<compile_context>
chip_gen: v7x
topology: tpu7x:2x2x1
jax: 0.10.0
libtpu: 0.0.40
codegen_flags: <defaults>
</compile_context>

<pallas_src>
import functools

import jax
import jax.numpy as jnp
from jax import lax
from jax.experimental import pallas as pl
from jax.experimental.pallas import tpu as pltpu


# Synthetic detector dimensions (config-built in the reference repo).
C_IN = 4       # input point-feature channels
C_READER = 16  # reader output channels
C_BACKBONE = 32
C_NECK = 16
N_CLS = 2
N_BOX = 14
C_HEAD = N_CLS + N_BOX  # fused head output channels


# ---------------------------------------------------------------------------
# Fused forward kernel: one grid step = one image, everything in VMEM.
# ---------------------------------------------------------------------------
def _detector_kernel(x_ref,                      # (1, H*W, C_IN)        f32
                     rd_w_ref, rd_b_ref,         # (C_IN, C_RD) bf16, (1, C_RD) f32
                     bb1_w_ref, bb1_b_ref,       # (9*C_RD, C_BB) bf16, (1, C_BB) f32
                     bb2_w_ref, bb2_b_ref,       # (9*C_BB, C_BB) bf16, (1, C_BB) f32
                     nk_w_ref, nk_b_ref,         # (C_BB, C_NK) bf16, (1, C_NK) f32
                     hd_w_ref, hd_b_ref,         # (C_HD, C_NK) bf16, (C_HD, 1) f32
                     o_ref,                      # (1, C_HD, H*W)        f32
                     pad1_ref, col1_ref,         # scratch: padded img / im2col (conv1)
                     pad2_ref, col2_ref,         # scratch: padded img / im2col (conv2)
                     *, H, W, c_rd, c_bb):
    HW = H * W

    def mm(act_f32, w_ref_):
        # bf16 MXU inputs, f32 accumulation.
        return jnp.dot(act_f32.astype(jnp.bfloat16), w_ref_[...],
                       preferred_element_type=jnp.float32)

    # ---- reader: per-pixel linear + ReLU (1x1 conv) -----------------------
    feat = jnp.maximum(mm(x_ref[0], rd_w_ref) + rd_b_ref[...], 0.0)   # (HW, c_rd)

    # ---- backbone conv1: 3x3, pad 1, ReLU (im2col -> single K=9*c_rd dot) --
    pad1_ref[...] = jnp.zeros_like(pad1_ref)
    pad1_ref[1:H + 1, 1:W + 1, :] = feat.reshape(H, W, c_rd)
    p1 = pad1_ref[...]
    for kh in range(3):
        for kw in range(3):
            t = kh * 3 + kw
            col1_ref[:, t * c_rd:(t + 1) * c_rd] = (
                p1[kh:kh + H, kw:kw + W, :].reshape(HW, c_rd))
    feat = jnp.maximum(mm(col1_ref[...], bb1_w_ref) + bb1_b_ref[...], 0.0)  # (HW, c_bb)

    # ---- backbone conv2: 3x3, pad 1, ReLU ----------------------------------
    pad2_ref[...] = jnp.zeros_like(pad2_ref)
    pad2_ref[1:H + 1, 1:W + 1, :] = feat.reshape(H, W, c_bb)
    p2 = pad2_ref[...]
    for kh in range(3):
        for kw in range(3):
            t = kh * 3 + kw
            col2_ref[:, t * c_bb:(t + 1) * c_bb] = (
                p2[kh:kh + H, kw:kw + W, :].reshape(HW, c_bb))
    feat = jnp.maximum(mm(col2_ref[...], bb2_w_ref) + bb2_b_ref[...], 0.0)  # (HW, c_bb)

    # ---- neck: 1x1 conv + ReLU ---------------------------------------------
    feat = jnp.maximum(mm(feat, nk_w_ref) + nk_b_ref[...], 0.0)             # (HW, c_nk)

    # ---- fused bbox_head (cls ++ box), channel-major output ----------------
    # hd_w is stored transposed (C_HD, C_NK); contract both operands on the
    # channel axis -> (C_HD, HW): lane dim HW is a multiple of 128 (dense
    # stores) and matches NCHW directly.
    head = lax.dot_general(hd_w_ref[...], feat.astype(jnp.bfloat16),
                           dimension_numbers=(((1,), (1,)), ((), ())),
                           preferred_element_type=jnp.float32)              # (C_HD, HW)
    o_ref[0] = (head + hd_b_ref[...]).astype(o_ref.dtype)


def _fused_forward(x_flat, wp, *, H, W):
    """x_flat: (N, H*W, C_IN) f32; wp: packed weight dict. Returns (N, C_HEAD, H*W)."""
    N, HW, c_in = x_flat.shape
    c_rd = wp["rd_w"].shape[1]
    c_bb = wp["bb1_w"].shape[1]
    c_hd = wp["hd_w"].shape[0]

    kernel = functools.partial(_detector_kernel, H=H, W=W, c_rd=c_rd, c_bb=c_bb)

    def const_spec(arr):
        nd = arr.ndim
        return pl.BlockSpec(arr.shape, lambda n, _nd=nd: (0,) * _nd)

    grid_spec = pltpu.PrefetchScalarGridSpec(
        num_scalar_prefetch=0,
        grid=(N,),
        in_specs=[
            pl.BlockSpec((1, HW, c_in), lambda n: (n, 0, 0)),
            const_spec(wp["rd_w"]), const_spec(wp["rd_b"]),
            const_spec(wp["bb1_w"]), const_spec(wp["bb1_b"]),
            const_spec(wp["bb2_w"]), const_spec(wp["bb2_b"]),
            const_spec(wp["nk_w"]), const_spec(wp["nk_b"]),
            const_spec(wp["hd_w"]), const_spec(wp["hd_b"]),
        ],
        out_specs=pl.BlockSpec((1, c_hd, HW), lambda n: (n, 0, 0)),
        scratch_shapes=[
            pltpu.VMEM((H + 2, W + 2, c_rd), jnp.float32),   # padded feat (conv1)
            pltpu.VMEM((HW, 9 * c_rd), jnp.float32),         # im2col     (conv1)
            pltpu.VMEM((H + 2, W + 2, c_bb), jnp.float32),   # padded feat (conv2)
            pltpu.VMEM((HW, 9 * c_bb), jnp.float32),         # im2col     (conv2)
        ],
    )

    return pl.pallas_call(
        kernel,
        out_shape=jax.ShapeDtypeStruct((N, c_hd, HW), jnp.float32),
        grid_spec=grid_spec,
        compiler_params=pltpu.CompilerParams(dimension_semantics=("parallel",)),
    )(x_flat, wp["rd_w"], wp["rd_b"], wp["bb1_w"], wp["bb1_b"],
      wp["bb2_w"], wp["bb2_b"], wp["nk_w"], wp["nk_b"],
      wp["hd_w"], wp["hd_b"])


# ---------------------------------------------------------------------------
# Parameters (conventional layout) + packing for the fused kernel
# ---------------------------------------------------------------------------
def init_params(key, c_in=C_IN, c_reader=C_READER, c_backbone=C_BACKBONE,
                c_neck=C_NECK, n_cls=N_CLS, n_box=N_BOX):
    ks = jax.random.split(key, 6)
    s = 0.1
    return {
        "reader_w": s * jax.random.normal(ks[0], (c_in, c_reader), jnp.float32),
        "reader_b": jnp.zeros((c_reader,), jnp.float32),
        "bb1_w": s * jax.random.normal(ks[1], (3, 3, c_reader, c_backbone), jnp.float32),
        "bb1_b": jnp.zeros((c_backbone,), jnp.float32),
        "bb2_w": s * jax.random.normal(ks[2], (3, 3, c_backbone, c_backbone), jnp.float32),
        "bb2_b": jnp.zeros((c_backbone,), jnp.float32),
        "neck_w": s * jax.random.normal(ks[3], (c_backbone, c_neck), jnp.float32),
        "neck_b": jnp.zeros((c_neck,), jnp.float32),
        "cls_w": s * jax.random.normal(ks[4], (c_neck, n_cls), jnp.float32),
        "cls_b": jnp.zeros((n_cls,), jnp.float32),
        "box_w": s * jax.random.normal(ks[5], (c_neck, n_box), jnp.float32),
        "box_b": jnp.zeros((n_box,), jnp.float32),
    }


def _pack_weights(p):
    c_reader = p["reader_w"].shape[1]
    c_backbone = p["bb1_w"].shape[-1]
    return {
        "rd_w": p["reader_w"].astype(jnp.bfloat16),
        "rd_b": p["reader_b"].reshape(1, -1),
        # (3,3,Cin,Cout) -> (9*Cin, Cout): row t*Cin+c matches the im2col
        # column layout col[:, t*Cin:(t+1)*Cin] with t = kh*3+kw.
        "bb1_w": p["bb1_w"].reshape(9 * c_reader, c_backbone).astype(jnp.bfloat16),
        "bb1_b": p["bb1_b"].reshape(1, -1),
        "bb2_w": p["bb2_w"].reshape(9 * c_backbone, c_backbone).astype(jnp.bfloat16),
        "bb2_b": p["bb2_b"].reshape(1, -1),
        "nk_w": p["neck_w"].astype(jnp.bfloat16),
        "nk_b": p["neck_b"].reshape(1, -1),
        # fused (cls ++ box) head, stored transposed for the channel-major dot
        "hd_w": jnp.concatenate([p["cls_w"], p["box_w"]], axis=1).T.astype(jnp.bfloat16),
        "hd_b": jnp.concatenate([p["cls_b"], p["box_b"]], axis=0).reshape(-1, 1),
    }


# ---------------------------------------------------------------------------
# SingleStageDetector forward (extract_feat + bbox_head)
# ---------------------------------------------------------------------------
@jax.jit
def single_stage_detector_forward(x_nchw, params):
    N, c_in, H, W = x_nchw.shape
    # NCHW -> (N, H*W, C) once; all intermediates stay inside the fused kernel.
    x = jnp.transpose(x_nchw, (0, 2, 3, 1)).reshape(N, H * W, c_in).astype(jnp.float32)
    wp = _pack_weights(params)
    out = _fused_forward(x, wp, H=H, W=W)          # (N, C_HEAD, H*W), channel-major
    out = out.reshape(N, C_HEAD, H, W)             # already NCHW
    cls_score = out[:, :N_CLS]
    bbox_pred = out[:, N_CLS:]
    # TODO(synk): loss computation / box decoding (train_cfg / test_cfg paths)
    # are config-driven in the reference repo and not part of this kernel.
    return cls_score, bbox_pred


if __name__ == "__main__":
    key = jax.random.PRNGKey(0)
    x = jax.random.normal(key, (2, C_IN, 16, 16), dtype=jnp.float32)  # NCHW
    params = init_params(jax.random.PRNGKey(42))

    cls_score, bbox_pred = single_stage_detector_forward(x, params)
    jax.block_until_ready((cls_score, bbox_pred))

    assert cls_score.shape == (2, N_CLS, 16, 16)
    assert bbox_pred.shape == (2, N_BOX, 16, 16)
    print("KERNEL_OK")
</pallas_src>

<mosaic_0001>
module attributes {stable_mosaic.version = 11 : i64} {
  func.func @_detector_kernel(%arg0: i32, %arg1: memref<1x256x4xf32, #tpu.memory_space<vmem>>, %arg2: memref<4x16xbf16, #tpu.memory_space<vmem>>, %arg3: memref<1x16xf32, #tpu.memory_space<vmem>>, %arg4: memref<144x32xbf16, #tpu.memory_space<vmem>>, %arg5: memref<1x32xf32, #tpu.memory_space<vmem>>, %arg6: memref<288x32xbf16, #tpu.memory_space<vmem>>, %arg7: memref<1x32xf32, #tpu.memory_space<vmem>>, %arg8: memref<32x16xbf16, #tpu.memory_space<vmem>>, %arg9: memref<1x16xf32, #tpu.memory_space<vmem>>, %arg10: memref<16x16xbf16, #tpu.memory_space<vmem>>, %arg11: memref<16x1xf32, #tpu.memory_space<vmem>>, %arg12: memref<1x16x256xf32, #tpu.memory_space<vmem>>, %arg13: memref<18x18x16xf32, #tpu.memory_space<vmem>>, %arg14: memref<256x144xf32, #tpu.memory_space<vmem>>, %arg15: memref<18x18x32xf32, #tpu.memory_space<vmem>>, %arg16: memref<256x288xf32, #tpu.memory_space<vmem>>) attributes {dimension_semantics = [#tpu.dimension_semantics<parallel>], iteration_bounds = array<i64: 2>, scalar_prefetch = 0 : i64, scratch_operands = 4 : i64, tpu.core_type = #tpu.core_type<tc>, window_params = [{transform_indices = @transform_0, window_bounds = array<i64: 1, 256, 4>}, {pipeline_mode = #tpu.pipeline_mode<synchronous>, transform_indices = @transform_1, window_bounds = array<i64: 4, 16>}, {pipeline_mode = #tpu.pipeline_mode<synchronous>, transform_indices = @transform_2, window_bounds = array<i64: 1, 16>}, {pipeline_mode = #tpu.pipeline_mode<synchronous>, transform_indices = @transform_3, window_bounds = array<i64: 144, 32>}, {pipeline_mode = #tpu.pipeline_mode<synchronous>, transform_indices = @transform_4, window_bounds = array<i64: 1, 32>}, {pipeline_mode = #tpu.pipeline_mode<synchronous>, transform_indices = @transform_5, window_bounds = array<i64: 288, 32>}, {pipeline_mode = #tpu.pipeline_mode<synchronous>, transform_indices = @transform_6, window_bounds = array<i64: 1, 32>}, {pipeline_mode = #tpu.pipeline_mode<synchronous>, transform_indices = @transform_7, window_bounds = array<i64: 32, 16>}, {pipeline_mode = #tpu.pipeline_mode<synchronous>, transform_indices = @transform_8, window_bounds = array<i64: 1, 16>}, {pipeline_mode = #tpu.pipeline_mode<synchronous>, transform_indices = @transform_9, window_bounds = array<i64: 16, 16>}, {pipeline_mode = #tpu.pipeline_mode<synchronous>, transform_indices = @transform_10, window_bounds = array<i64: 16, 1>}, {transform_indices = @transform_11, window_bounds = array<i64: 1, 16, 256>}]} {
    %c0 = arith.constant 0 : index
    %c0_0 = arith.constant 0 : index
    %c0_1 = arith.constant 0 : index
    %0 = vector.load %arg1[%c0, %c0_0, %c0_1] : memref<1x256x4xf32, #tpu.memory_space<vmem>>, vector<1x256x4xf32>
    %1 = vector.shape_cast %0 : vector<1x256x4xf32> to vector<256x4xf32>
    %2 = arith.truncf %1 : vector<256x4xf32> to vector<256x4xbf16>
    %c0_2 = arith.constant 0 : index
    %c0_3 = arith.constant 0 : index
    %3 = vector.load %arg2[%c0_2, %c0_3] : memref<4x16xbf16, #tpu.memory_space<vmem>>, vector<4x16xbf16>
    %cst = arith.constant dense<0.000000e+00> : vector<256x16xf32>
    %4 = tpu.matmul %2, %3, %cst {dimension_numbers = #tpu.dot_dimension_numbers<[1], [0], [0], [1], [0, 0, 1, 1], [], []>} : vector<256x4xbf16>, vector<4x16xbf16>, vector<256x16xf32> -> vector<256x16xf32>
    %c0_4 = arith.constant 0 : index
    %c0_5 = arith.constant 0 : index
    %5 = vector.load %arg3[%c0_4, %c0_5] : memref<1x16xf32, #tpu.memory_space<vmem>>, vector<1x16xf32>
    %6 = vector.broadcast %5 : vector<1x16xf32> to vector<256x16xf32>
    %7 = arith.addf %4, %6 : vector<256x16xf32>
    %cst_6 = arith.constant 0.000000e+00 : f32
    %8 = vector.broadcast %cst_6 : f32 to vector<256x16xf32>
    %9 = arith.maximumf %7, %8 : vector<256x16xf32>
    %cst_7 = arith.constant 0.000000e+00 : f32
    %10 = vector.broadcast %cst_7 : f32 to vector<18x18x16xf32>
    %c0_8 = arith.constant 0 : index
    %c0_9 = arith.constant 0 : index
    %c0_10 = arith.constant 0 : index
    %11 = vector.load %arg13[%c0_8, %c0_9, %c0_10] : memref<18x18x16xf32, #tpu.memory_space<vmem>>, vector<18x18x16xf32>
    tpu.vector_store %arg13[%c0_8, %c0_9, %c0_10], %10 {strides = array<i32>} : memref<18x18x16xf32, #tpu.memory_space<vmem>>, vector<18x18x16xf32>,
    %12 = vector.shape_cast %9 : vector<256x16xf32> to vector<16x16x16xf32>
    %c1 = arith.constant 1 : index
    %c1_11 = arith.constant 1 : index
    %c0_12 = arith.constant 0 : index
    %13 = vector.load %arg13[%c1, %c1_11, %c0_12] : memref<18x18x16xf32, #tpu.memory_space<vmem>>, vector<16x16x16xf32>
    tpu.vector_store %arg13[%c1, %c1_11, %c0_12], %12 {strides = array<i32>} : memref<18x18x16xf32, #tpu.memory_space<vmem>>, vector<16x16x16xf32>,
    %c0_13 = arith.constant 0 : index
    %c0_14 = arith.constant 0 : index
    %c0_15 = arith.constant 0 : index
    %14 = vector.load %arg13[%c0_13, %c0_14, %c0_15] : memref<18x18x16xf32, #tpu.memory_space<vmem>>, vector<18x18x16xf32>
    %15 = vector.extract_strided_slice %14 {offsets = [0, 0, 0], sizes = [16, 16, 16], strides = [1, 1, 1]} : vector<18x18x16xf32> to vector<16x16x16xf32>
    %16 = vector.shape_cast %15 : vector<16x16x16xf32> to vector<256x16xf32>
    %c0_16 = arith.constant 0 : index
    %c0_17 = arith.constant 0 : index
    %17 = vector.load %arg14[%c0_16, %c0_17] : memref<256x144xf32, #tpu.memory_space<vmem>>, vector<256x16xf32>
    tpu.vector_store %arg14[%c0_16, %c0_17], %16 {strides = array<i32>} : memref<256x144xf32, #tpu.memory_space<vmem>>, vector<256x16xf32>,
    %18 = vector.extract_strided_slice %14 {offsets = [0, 1, 0], sizes = [16, 16, 16], strides = [1, 1, 1]} : vector<18x18x16xf32> to vector<16x16x16xf32>
    %19 = vector.shape_cast %18 : vector<16x16x16xf32> to vector<256x16xf32>
    %c0_18 = arith.constant 0 : index
    %c16 = arith.constant 16 : index
    %20 = vector.load %arg14[%c0_18, %c16] : memref<256x144xf32, #tpu.memory_space<vmem>>, vector<256x16xf32>
    tpu.vector_store %arg14[%c0_18, %c16], %19 {strides = array<i32>} : memref<256x144xf32, #tpu.memory_space<vmem>>, vector<256x16xf32>,
    %21 = vector.extract_strided_slice %14 {offsets = [0, 2, 0], sizes = [16, 16, 16], strides = [1, 1, 1]} : vector<18x18x16xf32> to vector<16x16x16xf32>
    %22 = vector.shape_cast %21 : vector<16x16x16xf32> to vector<256x16xf32>
    %c0_19 = arith.constant 0 : index
    %c32 = arith.constant 32 : index
    %23 = vector.load %arg14[%c0_19, %c32] : memref<256x144xf32, #tpu.memory_space<vmem>>, vector<256x16xf32>
    tpu.vector_store %arg14[%c0_19, %c32], %22 {strides = array<i32>} : memref<256x144xf32, #tpu.memory_space<vmem>>, vector<256x16xf32>,
    %24 = vector.extract_strided_slice %14 {offsets = [1, 0, 0], sizes = [16, 16, 16], strides = [1, 1, 1]} : vector<18x18x16xf32> to vector<16x16x16xf32>
    %25 = vector.shape_cast %24 : vector<16x16x16xf32> to vector<256x16xf32>
    %c0_20 = arith.constant 0 : index
    %c48 = arith.constant 48 : index
    %26 = vector.load %arg14[%c0_20, %c48] : memref<256x144xf32, #tpu.memory_space<vmem>>, vector<256x16xf32>
    tpu.vector_store %arg14[%c0_20, %c48], %25 {strides = array<i32>} : memref<256x144xf32, #tpu.memory_space<vmem>>, vector<256x16xf32>,
    %27 = vector.extract_strided_slice %14 {offsets = [1, 1, 0], sizes = [16, 16, 16], strides = [1, 1, 1]} : vector<18x18x16xf32> to vector<16x16x16xf32>
    %28 = vector.shape_cast %27 : vector<16x16x16xf32> to vector<256x16xf32>
    %c0_21 = arith.constant 0 : index
    %c64 = arith.constant 64 : index
    %29 = vector.load %arg14[%c0_21, %c64] : memref<256x144xf32, #tpu.memory_space<vmem>>, vector<256x16xf32>
    tpu.vector_store %arg14[%c0_21, %c64], %28 {strides = array<i32>} : memref<256x144xf32, #tpu.memory_space<vmem>>, vector<256x16xf32>,
    %30 = vector.extract_strided_slice %14 {offsets = [1, 2, 0], sizes = [16, 16, 16], strides = [1, 1, 1]} : vector<18x18x16xf32> to vector<16x16x16xf32>
    %31 = vector.shape_cast %30 : vector<16x16x16xf32> to vector<256x16xf32>
    %c0_22 = arith.constant 0 : index
    %c80 = arith.constant 80 : index
    %32 = vector.load %arg14[%c0_22, %c80] : memref<256x144xf32, #tpu.memory_space<vmem>>, vector<256x16xf32>
    tpu.vector_store %arg14[%c0_22, %c80], %31 {strides = array<i32>} : memref<256x144xf32, #tpu.memory_space<vmem>>, vector<256x16xf32>,
    %33 = vector.extract_strided_slice %14 {offsets = [2, 0, 0], sizes = [16, 16, 16], strides = [1, 1, 1]} : vector<18x18x16xf32> to vector<16x16x16xf32>
    %34 = vector.shape_cast %33 : vector<16x16x16xf32> to vector<256x16xf32>
    %c0_23 = arith.constant 0 : index
    %c96 = arith.constant 96 : index
    %35 = vector.load %arg14[%c0_23, %c96] : memref<256x144xf32, #tpu.memory_space<vmem>>, vector<256x16xf32>
    tpu.vector_store %arg14[%c0_23, %c96], %34 {strides = array<i32>} : memref<256x144xf32, #tpu.memory_space<vmem>>, vector<256x16xf32>,
    %36 = vector.extract_strided_slice %14 {offsets = [2, 1, 0], sizes = [16, 16, 16], strides = [1, 1, 1]} : vector<18x18x16xf32> to vector<16x16x16xf32>
    %37 = vector.shape_cast %36 : vector<16x16x16xf32> to vector<256x16xf32>
    %c0_24 = arith.constant 0 : index
    %c112 = arith.constant 112 : index
    %38 = vector.load %arg14[%c0_24, %c112] : memref<256x144xf32, #tpu.memory_space<vmem>>, vector<256x16xf32>
    tpu.vector_store %arg14[%c0_24, %c112], %37 {strides = array<i32>} : memref<256x144xf32, #tpu.memory_space<vmem>>, vector<256x16xf32>,
    %39 = vector.extract_strided_slice %14 {offsets = [2, 2, 0], sizes = [16, 16, 16], strides = [1, 1, 1]} : vector<18x18x16xf32> to vector<16x16x16xf32>
    %40 = vector.shape_cast %39 : vector<16x16x16xf32> to vector<256x16xf32>
    %c0_25 = arith.constant 0 : index
    %c128 = arith.constant 128 : index
    %41 = vector.load %arg14[%c0_25, %c128] : memref<256x144xf32, #tpu.memory_space<vmem>>, vector<256x16xf32>
    tpu.vector_store %arg14[%c0_25, %c128], %40 {strides = array<i32>} : memref<256x144xf32, #tpu.memory_space<vmem>>, vector<256x16xf32>,
    %c0_26 = arith.constant 0 : index
    %c0_27 = arith.constant 0 : index
    %42 = vector.load %arg14[%c0_26, %c0_27] : memref<256x144xf32, #tpu.memory_space<vmem>>, vector<256x144xf32>
    %43 = arith.truncf %42 : vector<256x144xf32> to vector<256x144xbf16>
    %c0_28 = arith.constant 0 : index
    %c0_29 = arith.constant 0 : index
    %44 = vector.load %arg4[%c0_28, %c0_29] : memref<144x32xbf16, #tpu.memory_space<vmem>>, vector<144x32xbf16>
    %cst_30 = arith.constant dense<0.000000e+00> : vector<256x32xf32>
    %45 = tpu.matmul %43, %44, %cst_30 {dimension_numbers = #tpu.dot_dimension_numbers<[1], [0], [0], [1], [0, 0, 1, 1], [], []>} : vector<256x144xbf16>, vector<144x32xbf16>, vector<256x32xf32> -> vector<256x32xf32>
    %c0_31 = arith.constant 0 : index
    %c0_32 = arith.constant 0 : index
    %46 = vector.load %arg5[%c0_31, %c0_32] : memref<1x32xf32, #tpu.memory_space<vmem>>, vector<1x32xf32>
    %47 = vector.broadcast %46 : vector<1x32xf32> to vector<256x32xf32>
    %48 = arith.addf %45, %47 : vector<256x32xf32>
    %cst_33 = arith.constant 0.000000e+00 : f32
    %49 = vector.broadcast %cst_33 : f32 to vector<256x32xf32>
    %50 = arith.maximumf %48, %49 : vector<256x32xf32>
    %cst_34 = arith.constant 0.000000e+00 : f32
    %51 = vector.broadcast %cst_34 : f32 to vector<18x18x32xf32>
    %c0_35 = arith.constant 0 : index
    %c0_36 = arith.constant 0 : index
    %c0_37 = arith.constant 0 : index
    %52 = vector.load %arg15[%c0_35, %c0_36, %c0_37] : memref<18x18x32xf32, #tpu.memory_space<vmem>>, vector<18x18x32xf32>
    tpu.vector_store %arg15[%c0_35, %c0_36, %c0_37], %51 {strides = array<i32>} : memref<18x18x32xf32, #tpu.memory_space<vmem>>, vector<18x18x32xf32>,
    %53 = vector.shape_cast %50 : vector<256x32xf32> to vector<16x16x32xf32>
    %c1_38 = arith.constant 1 : index
    %c1_39 = arith.constant 1 : index
    %c0_40 = arith.constant 0 : index
    %54 = vector.load %arg15[%c1_38, %c1_39, %c0_40] : memref<18x18x32xf32, #tpu.memory_space<vmem>>, vector<16x16x32xf32>
    tpu.vector_store %arg15[%c1_38, %c1_39, %c0_40], %53 {strides = array<i32>} : memref<18x18x32xf32, #tpu.memory_space<vmem>>, vector<16x16x32xf32>,
    %c0_41 = arith.constant 0 : index
    %c0_42 = arith.constant 0 : index
    %c0_43 = arith.constant 0 : index
    %55 = vector.load %arg15[%c0_41, %c0_42, %c0_43] : memref<18x18x32xf32, #tpu.memory_space<vmem>>, vector<18x18x32xf32>
    %56 = vector.extract_strided_slice %55 {offsets = [0, 0, 0], sizes = [16, 16, 32], strides = [1, 1, 1]} : vector<18x18x32xf32> to vector<16x16x32xf32>
    %57 = vector.shape_cast %56 : vector<16x16x32xf32> to vector<256x32xf32>
    %c0_44 = arith.constant 0 : index
    %c0_45 = arith.constant 0 : index
    %58 = vector.load %arg16[%c0_44, %c0_45] : memref<256x288xf32, #tpu.memory_space<vmem>>, vector<256x32xf32>
    tpu.vector_store %arg16[%c0_44, %c0_45], %57 {strides = array<i32>} : memref<256x288xf32, #tpu.memory_space<vmem>>, vector<256x32xf32>,
    %59 = vector.extract_strided_slice %55 {offsets = [0, 1, 0], sizes = [16, 16, 32], strides = [1, 1, 1]} : vector<18x18x32xf32> to vector<16x16x32xf32>
    %60 = vector.shape_cast %59 : vector<16x16x32xf32> to vector<256x32xf32>
    %c0_46 = arith.constant 0 : index
    %c32_47 = arith.constant 32 : index
    %61 = vector.load %arg16[%c0_46, %c32_47] : memref<256x288xf32, #tpu.memory_space<vmem>>, vector<256x32xf32>
    tpu.vector_store %arg16[%c0_46, %c32_47], %60 {strides = array<i32>} : memref<256x288xf32, #tpu.memory_space<vmem>>, vector<256x32xf32>,
    %62 = vector.extract_strided_slice %55 {offsets = [0, 2, 0], sizes = [16, 16, 32], strides = [1, 1, 1]} : vector<18x18x32xf32> to vector<16x16x32xf32>
    %63 = vector.shape_cast %62 : vector<16x16x32xf32> to vector<256x32xf32>
    %c0_48 = arith.constant 0 : index
    %c64_49 = arith.constant 64 : index
    %64 = vector.load %arg16[%c0_48, %c64_49] : memref<256x288xf32, #tpu.memory_space<vmem>>, vector<256x32xf32>
    tpu.vector_store %arg16[%c0_48, %c64_49], %63 {strides = array<i32>} : memref<256x288xf32, #tpu.memory_space<vmem>>, vector<256x32xf32>,
    %65 = vector.extract_strided_slice %55 {offsets = [1, 0, 0], sizes = [16, 16, 32], strides = [1, 1, 1]} : vector<18x18x32xf32> to vector<16x16x32xf32>
    %66 = vector.shape_cast %65 : vector<16x16x32xf32> to vector<256x32xf32>
    %c0_50 = arith.constant 0 : index
    %c96_51 = arith.constant 96 : index
    %67 = vector.load %arg16[%c0_50, %c96_51] : memref<256x288xf32, #tpu.memory_space<vmem>>, vector<256x32xf32>
    tpu.vector_store %arg16[%c0_50, %c96_51], %66 {strides = array<i32>} : memref<256x288xf32, #tpu.memory_space<vmem>>, vector<256x32xf32>,
    %68 = vector.extract_strided_slice %55 {offsets = [1, 1, 0], sizes = [16, 16, 32], strides = [1, 1, 1]} : vector<18x18x32xf32> to vector<16x16x32xf32>
    %69 = vector.shape_cast %68 : vector<16x16x32xf32> to vector<256x32xf32>
    %c0_52 = arith.constant 0 : index
    %c128_53 = arith.constant 128 : index
    %70 = vector.load %arg16[%c0_52, %c128_53] : memref<256x288xf32, #tpu.memory_space<vmem>>, vector<256x32xf32>
    tpu.vector_store %arg16[%c0_52, %c128_53], %69 {strides = array<i32>} : memref<256x288xf32, #tpu.memory_space<vmem>>, vector<256x32xf32>,
    %71 = vector.extract_strided_slice %55 {offsets = [1, 2, 0], sizes = [16, 16, 32], strides = [1, 1, 1]} : vector<18x18x32xf32> to vector<16x16x32xf32>
    %72 = vector.shape_cast %71 : vector<16x16x32xf32> to vector<256x32xf32>
    %c0_54 = arith.constant 0 : index
    %c160 = arith.constant 160 : index
    %73 = vector.load %arg16[%c0_54, %c160] : memref<256x288xf32, #tpu.memory_space<vmem>>, vector<256x32xf32>
    tpu.vector_store %arg16[%c0_54, %c160], %72 {strides = array<i32>} : memref<256x288xf32, #tpu.memory_space<vmem>>, vector<256x32xf32>,
    %74 = vector.extract_strided_slice %55 {offsets = [2, 0, 0], sizes = [16, 16, 32], strides = [1, 1, 1]} : vector<18x18x32xf32> to vector<16x16x32xf32>
    %75 = vector.shape_cast %74 : vector<16x16x32xf32> to vector<256x32xf32>
    %c0_55 = arith.constant 0 : index
    %c192 = arith.constant 192 : index
    %76 = vector.load %arg16[%c0_55, %c192] : memref<256x288xf32, #tpu.memory_space<vmem>>, vector<256x32xf32>
    tpu.vector_store %arg16[%c0_55, %c192], %75 {strides = array<i32>} : memref<256x288xf32, #tpu.memory_space<vmem>>, vector<256x32xf32>,
    %77 = vector.extract_strided_slice %55 {offsets = [2, 1, 0], sizes = [16, 16, 32], strides = [1, 1, 1]} : vector<18x18x32xf32> to vector<16x16x32xf32>
    %78 = vector.shape_cast %77 : vector<16x16x32xf32> to vector<256x32xf32>
    %c0_56 = arith.constant 0 : index
    %c224 = arith.constant 224 : index
    %79 = vector.load %arg16[%c0_56, %c224] : memref<256x288xf32, #tpu.memory_space<vmem>>, vector<256x32xf32>
    tpu.vector_store %arg16[%c0_56, %c224], %78 {strides = array<i32>} : memref<256x288xf32, #tpu.memory_space<vmem>>, vector<256x32xf32>,
    %80 = vector.extract_strided_slice %55 {offsets = [2, 2, 0], sizes = [16, 16, 32], strides = [1, 1, 1]} : vector<18x18x32xf32> to vector<16x16x32xf32>
    %81 = vector.shape_cast %80 : vector<16x16x32xf32> to vector<256x32xf32>
    %c0_57 = arith.constant 0 : index
    %c256 = arith.constant 256 : index
    %82 = vector.load %arg16[%c0_57, %c256] : memref<256x288xf32, #tpu.memory_space<vmem>>, vector<256x32xf32>
    tpu.vector_store %arg16[%c0_57, %c256], %81 {strides = array<i32>} : memref<256x288xf32, #tpu.memory_space<vmem>>, vector<256x32xf32>,
    %c0_58 = arith.constant 0 : index
    %c0_59 = arith.constant 0 : index
    %83 = vector.load %arg16[%c0_58, %c0_59] : memref<256x288xf32, #tpu.memory_space<vmem>>, vector<256x288xf32>
    %84 = arith.truncf %83 : vector<256x288xf32> to vector<256x288xbf16>
    %c0_60 = arith.constant 0 : index
    %c0_61 = arith.constant 0 : index
    %85 = vector.load %arg6[%c0_60, %c0_61] : memref<288x32xbf16, #tpu.memory_space<vmem>>, vector<288x32xbf16>
    %cst_62 = arith.constant dense<0.000000e+00> : vector<256x32xf32>
    %86 = tpu.matmul %84, %85, %cst_62 {dimension_numbers = #tpu.dot_dimension_numbers<[1], [0], [0], [1], [0, 0, 1, 1], [], []>} : vector<256x288xbf16>, vector<288x32xbf16>, vector<256x32xf32> -> vector<256x32xf32>
    %c0_63 = arith.constant 0 : index
    %c0_64 = arith.constant 0 : index
    %87 = vector.load %arg7[%c0_63, %c0_64] : memref<1x32xf32, #tpu.memory_space<vmem>>, vector<1x32xf32>
    %88 = vector.broadcast %87 : vector<1x32xf32> to vector<256x32xf32>
    %89 = arith.addf %86, %88 : vector<256x32xf32>
    %cst_65 = arith.constant 0.000000e+00 : f32
    %90 = vector.broadcast %cst_65 : f32 to vector<256x32xf32>
    %91 = arith.maximumf %89, %90 : vector<256x32xf32>
    %92 = arith.truncf %91 : vector<256x32xf32> to vector<256x32xbf16>
    %c0_66 = arith.constant 0 : index
    %c0_67 = arith.constant 0 : index
    %93 = vector.load %arg8[%c0_66, %c0_67] : memref<32x16xbf16, #tpu.memory_space<vmem>>, vector<32x16xbf16>
    %cst_68 = arith.constant dense<0.000000e+00> : vector<256x16xf32>
    %94 = tpu.matmul %92, %93, %cst_68 {dimension_numbers = #tpu.dot_dimension_numbers<[1], [0], [0], [1], [0, 0, 1, 1], [], []>} : vector<256x32xbf16>, vector<32x16xbf16>, vector<256x16xf32> -> vector<256x16xf32>
    %c0_69 = arith.constant 0 : index
    %c0_70 = arith.constant 0 : index
    %95 = vector.load %arg9[%c0_69, %c0_70] : memref<1x16xf32, #tpu.memory_space<vmem>>, vector<1x16xf32>
    %96 = vector.broadcast %95 : vector<1x16xf32> to vector<256x16xf32>
    %97 = arith.addf %94, %96 : vector<256x16xf32>
    %cst_71 = arith.constant 0.000000e+00 : f32
    %98 = vector.broadcast %cst_71 : f32 to vector<256x16xf32>
    %99 = arith.maximumf %97, %98 : vector<256x16xf32>
    %c0_72 = arith.constant 0 : index
    %c0_73 = arith.constant 0 : index
    %100 = vector.load %arg10[%c0_72, %c0_73] : memref<16x16xbf16, #tpu.memory_space<vmem>>, vector<16x16xbf16>
    %101 = arith.truncf %99 : vector<256x16xf32> to vector<256x16xbf16>
    %cst_74 = arith.constant dense<0.000000e+00> : vector<16x256xf32>
    %102 = tpu.matmul %100, %101, %cst_74 {dimension_numbers = #tpu.dot_dimension_numbers<[1], [1], [0], [0], [0, 0, 1, 0], [], []>} : vector<16x16xbf16>, vector<256x16xbf16>, vector<16x256xf32> -> vector<16x256xf32>
    %c0_75 = arith.constant 0 : index
    %c0_76 = arith.constant 0 : index
    %103 = vector.load %arg11[%c0_75, %c0_76] : memref<16x1xf32, #tpu.memory_space<vmem>>, vector<16x1xf32>
    %104 = vector.broadcast %103 : vector<16x1xf32> to vector<16x256xf32>
    %105 = arith.addf %102, %104 : vector<16x256xf32>
    %c0_77 = arith.constant 0 : index
    %c0_78 = arith.constant 0 : index
    %c0_79 = arith.constant 0 : index
    %106 = vector.load %arg12[%c0_77, %c0_78, %c0_79] : memref<1x16x256xf32, #tpu.memory_space<vmem>>, vector<1x16x256xf32>
    %107 = vector.shape_cast %106 : vector<1x16x256xf32> to vector<16x256xf32>
    %108 = vector.shape_cast %105 : vector<16x256xf32> to vector<1x16x256xf32>
    tpu.vector_store %arg12[%c0_77, %c0_78, %c0_79], %108 {strides = array<i32>} : memref<1x16x256xf32, #tpu.memory_space<vmem>>, vector<1x16x256xf32>,
    return
  }
  func.func @transform_0(%arg0: i32) -> (i32, i32, i32) {
    %c0_i32 = arith.constant 0 : i32
    %c0_i32_0 = arith.constant 0 : i32
    %c0_i32_1 = arith.constant 0 : i32
    return %arg0, %c0_i32, %c0_i32_0 : i32, i32, i32
  }
  func.func @transform_1(%arg0: i32) -> (i32, i32) {
    %c0_i32 = arith.constant 0 : i32
    %c0_i32_0 = arith.constant 0 : i32
    %c0_i32_1 = arith.constant 0 : i32
    return %c0_i32, %c0_i32_0 : i32, i32
  }
  func.func @transform_2(%arg0: i32) -> (i32, i32) {
    %c0_i32 = arith.constant 0 : i32
    %c0_i32_0 = arith.constant 0 : i32
    %c0_i32_1 = arith.constant 0 : i32
    return %c0_i32, %c0_i32_0 : i32, i32
  }
  func.func @transform_3(%arg0: i32) -> (i32, i32) {
    %c0_i32 = arith.constant 0 : i32
    %c0_i32_0 = arith.constant 0 : i32
    %c0_i32_1 = arith.constant 0 : i32
    return %c0_i32, %c0_i32_0 : i32, i32
  }
  func.func @transform_4(%arg0: i32) -> (i32, i32) {
    %c0_i32 = arith.constant 0 : i32
    %c0_i32_0 = arith.constant 0 : i32
    %c0_i32_1 = arith.constant 0 : i32
    return %c0_i32, %c0_i32_0 : i32, i32
  }
  func.func @transform_5(%arg0: i32) -> (i32, i32) {
    %c0_i32 = arith.constant 0 : i32
    %c0_i32_0 = arith.constant 0 : i32
    %c0_i32_1 = arith.constant 0 : i32
    return %c0_i32, %c0_i32_0 : i32, i32
  }
  func.func @transform_6(%arg0: i32) -> (i32, i32) {
    %c0_i32 = arith.constant 0 : i32
    %c0_i32_0 = arith.constant 0 : i32
    %c0_i32_1 = arith.constant 0 : i32
    return %c0_i32, %c0_i32_0 : i32, i32
  }
  func.func @transform_7(%arg0: i32) -> (i32, i32) {
    %c0_i32 = arith.constant 0 : i32
    %c0_i32_0 = arith.constant 0 : i32
    %c0_i32_1 = arith.constant 0 : i32
    return %c0_i32, %c0_i32_0 : i32, i32
  }
  func.func @transform_8(%arg0: i32) -> (i32, i32) {
    %c0_i32 = arith.constant 0 : i32
    %c0_i32_0 = arith.constant 0 : i32
    %c0_i32_1 = arith.constant 0 : i32
    return %c0_i32, %c0_i32_0 : i32, i32
  }
  func.func @transform_9(%arg0: i32) -> (i32, i32) {
    %c0_i32 = arith.constant 0 : i32
    %c0_i32_0 = arith.constant 0 : i32
    %c0_i32_1 = arith.constant 0 : i32
    return %c0_i32, %c0_i32_0 : i32, i32
  }
  func.func @transform_10(%arg0: i32) -> (i32, i32) {
    %c0_i32 = arith.constant 0 : i32
    %c0_i32_0 = arith.constant 0 : i32
    %c0_i32_1 = arith.constant 0 : i32
    return %c0_i32, %c0_i32_0 : i32, i32
  }
  func.func @transform_11(%arg0: i32) -> (i32, i32, i32) {
    %c0_i32 = arith.constant 0 : i32
    %c0_i32_0 = arith.constant 0 : i32
    %c0_i32_1 = arith.constant 0 : i32
    return %arg0, %c0_i32, %c0_i32_0 : i32, i32, i32
  }
}

</mosaic_0001>

<bundles_post_ra>
// kernel: single_stage_detector_forward.1
= control target key start
LH: loop header
LB: loop body
LE: loop exit
PB: predicated region body
PF: predicated region fallthrough
CT: control target
= control target key end

     0   :  { %s5499_s17 = smov 0   ;;  %s8555_s0 = inlined_call_operand.vmem [shape: f32[2,256,4], index: 0, kind: input, shape index: {}]   ;;  %s8556_s1 = inlined_call_operand.vmem [shape: bf16[4,16], index: 1, kind: input, shape index: {}]   ;;  %s8557_s2 = inlined_call_operand.vmem [shape: f32[1,16], index: 2, kind: input, shape index: {}]   ;;  %s8558_s3 = inlined_call_operand.vmem [shape: bf16[144,32], index: 3, kind: input, shape index: {}]   ;;  %s8559_s4 = inlined_call_operand.vmem [shape: f32[1,32], index: 4, kind: input, shape index: {}]   ;;  %s8560_s5 = inlined_call_operand.vmem [shape: bf16[288,32], index: 5, kind: input, shape index: {}]   ;;  %s8561_s6 = inlined_call_operand.vmem [shape: f32[1,32], index: 6, kind: input, shape index: {}]   ;;  %s8562_s7 = inlined_call_operand.vmem [shape: bf16[32,16], index: 7, kind: input, shape index: {}]   ;;  %s8563_s8 = inlined_call_operand.vmem [shape: f32[1,16], index: 8, kind: input, shape index: {}]   ;;  %s8564_s9 = inlined_call_operand.vmem [shape: bf16[16,16], index: 9, kind: input, shape index: {}]   ;;  %s8565_s10 = inlined_call_operand.vmem [shape: f32[16,1], index: 10, kind: input, shape index: {}]   ;;  %s8566_s11 = inlined_call_operand.vmem [shape: f32[2,16,256], index: 11, kind: output, shape index: {}]  }
   0x1 LB: > { %s4957_s18 = sadd.s32 4294967295, %s5428_s17   ;;  %p4961_p0 = scmp.ge.s32.totalorder %s5428_s17, 1  ;;  %s5428_s17 = sphi %s5499_s17, %s21_s17  }
   0x2   : > { %p337_p1 = scmp.lt.s32.totalorder %s5428_s17, 3 }
   0x4   : > { %p338_p2 = pnand %p4961_p0, %p337_p1 }
   0x6   : > { %341 = sbr.rel (%p338_p2) target bundleno = 1910 (0x776), region = 64 }
   0xd   : > { %v436_v0 = vld [vmem:[%s8556_s1] sm:$0x3]  ;;  %vm493_vm0 = vcmask 1041408   ;;  %p377_p3 = scmp.lt.s32.totalorder %s4957_s18, 1  ;;  %vm444_vm1 = vcmask 31744   ;;  %vm690_vm2 = vcmask 130048  }
   0xe   : > { %5360 = vmatprep.subr.msk.bf16.mxu0 %vm493_vm0, %v436_v0  ;;  %v495_v1 = vsel %vm493_vm0, %v436_v0, 0  ;;  %5361 = vmatprep.subr.msk.bf16.mxu1 %vm493_vm0, %v436_v0  ;;  %v8567_v32 = vmov 0.0   ;;  %vm693_vm3 = vcmask 123904   ;;  %vm913_vm4 = vcmask 1046528   ;;  %s5431_s25 = smov 16   ;;  %s5432_s26 = smov 32  }
   0xf   : > { %5253 = vmatpush3.bf16.msra.mxu0 %v495_v1  ;;  %s8579_s18 = smov (!%p377_p3, %s4957_s18), 1  ;;  %5359 = vmatpush3.bf16.msra.mxu1 %v495_v1  ;;  %698 = vst.msk [vmem:[#allocation2 + $0x30] sm:$0xff] %vm690_vm2, %v8567_v32  ;;  %699 = vst.msk [vmem:[#allocation2 + $0x38] sm:$0xff] %vm690_vm2, %v8567_v32  ;;  %vm1123_vm5 = vcmask 1045504   ;;  %vm1090_vm6 = vcmask 261248   ;;  %vm1300_vm7 = vcmask 392448  }
  0x10   : > { %s5067_s21 = sshll.u32 %s8579_s18, 8  ;;  %691 = vst.msk [vmem:[#allocation2] sm:$0xff] %vm690_vm2, %v8567_v32  ;;  %692 = vst.msk [vmem:[#allocation2 + $0x8] sm:$0xff] %vm690_vm2, %v8567_v32  ;;  %s5433_s29 = smov 96   ;;  %vm1431_vm8 = vcmask 523648   ;;  %vm1566_vm9 = vcmask 654848  }
  0x11   : > { %s5516_s24 = scalar_lea.vmem %s8555_s0, %s5067_s21  ;;  %695 = vst.msk [vmem:[#allocation2 + $0x18] sm:$0xff] %vm690_vm2, %v8567_v32  ;;  %696 = vst.msk [vmem:[#allocation2 + $0x20] sm:$0xff] %vm690_vm2, %v8567_v32  ;;  %s5434_s30 = smov 48   ;;  %vm1700_vm10 = vcmask 786048   ;;  %vm1831_vm11 = vcmask 917248   ;;  %vm1966_vm12 = vcmask 1048448  }
  0x12   : > { %v388_v2 = vld [vmem:[%s5516_s24] sm:$0xff]  ;;  %v389_v3 = vld [vmem:[%s5516_s24 + $0x8] sm:$0xff]  ;;  %v390_v4 = vld [vmem:[%s5516_s24 + $0x10] sm:$0xff]  ;;  %701 = vst.msk [vmem:[#allocation2 + $0x48] sm:$0xff] %vm690_vm2, %v8567_v32  ;;  %s5436_s14 = smov 112   ;;  %s5437_s19 = smov 64  }
  0x13   : > { %v420_v5 = vpack.c.bf16 %v389_v3, %v388_v2  ;;  %v391_v6 = vld [vmem:[%s5516_s24 + $0x18] sm:$0xff]  ;;  %v404_v7 = vld [vmem:[%s5516_s24 + $0x80] sm:$0xff]  ;;  %v405_v8 = vld [vmem:[%s5516_s24 + $0x88] sm:$0xff]  ;;  %702 = vst.msk [vmem:[#allocation2 + $0x50] sm:$0xff] %vm690_vm2, %v8567_v32  ;;  %s5438_s22 = smov 80   ;;  %vm2484_vm13 = vcmask 261120  }
  0x14   : > { %v421_v9 = vpack.c.bf16 %v391_v6, %v390_v4  ;;  %v428_v10 = vpack.c.bf16 %v405_v8, %v404_v7  ;;  %v406_v11 = vld [vmem:[%s5516_s24 + $0x90] sm:$0xff]  ;;  %v407_v12 = vld [vmem:[%s5516_s24 + $0x98] sm:$0xff]  ;;  %v392_v13 = vld [vmem:[%s5516_s24 + $0x20] sm:$0xff]  ;;  %704 = vst.msk [vmem:[#allocation2 + $0x60] sm:$0xff] %vm690_vm2, %v8567_v32  ;;  %vm2487_vm14 = vcmask 254976   ;;  %vm2883_vm15 = vcmask 523520  }
  0x15   : > { %5254 = vmatprep.mubr.msk.bf16.mxu0 %vm444_vm1, %v420_v5  ;;  %v429_v14 = vpack.c.bf16 %v407_v12, %v406_v11  ;;  %v393_v15 = vld [vmem:[%s5516_s24 + $0x28] sm:$0xff]  ;;  %v394_v17 = vld [vmem:[%s5516_s24 + $0x30] sm:$0xff]  ;;  %v395_v18 = vld [vmem:[%s5516_s24 + $0x38] sm:$0xff]  ;;  %705 = vst.msk [vmem:[#allocation2 + $0x68] sm:$0xff] %vm690_vm2, %v8567_v32  ;;  %vm3092_vm0 = vcmask 785920  }
  0x16   : > { %5255 = vmatmul.mubr.msk.bf16.vlgmr.msra.gmra.mrb[0].mxu0 %vm444_vm1, %v421_v9  ;;  %5270 = vmatprep.mubr.msk.bf16.mxu1 %vm444_vm1, %v428_v10  ;;  %v422_v16 = vpack.c.bf16 %v393_v15, %v392_v13  ;;  %v396_v19 = vld [vmem:[%s5516_s24 + $0x40] sm:$0xff]  ;;  %v397_v20 = vld [vmem:[%s5516_s24 + $0x48] sm:$0xff]  ;;  %v423_v21 = vpack.c.bf16 %v395_v18, %v394_v17  ;;  %v398_v23 = vld [vmem:[%s5516_s24 + $0x50] sm:$0xff]  ;;  %707 = vst.msk [vmem:[#allocation2 + $0x78] sm:$0xff] %vm690_vm2, %v8567_v32 }
  0x17   : > { %5271 = vmatmul.mubr.msk.bf16.vlgmr.msra.gmra.mrb[0].mxu1 %vm444_vm1, %v429_v14  ;;  %v424_v22 = vpack.c.bf16 %v397_v20, %v396_v19  ;;  %v399_v24 = vld [vmem:[%s5516_s24 + $0x58] sm:$0xff]  ;;  %v400_v25 = vld [vmem:[%s5516_s24 + $0x60] sm:$0xff]  ;;  %v401_v26 = vld [vmem:[%s5516_s24 + $0x68] sm:$0xff]  ;;  %708 = vst.msk [vmem:[#allocation2 + $0x80] sm:$0xff] %vm690_vm2, %v8567_v32 }
  0x18   : > { %5258 = vmatprep.mubr.msk.bf16.mxu0 %vm444_vm1, %v422_v16  ;;  %v425_v27 = vpack.c.bf16 %v399_v24, %v398_v23  ;;  %v426_v28 = vpack.c.bf16 %v401_v26, %v400_v25  ;;  %v402_v29 = vld [vmem:[%s5516_s24 + $0x70] sm:$0xff]  ;;  %v403_v30 = vld [vmem:[%s5516_s24 + $0x78] sm:$0xff]  ;;  %710 = vst.msk [vmem:[#allocation2 + $0x90] sm:$0xff] %vm690_vm2, %v8567_v32  ;;  %711 = vst.msk [vmem:[#allocation2 + $0x98] sm:$0xff] %vm690_vm2, %v8567_v32 }
  0x19   : > { %v427_v31 = vpack.c.bf16 %v403_v30, %v402_v29  ;;  %713 = vst.msk [vmem:[#allocation2 + $0xa8] sm:$0xff] %vm690_vm2, %v8567_v32  ;;  %714 = vst.msk [vmem:[#allocation2 + $0xb0] sm:$0xff] %vm690_vm2, %v8567_v32  ;;  %v779_v33 = vld [vmem:[#allocation2] sm:$0xff]  ;;  %v780_v34 = vld [vmem:[#allocation2 + $0x8] sm:$0xff] }
  0x1a   : > { %716 = vst.msk [vmem:[#allocation2 + $0xc0] sm:$0xff] %vm690_vm2, %v8567_v32  ;;  %717 = vst.msk [vmem:[#allocation2 + $0xc8] sm:$0xff] %vm690_vm2, %v8567_v32  ;;  %v914_v35 = vrot.slane %v779_v33, 1  ;;  %v915_v36 = vrot.slane %v780_v34, 1  ;;  %v1124_v38 = vrot.slane %v779_v33, 2  ;;  %v1125_v39 = vrot.slane %v780_v34, 2 }
  0x1b   : > { %719 = vst.msk [vmem:[#allocation2 + $0xd8] sm:$0xff] %vm690_vm2, %v8567_v32  ;;  %720 = vst.msk [vmem:[#allocation2 + $0xe0] sm:$0xff] %vm690_vm2, %v8567_v32  ;;  %v408_v43 = vld [vmem:[%s5516_s24 + $0xa0] sm:$0xff]  ;;  %v409_v44 = vld [vmem:[%s5516_s24 + $0xa8] sm:$0xff] }
  0x1c   : > { %722 = vst.msk [vmem:[#allocation2 + $0xf0] sm:$0xff] %vm690_vm2, %v8567_v32  ;;  %723 = vst.msk [vmem:[#allocation2 + $0xf8] sm:$0xff] %vm690_vm2, %v8567_v32  ;;  %v916_v37 = vsel %vm913_vm4, %v914_v35, %v915_v36  ;;  %v1126_v41 = vsel %vm1123_vm5, %v1124_v38, %v1125_v39  ;;  %v430_v46 = vpack.c.bf16 %v409_v44, %v408_v43  ;;  %v410_v48 = vld [vmem:[%s5516_s24 + $0xb0] sm:$0xff]  ;;  %v411_v49 = vld [vmem:[%s5516_s24 + $0xb8] sm:$0xff] }
  0x1d   : > { %725 = vst.msk [vmem:[#allocation2 + $0x108] sm:$0xff] %vm690_vm2, %v8567_v32  ;;  %726 = vst.msk [vmem:[#allocation2 + $0x110] sm:$0xff] %vm690_vm2, %v8567_v32  ;;  %994 = vrot.lane.b32.xlu0 %v916_v37, %s5431_s25  ;;  %1204 = vrot.lane.b32.xlu1 %v1126_v41, %s5432_s26  ;;  %v431_v50 = vpack.c.bf16 %v411_v49, %v410_v48  ;;  %v412_v52 = vld [vmem:[%s5516_s24 + $0xc0] sm:$0xff]  ;;  %v413_v53 = vld [vmem:[%s5516_s24 + $0xc8] sm:$0xff] }
  0x1e   : > { %5259 = vmatmul.mubr.msk.bf16.gmra.mrb[4].mxu0 %vm444_vm1, %v423_v21  ;;  %728 = vst.msk [vmem:[#allocation2 + $0x120] sm:$0xff] %vm690_vm2, %v8567_v32  ;;  %729 = vst.msk [vmem:[#allocation2 + $0x128] sm:$0xff] %vm690_vm2, %v8567_v32  ;;  %5274 = vmatprep.mubr.msk.bf16.mxu1 %vm444_vm1, %v430_v46  ;;  %v432_v54 = vpack.c.bf16 %v413_v53, %v412_v52  ;;  %v414_v55 = vld [vmem:[%s5516_s24 + $0xd0] sm:$0xff]  ;;  %v415_v56 = vld [vmem:[%s5516_s24 + $0xd8] sm:$0xff] }
  0x1f   : > { %5262 = vmatprep.mubr.msk.bf16.mxu0 %vm444_vm1, %v424_v22  ;;  %731 = vst.msk [vmem:[#allocation2 + $0x138] sm:$0xff] %vm690_vm2, %v8567_v32  ;;  %732 = vst.msk [vmem:[#allocation2 + $0x140] sm:$0xff] %vm690_vm2, %v8567_v32  ;;  %5275 = vmatmul.mubr.msk.bf16.gmra.mrb[4].mxu1 %vm444_vm1, %v431_v50  ;;  %v433_v57 = vpack.c.bf16 %v415_v56, %v414_v55  ;;  %v416_v58 = vld [vmem:[%s5516_s24 + $0xe0] sm:$0xff]  ;;  %v417_v59 = vld [vmem:[%s5516_s24 + $0xe8] sm:$0xff] }
  0x20   : > { %734 = vst.msk [vmem:[#allocation2 + $0x150] sm:$0xff] %vm690_vm2, %v8567_v32  ;;  %735 = vst.msk [vmem:[#allocation2 + $0x158] sm:$0xff] %vm690_vm2, %v8567_v32  ;;  %5278 = vmatprep.mubr.msk.bf16.mxu1 %vm444_vm1, %v432_v54  ;;  %v434_v60 = vpack.c.bf16 %v417_v59, %v416_v58  ;;  %v418_v61 = vld [vmem:[%s5516_s24 + $0xf0] sm:$0xff]  ;;  %v419_v62 = vld [vmem:[%s5516_s24 + $0xf8] sm:$0xff]  ;;  %s5068_s24 = sshll.u32 %s8579_s18, 5 }
  0x21   : > { %737 = vst.msk [vmem:[#allocation2 + $0x168] sm:$0xff] %vm690_vm2, %v8567_v32  ;;  %738 = vst.msk [vmem:[#allocation2 + $0x170] sm:$0xff] %vm690_vm2, %v8567_v32  ;;  %v435_v63 = vpack.c.bf16 %v419_v62, %v418_v61  ;;  %v5690_v4 = vld [vmem:[%s8557_s2] ss:$0 sm:$0xff]  ;;  %s386_s12 = scalar_lea.vmem %s8566_s11, %s5068_s24 }
  0x22   : > { %740 = vst.msk [vmem:[#allocation2 + $0x180] sm:$0xff] %vm690_vm2, %v8567_v32  ;;  %741 = vst.msk [vmem:[#allocation2 + $0x188] sm:$0xff] %vm690_vm2, %v8567_v32 }
  0x23   : > { %743 = vst.msk [vmem:[#allocation2 + $0x198] sm:$0xff] %vm690_vm2, %v8567_v32  ;;  %744 = vst.msk [vmem:[#allocation2 + $0x1a0] sm:$0xff] %vm690_vm2, %v8567_v32 }
  0x24   : > { %700 = vst.msk [vmem:[#allocation2 + $0x40] sm:$0x3] %vm693_vm3, %v8567_v32  ;;  %694 = vst.msk [vmem:[#allocation2 + $0x10] sm:$0x3] %vm693_vm3, %v8567_v32 }
  0x25   : > { %697 = vst.msk [vmem:[#allocation2 + $0x28] sm:$0x3] %vm693_vm3, %v8567_v32  ;;  %703 = vst.msk [vmem:[#allocation2 + $0x58] sm:$0x3] %vm693_vm3, %v8567_v32 }
  0x26   : > { %5263 = vmatmul.mubr.msk.bf16.gmra.mrb[8].mxu0 %vm444_vm1, %v425_v27  ;;  %706 = vst.msk [vmem:[#allocation2 + $0x70] sm:$0x3] %vm693_vm3, %v8567_v32  ;;  %709 = vst.msk [vmem:[#allocation2 + $0x88] sm:$0x3] %vm693_vm3, %v8567_v32 }
  0x27   : > { %5266 = vmatprep.mubr.msk.bf16.mxu0 %vm444_vm1, %v426_v28  ;;  %712 = vst.msk [vmem:[#allocation2 + $0xa0] sm:$0x3] %vm693_vm3, %v8567_v32  ;;  %715 = vst.msk [vmem:[#allocation2 + $0xb8] sm:$0x3] %vm693_vm3, %v8567_v32  ;;  %5279 = vmatmul.mubr.msk.bf16.gmra.mrb[8].mxu1 %vm444_vm1, %v433_v57 }
  0x28   : > { %718 = vst.msk [vmem:[#allocation2 + $0xd0] sm:$0x3] %vm693_vm3, %v8567_v32  ;;  %721 = vst.msk [vmem:[#allocation2 + $0xe8] sm:$0x3] %vm693_vm3, %v8567_v32  ;;  %5282 = vmatprep.mubr.msk.bf16.mxu1 %vm444_vm1, %v434_v60 }
  0x29   : > { %724 = vst.msk [vmem:[#allocation2 + $0x100] sm:$0x3] %vm693_vm3, %v8567_v32  ;;  %727 = vst.msk [vmem:[#allocation2 + $0x118] sm:$0x3] %vm693_vm3, %v8567_v32 }
  0x2a   : > { %730 = vst.msk [vmem:[#allocation2 + $0x130] sm:$0x3] %vm693_vm3, %v8567_v32  ;;  %733 = vst.msk [vmem:[#allocation2 + $0x148] sm:$0x3] %vm693_vm3, %v8567_v32 }
  0x2b   : > { %736 = vst.msk [vmem:[#allocation2 + $0x160] sm:$0x3] %vm693_vm3, %v8567_v32  ;;  %739 = vst.msk [vmem:[#allocation2 + $0x178] sm:$0x3] %vm693_vm3, %v8567_v32  ;;  %v781_v40 = vld [vmem:[#allocation2 + $0x10] sm:$0x3] }
  0x2c   : > { %742 = vst.msk [vmem:[#allocation2 + $0x190] sm:$0x3] %vm693_vm3, %v8567_v32  ;;  %745 = vst.msk [vmem:[#allocation2 + $0x1a8] sm:$0x3] %vm693_vm3, %v8567_v32  ;;  %v917_v42 = vrot.slane %v781_v40, 1  ;;  %v1127_v47 = vrot.slane %v781_v40, 2 }
  0x2d   : > { %833 = vst.msk [vmem:[#allocation3] sm:$0xff] %vm690_vm2, %v779_v33  ;;  %834 = vst.msk [vmem:[#allocation3 + $0x10] sm:$0xff] %vm690_vm2, %v780_v34 }
  0x2e   : > { %5267 = vmatmul.mubr.msk.bf16.gmra.mrb[12].mxu0 %vm444_vm1, %v427_v31  ;;  %v918_v45 = vsel %vm913_vm4, %v915_v36, %v917_v42  ;;  %v1128_v51 = vsel %vm1123_vm5, %v1125_v39, %v1127_v47 }
  0x2f   : > { %996 = vrot.lane.b32.xlu0 %v918_v45, %s5431_s25  ;;  %1206 = vrot.lane.b32.xlu1 %v1128_v51, %s5432_s26 }
  0x30   : > { %5283 = vmatmul.mubr.msk.bf16.gmra.mrb[12].mxu1 %vm444_vm1, %v435_v63  ;;  %vm3223_vm1 = vcmask 1048320  }
  0x8f   : > { %v995_v0 = vpop.permute.xlu0 %994  ;;  %v1205_v1 = vpop.permute.xlu1 %1204 }
  0x90   : > { %1091 = vst.msk [vmem:[#allocation3] sm:$0xff] %vm1090_vm6, %v995_v0 }
  0x91   : > { %1301 = vst.msk [vmem:[#allocation3] sm:$0xff] %vm1300_vm7, %v1205_v1 }
  0xa1   : > { %v997_v2 = vpop.permute.xlu0 %996  ;;  %v1207_v3 = vpop.permute.xlu1 %1206 }
  0xa2   : > { %1092 = vst.msk [vmem:[#allocation3 + $0x10] sm:$0xff] %vm1090_vm6, %v997_v2 }
  0xa3   : > { %1302 = vst.msk [vmem:[#allocation3 + $0x10] sm:$0xff] %vm1300_vm7, %v1207_v3 }
  0xe9   : > { %v5256_v5 = vpop.f32.mrb[0].mxu0 }
  0xea   : > { %v540_v6 = vadd.f32 %v5256_v5, %v5690_v4  ;;  %v531_v7 = vpop.f32.mrb[1].mxu0  ;;  %v5272_v8 = vpop.f32.mrb[0].mxu1 }
  0xeb   : > { %v532_v9 = vadd.f32 %v5690_v4, %v531_v7  ;;  %v5257_v10 = vpop.f32.mrb[2].mxu0  ;;  %v604_v11 = vadd.f32 %v5272_v8, %v5690_v4  ;;  %v595_v12 = vpop.f32.mrb[1].mxu1 }
  0xec   : > { %v660_v13 = vmax.f32 %v540_v6, 0.0  ;;  %v543_v14 = vadd.f32 %v5257_v10, %v5690_v4  ;;  %v534_v15 = vpop.f32.mrb[3].mxu0  ;;  %v596_v16 = vadd.f32 %v5690_v4, %v595_v12  ;;  %v5273_v17 = vpop.f32.mrb[2].mxu1 }
  0xed   : > { %v658_v18 = vmax.f32 %v532_v9, 0.0  ;;  %v535_v19 = vadd.f32 %v5690_v4, %v534_v15  ;;  %v676_v20 = vmax.f32 %v604_v11, 0.0  ;;  %v607_v21 = vadd.f32 %v5273_v17, %v5690_v4  ;;  %v598_v22 = vpop.f32.mrb[3].mxu1 }
  0xee   : > { %749 = vst.msk [vmem:[#allocation2 + $0x31] sm:$0xff] %vm690_vm2, %v660_v13  ;;  %v661_v23 = vmax.f32 %v543_v14, 0.0  ;;  %v674_v24 = vmax.f32 %v596_v16, 0.0  ;;  %v599_v25 = vadd.f32 %v5690_v4, %v598_v22 }
  0xef   : > { %747 = vst.msk [vmem:[#allocation2 + $0x19] sm:$0xff] %vm690_vm2, %v658_v18  ;;  %v659_v26 = vmax.f32 %v535_v19, 0.0  ;;  %765 = vst.msk [vmem:[#allocation2 + $0xf1] sm:$0xff] %vm690_vm2, %v676_v20  ;;  %v677_v27 = vmax.f32 %v607_v21, 0.0 }
  0xf0   : > { %750 = vst.msk [vmem:[#allocation2 + $0x39] sm:$0xff] %vm690_vm2, %v661_v23  ;;  %763 = vst.msk [vmem:[#allocation2 + $0xd9] sm:$0xff] %vm690_vm2, %v674_v24  ;;  %v675_v28 = vmax.f32 %v599_v25, 0.0 }
  0xf1   : > { %748 = vst.msk [vmem:[#allocation2 + $0x21] sm:$0xff] %vm690_vm2, %v659_v26  ;;  %766 = vst.msk [vmem:[#allocation2 + $0xf9] sm:$0xff] %vm690_vm2, %v677_v27  ;;  %v5260_v29 = vpop.f32.mrb[4].mxu0 }
  0xf2   : > { %764 = vst.msk [vmem:[#allocation2 + $0xe1] sm:$0xff] %vm690_vm2, %v675_v28  ;;  %v556_v30 = vadd.f32 %v5260_v29, %v5690_v4  ;;  %v547_v31 = vpop.f32.mrb[5].mxu0 }
  0xf3   : > { %v548_v33 = vadd.f32 %v5690_v4, %v547_v31  ;;  %v5261_v34 = vpop.f32.mrb[6].mxu0 }
  0xf4   : > { %v664_v35 = vmax.f32 %v556_v30, 0.0  ;;  %v559_v36 = vadd.f32 %v5261_v34, %v5690_v4  ;;  %v550_v37 = vpop.f32.mrb[7].mxu0 }
  0xf5   : > { %v5712_v38 = vld [vmem:[#allocation2 + $0x30] sm:$0xff]  ;;  %v662_v39 = vmax.f32 %v548_v33, 0.0  ;;  %v551_v52 = vadd.f32 %v5690_v4, %v550_v37 }
  0xf6   : > { %1735 = vrot.lane.b32.xlu0 %v5712_v38, %s5433_s29  ;;  %837 = vst.msk [vmem:[#allocation3 + $0x40] sm:$0xff] %vm690_vm2, %v5712_v38  ;;  %v5718_v40 = vld [vmem:[#allocation2 + $0xf0] sm:$0xff]  ;;  %v5720_v41 = vld [vmem:[#allocation2 + $0x18] sm:$0xff]  ;;  %753 = vst.msk [vmem:[#allocation2 + $0x61] sm:$0xff] %vm690_vm2, %v664_v35  ;;  %v665_v42 = vmax.f32 %v559_v36, 0.0  ;;  %v1134_v46 = vrot.slane %v5712_v38, 2 }
  0xf7   : > { %v5723_v43 = vld [vmem:[#allocation2 + $0x38] sm:$0xff]  ;;  %v5725_v44 = vld [vmem:[#allocation2 + $0x40] sm:$0x3]  ;;  %853 = vst.msk [vmem:[#allocation3 + $0x140] sm:$0xff] %vm690_vm2, %v5718_v40  ;;  %835 = vst.msk [vmem:[#allocation3 + $0x20] sm:$0xff] %vm690_vm2, %v5720_v41  ;;  %v663_v61 = vmax.f32 %v551_v52, 0.0 }
  0xf8   : > { %v5731_v45 = vld [vmem:[#allocation2 + $0xd8] sm:$0xff]  ;;  %751 = vst.msk [vmem:[#allocation2 + $0x49] sm:$0xff] %vm690_vm2, %v662_v39  ;;  %v1137_v47 = vrot.slane %v5725_v44, 2  ;;  %1737 = vrot.lane.b32.xlu1 %v5723_v43, %s5433_s29  ;;  %v1135_v48 = vrot.slane %v5723_v43, 2  ;;  %838 = vst.msk [vmem:[#allocation3 + $0x50] sm:$0xff] %vm690_vm2, %v5723_v43  ;;  %v5743_v50 = vld [vmem:[#allocation2 + $0x20] sm:$0xff] }
  0xf9   : > { %v5741_v49 = vld [vmem:[#allocation2 + $0xf8] sm:$0xff]  ;;  %851 = vst.msk [vmem:[#allocation3 + $0x120] sm:$0xff] %vm690_vm2, %v5731_v45  ;;  %754 = vst.msk [vmem:[#allocation2 + $0x69] sm:$0xff] %vm690_vm2, %v665_v42  ;;  %v5752_v51 = vld [vmem:[#allocation2 + $0xe0] sm:$0xff]  ;;  %v5264_v55 = vpop.f32.mrb[8].mxu0  ;;  %v959_v57 = vrot.slane %v5731_v45, 1 }
  0xfa   : > { %854 = vst.msk [vmem:[#allocation3 + $0x150] sm:$0xff] %vm690_vm2, %v5741_v49  ;;  %836 = vst.msk [vmem:[#allocation3 + $0x30] sm:$0xff] %vm690_vm2, %v5743_v50  ;;  %v5756_v53 = vsel %vm1123_vm5, %v1134_v46, %v1135_v48  ;;  %v5759_v54 = vsel %vm1123_vm5, %v1135_v48, %v1137_v47  ;;  %1339 = vrot.lane.b32.xlu0 %v5712_v38, %s5434_s30  ;;  %v563_v56 = vpop.f32.mrb[9].mxu0  ;;  %v960_v58 = vrot.slane %v5752_v51, 1  ;;  %v5773_v59 = vld [vmem:[#allocation2 + $0xe8] sm:$0x3] }
  0xfb   : > { %852 = vst.msk [vmem:[#allocation3 + $0x130] sm:$0xff] %vm690_vm2, %v5752_v51  ;;  %2036 = vst.msk [vmem:[#allocation3 + $0x8] sm:$0xff] %vm690_vm2, %v5756_v53  ;;  %v5265_v60 = vpop.f32.mrb[10].mxu0  ;;  %v1169_v1 = vrot.slane %v5731_v45, 2  ;;  %v1170_v3 = vrot.slane %v5752_v51, 2  ;;  %v1172_v5 = vrot.slane %v5773_v59, 2  ;;  %v572_v19 = vadd.f32 %v5264_v55, %v5690_v4 }
  0xfc   : > { %2037 = vst.msk [vmem:[#allocation3 + $0x18] sm:$0xff] %vm690_vm2, %v5759_v54  ;;  %1341 = vrot.lane.b32.xlu1 %v5723_v43, %s5434_s30  ;;  %v566_v63 = vpop.f32.mrb[11].mxu0  ;;  %v5782_v0 = vsel %vm913_vm4, %v959_v57, %v960_v58  ;;  %752 = vst.msk [vmem:[#allocation2 + $0x51] sm:$0xff] %vm690_vm2, %v663_v61  ;;  %v5813_v15 = vld [vmem:[#allocation2 + $0x100] sm:$0x3]  ;;  %v564_v20 = vadd.f32 %v5690_v4, %v563_v56  ;;  %v575_v21 = vadd.f32 %v5265_v60, %v5690_v4 }
  0xfd   : > { %v5775_v62 = vld [vmem:[#allocation2 + $0x60] sm:$0xff]  ;;  %v5805_v10 = vsel %vm1123_vm5, %v1169_v1, %v1170_v3  ;;  %v5808_v11 = vsel %vm1123_vm5, %v1170_v3, %v1172_v5  ;;  %v567_v22 = vadd.f32 %v5690_v4, %v566_v63  ;;  %v1174_v24 = vrot.slane %v5718_v40, 2 }
  0xfe   : > { %1767 = vrot.lane.b32.xlu0 %v5718_v40, %s5433_s29  ;;  %841 = vst.msk [vmem:[#allocation3 + $0x80] sm:$0xff] %vm690_vm2, %v5775_v62  ;;  %v1144_v8 = vrot.slane %v5775_v62, 2  ;;  %2050 = vst.msk [vmem:[#allocation3 + $0xe8] sm:$0xff] %vm690_vm2, %v5805_v10  ;;  %v668_v25 = vmax.f32 %v572_v19, 0.0  ;;  %v666_v26 = vmax.f32 %v564_v20, 0.0  ;;  %v1175_v27 = vrot.slane %v5741_v49, 2 }
  0xff   : > { %v5787_v2 = vld [vmem:[#allocation2 + $0x48] sm:$0xff]  ;;  %2051 = vst.msk [vmem:[#allocation3 + $0xf8] sm:$0xff] %vm690_vm2, %v5808_v11  ;;  %v1177_v28 = vrot.slane %v5813_v15, 2  ;;  %v669_v31 = vmax.f32 %v575_v21, 0.0  ;;  %v667_v33 = vmax.f32 %v567_v22, 0.0  ;;  %v925_v46 = vrot.slane %v5723_v43, 1 }
 0x100   : > { %v5792_v6 = vld [vmem:[#allocation2 + $0x68] sm:$0xff]  ;;  %839 = vst.msk [vmem:[#allocation3 + $0x60] sm:$0xff] %vm690_vm2, %v5787_v2  ;;  %v5796_v7 = vld [vmem:[#allocation2 + $0x70] sm:$0x3]  ;;  %1769 = vrot.lane.b32.xlu1 %v5741_v49, %s5433_s29  ;;  %v1139_v23 = vrot.slane %v5787_v2, 2  ;;  %757 = vst.msk [vmem:[#allocation2 + $0x91] sm:$0xff] %vm690_vm2, %v668_v25  ;;  %v5857_v36 = vsel %vm1123_vm5, %v1174_v24, %v1175_v27 }
 0x101   : > { %842 = vst.msk [vmem:[#allocation3 + $0x90] sm:$0xff] %vm690_vm2, %v5792_v6  ;;  %v1145_v9 = vrot.slane %v5792_v6, 2  ;;  %v1147_v12 = vrot.slane %v5796_v7, 2  ;;  %755 = vst.msk [vmem:[#allocation2 + $0x79] sm:$0xff] %vm690_vm2, %v666_v26  ;;  %v5860_v37 = vsel %vm1123_vm5, %v1175_v27, %v1177_v28  ;;  %v924_v47 = vrot.slane %v5712_v38, 1  ;;  %v5389_v52 = vld [vmem:[%s8558_s3] sm:$0xff]  }
 0x102   : > { %1371 = vrot.lane.b32.xlu0 %v5718_v40, %s5434_s30  ;;  %v2069_v13 = vld [vmem:[#allocation3 + $0x8] sm:$0xff]  ;;  %758 = vst.msk [vmem:[#allocation2 + $0x99] sm:$0xff] %vm690_vm2, %v669_v31  ;;  %756 = vst.msk [vmem:[#allocation2 + $0x81] sm:$0xff] %vm690_vm2, %v667_v33  ;;  %v927_v56 = vrot.slane %v5725_v44, 1  ;;  %v5435_v43 = vmov 0   ;;  %v5391_v20 = vld [vmem:[%s8558_s3 + $0x10] sm:$0xff]  }
 0x103   : > { %v2071_v14 = vld [vmem:[#allocation3 + $0x18] sm:$0xff]  ;;  %v5820_v16 = vsel %vm1123_vm5, %v1144_v8, %v1145_v9  ;;  %v5825_v18 = vsel %vm1123_vm5, %v1145_v9, %v1147_v12  ;;  %v5842_v29 = vld [vmem:[#allocation2 + $0x50] sm:$0xff]  ;;  %v5844_v30 = vld [vmem:[#allocation2 + $0x58] sm:$0x3]  ;;  %2052 = vst.msk [vmem:[#allocation3 + $0x108] sm:$0xff] %vm690_vm2, %v5857_v36  ;;  %2291 = vmatprep.subr.bf16.mxu1 %v5435_v43  ;;  %5387 = vset.pattern.permute.xlu0 %v5435_v43  ;;  %v965_v24 = vrot.slane %v5741_v49, 1 }
 0x104   : > { %v2133_v17 = vpack.c.bf16 %v2071_v14, %v2069_v13  ;;  %2040 = vst.msk [vmem:[#allocation3 + $0x48] sm:$0xff] %vm690_vm2, %v5820_v16  ;;  %1373 = vrot.lane.b32.xlu1 %v5741_v49, %s5434_s30  ;;  %2041 = vst.msk [vmem:[#allocation3 + $0x58] sm:$0xff] %vm690_vm2, %v5825_v18  ;;  %v1140_v34 = vrot.slane %v5842_v29, 2  ;;  %v1142_v35 = vrot.slane %v5844_v30, 2  ;;  %2292 = vmatpush1.bf16.msra.mxu1 %v5389_v52  ;;  %v5390_v12 = vld [vmem:[%s8558_s3 + $0x8] sm:$0xff]   ;;  %v5392_v21 = vld [vmem:[%s8558_s3 + $0x18] sm:$0xff]  }
 0x105   : > { %840 = vst.msk [vmem:[#allocation3 + $0x70] sm:$0xff] %vm690_vm2, %v5842_v29  ;;  %2053 = vst.msk [vmem:[#allocation3 + $0x118] sm:$0xff] %vm690_vm2, %v5860_v37  ;;  %v926_v63 = vsel %vm913_vm4, %v924_v47, %v925_v46  ;;  %2293 = vmatprep.subr.bf16.mxu1 %v5435_v43  ;;  %5388 = vset.pattern.permute.xlu1 %v5435_v43  ;;  %v928_v9 = vsel %vm913_vm4, %v925_v46, %v927_v56  ;;  %v5393_v22 = vld [vmem:[%s8558_s3 + $0x20] sm:$0xff]   ;;  %v967_v25 = vrot.slane %v5813_v15, 1  ;;  %v5394_v26 = vld [vmem:[%s8558_s3 + $0x28] sm:$0xff]  }
 0x106   : > { %4993 = vmatprep.mubr.msk.bf16.mxu1 %vm690_vm2, %v2133_v17  ;;  %1335 = vrot.lane.b32.xlu0 %v5720_v41, %s5434_s30  ;;  %v5863_v39 = vsel %vm1123_vm5, %v1139_v23, %v1140_v34  ;;  %v5866_v42 = vsel %vm1123_vm5, %v1140_v34, %v1142_v35  ;;  %v964_v23 = vrot.slane %v5718_v40, 1  ;;  %v784_v49 = vld [vmem:[#allocation2 + $0x28] sm:$0x3]  ;;  %v919_v15 = vrot.slane %v5720_v41, 1  ;;  %v5396_v31 = vld [vmem:[%s8558_s3 + $0x38] sm:$0xff]   ;;  %v5397_v56 = vld [vmem:[%s8558_s3 + $0x40] sm:$0xff]  }
 0x107   : > { %2038 = vst.msk [vmem:[#allocation3 + $0x28] sm:$0xff] %vm690_vm2, %v5863_v39  ;;  %2039 = vst.msk [vmem:[#allocation3 + $0x38] sm:$0xff] %vm690_vm2, %v5866_v42  ;;  %v5884_v48 = vld [vmem:[#allocation2 + $0x90] sm:$0xff]  ;;  %v5985_v40 = vsel %vm913_vm4, %v965_v24, %v967_v25  ;;  %v922_v28 = vrot.slane %v784_v49, 1  ;;  %v1130_v34 = vrot.slane %v5743_v50, 2  ;;  %v1129_v46 = vrot.slane %v5720_v41, 2 }
 0x108   : > { %1337 = vrot.lane.b32.xlu1 %v5743_v50, %s5434_s30  ;;  %v5889_v55 = vld [vmem:[#allocation2 + $0x78] sm:$0xff]  ;;  %845 = vst.msk [vmem:[#allocation3 + $0xc0] sm:$0xff] %vm690_vm2, %v5884_v48  ;;  %v1154_v60 = vrot.slane %v5884_v48, 2  ;;  %2294 = vmatpush1.bf16.msra.mxu1 %v5390_v12  ;;  %v5979_v27 = vsel %vm913_vm4, %v964_v23, %v965_v24  ;;  %v1132_v47 = vrot.slane %v784_v49, 2 }
 0x109   : > { %v5894_v57 = vld [vmem:[#allocation2 + $0x98] sm:$0xff]  ;;  %843 = vst.msk [vmem:[#allocation3 + $0xa0] sm:$0xff] %vm690_vm2, %v5889_v55  ;;  %v5899_v38 = vld [vmem:[#allocation2 + $0x80] sm:$0xff]  ;;  %v5915_v1 = vld [vmem:[#allocation2 + $0x88] sm:$0x3]  ;;  %v1149_v3 = vrot.slane %v5889_v55, 2  ;;  %2295 = vmatprep.subr.bf16.mxu1 %v5435_v43  ;;  %v1131_v52 = vsel %vm1123_vm5, %v1129_v46, %v1130_v34 }
 0x10a   : > { %1763 = vrot.lane.b32.xlu0 %v5731_v45, %s5433_s29  ;;  %846 = vst.msk [vmem:[#allocation3 + $0xd0] sm:$0xff] %vm690_vm2, %v5894_v57  ;;  %844 = vst.msk [vmem:[#allocation3 + $0xb0] sm:$0xff] %vm690_vm2, %v5899_v38  ;;  %v1155_v44 = vrot.slane %v5894_v57, 2  ;;  %v1150_v13 = vrot.slane %v5899_v38, 2  ;;  %v1152_v14 = vrot.slane %v5915_v1, 2 }
 0x10c   : > { %1765 = vrot.lane.b32.xlu1 %v5752_v51, %s5433_s29  ;;  %v5921_v5 = vsel %vm1123_vm5, %v1154_v60, %v1155_v44  ;;  %v5938_v17 = vsel %vm1123_vm5, %v1149_v3, %v1150_v13  ;;  %v5945_v19 = vsel %vm1123_vm5, %v1150_v13, %v1152_v14  ;;  %2296 = vmatpush1.bf16.msra.mxu1 %v5391_v20 }
 0x10d   : > { %2044 = vst.msk [vmem:[#allocation3 + $0x88] sm:$0xff] %vm690_vm2, %v5921_v5  ;;  %2042 = vst.msk [vmem:[#allocation3 + $0x68] sm:$0xff] %vm690_vm2, %v5938_v17  ;;  %2297 = vmatprep.subr.bf16.mxu1 %v5435_v43  ;;  %v1133_v60 = vsel %vm1123_vm5, %v1130_v34, %v1132_v47 }
 0x10e   : > { %1367 = vrot.lane.b32.xlu0 %v5731_v45, %s5434_s30  ;;  %v5901_v45 = vld [vmem:[#allocation2 + $0xa0] sm:$0x3]  ;;  %2043 = vst.msk [vmem:[#allocation3 + $0x78] sm:$0xff] %vm690_vm2, %v5945_v19 }
 0x10f   : > { %v1157_v61 = vrot.slane %v5901_v45, 2 }
 0x110   : > { %1369 = vrot.lane.b32.xlu1 %v5752_v51, %s5434_s30  ;;  %2298 = vmatpush1.bf16.msra.mxu1 %v5392_v21  ;;  %v962_v21 = vrot.slane %v5773_v59, 1 }
 0x111   : > { %v5924_v8 = vsel %vm1123_vm5, %v1155_v44, %v1157_v61  ;;  %2299 = vmatprep.subr.bf16.mxu1 %v5435_v43 }
 0x112   : > { %1870 = vrot.lane.b32.xlu0 %v926_v63, %s5436_s14  ;;  %2045 = vst.msk [vmem:[#allocation3 + $0x98] sm:$0xff] %vm690_vm2, %v5924_v8 }
 0x114   : > { %1872 = vrot.lane.b32.xlu1 %v928_v9, %s5436_s14  ;;  %2300 = vmatpush1.bf16.msra.mxu1 %v5393_v22  ;;  %v963_v22 = vsel %vm913_vm4, %v960_v58, %v962_v21 }
 0x115   : > { %2301 = vmatprep.subr.bf16.mxu1 %v5435_v43 }
 0x116   : > { %1474 = vrot.lane.b32.xlu0 %v926_v63, %s5437_s19 }
 0x118   : > { %1476 = vrot.lane.b32.xlu1 %v928_v9, %s5437_s19  ;;  %2302 = vmatpush1.bf16.msra.mxu1 %v5394_v26 }
 0x119   : > { %2303 = vmatprep.subr.bf16.mxu1 %v5435_v43 }
 0x11a   : > { %1608 = vrot.lane.b32.xlu0 %v5756_v53, %s5438_s22 }
 0x11c   : > { %1610 = vrot.lane.b32.xlu1 %v5759_v54, %s5438_s22 }
 0x11e   : > { %1002 = vrot.lane.b32.xlu0 %v926_v63, %s5431_s25 }
 0x120   : > { %1004 = vrot.lane.b32.xlu1 %v928_v9, %s5431_s25 }
 0x122   : > { %1212 = vrot.lane.b32.xlu0 %v5756_v53, %s5432_s26  ;;  %v920_v53 = vrot.slane %v5743_v50, 1  ;;  %v5268_v50 = vpop.f32.mrb[12].mxu0 }
 0x123   : > { %v588_v41 = vadd.f32 %v5268_v50, %v5690_v4  ;;  %v579_v44 = vpop.f32.mrb[13].mxu0 }
 0x124   : > { %1214 = vrot.lane.b32.xlu1 %v5759_v54, %s5432_s26  ;;  %v5395_v54 = vld [vmem:[%s8558_s3 + $0x30] sm:$0xff]   ;;  %v921_v33 = vsel %vm913_vm4, %v919_v15, %v920_v53  ;;  %v923_v35 = vsel %vm913_vm4, %v920_v53, %v922_v28  ;;  %v580_v61 = vadd.f32 %v5690_v4, %v579_v44  ;;  %v929_v44 = vrot.slane %v5787_v2, 1 }
 0x125   : > { %2304 = vmatpush1.bf16.msra.mxu1 %v5395_v54  ;;  %v672_v63 = vmax.f32 %v588_v41, 0.0 }
 0x126   : > { %1902 = vrot.lane.b32.xlu0 %v5979_v27, %s5436_s14  ;;  %2305 = vmatprep.subr.bf16.mxu1 %v5435_v43  ;;  %v670_v12 = vmax.f32 %v580_v61, 0.0  ;;  %v930_v61 = vrot.slane %v5842_v29, 1 }
 0x127   : > { %761 = vst.msk [vmem:[#allocation2 + $0xc1] sm:$0xff] %vm690_vm2, %v672_v63 }
 0x128   : > { %1904 = vrot.lane.b32.xlu1 %v5985_v40, %s5436_s14  ;;  %759 = vst.msk [vmem:[#allocation2 + $0xa9] sm:$0xff] %vm690_vm2, %v670_v12 }
 0x129   : > { %2306 = vmatpush1.bf16.msra.mxu1 %v5396_v31 }
 0x12a   : > { %1506 = vrot.lane.b32.xlu0 %v5979_v27, %s5437_s19  ;;  %2307 = vmatprep.subr.bf16.mxu1 %v5435_v43  ;;  %v5269_v43 = vpop.f32.mrb[14].mxu0 }
 0x12b   : > { %v591_v3 = vadd.f32 %v5269_v43, %v5690_v4  ;;  %v582_v9 = vpop.f32.mrb[15].mxu0 }
 0x12c   : > { %1508 = vrot.lane.b32.xlu1 %v5985_v40, %s5437_s19  ;;  %v583_v13 = vadd.f32 %v5690_v4, %v582_v9  ;;  %v932_v9 = vrot.slane %v5844_v30, 1 }
 0x12d   : > { %2308 = vmatpush1.bf16.msra.mxu1 %v5397_v56  ;;  %v673_v14 = vmax.f32 %v591_v3, 0.0  ;;  %v5276_v56 = vpop.f32.mrb[4].mxu1 }
 0x12e   : > { %1470 = vrot.lane.b32.xlu0 %v921_v33, %s5437_s19  ;;  %v671_v20 = vmax.f32 %v583_v13, 0.0  ;;  %v6038_v23 = vld [vmem:[#allocation2 + $0xc0] sm:$0xff]  ;;  %v611_v41 = vpop.f32.mrb[5].mxu1 }
 0x12f   : > { %762 = vst.msk [vmem:[#allocation2 + $0xc9] sm:$0xff] %vm690_vm2, %v673_v14  ;;  %v6042_v59 = vld [vmem:[#allocation2 + $0xa8] sm:$0xff]  ;;  %849 = vst.msk [vmem:[#allocation3 + $0x100] sm:$0xff] %vm690_vm2, %v6038_v23  ;;  %v1164_v25 = vrot.slane %v6038_v23, 2  ;;  %v612_v43 = vadd.f32 %v5690_v4, %v611_v41  ;;  %v5277_v13 = vpop.f32.mrb[6].mxu1 }
 0x130   : > { %1472 = vrot.lane.b32.xlu1 %v923_v35, %s5437_s19  ;;  %760 = vst.msk [vmem:[#allocation2 + $0xb1] sm:$0xff] %vm690_vm2, %v671_v20  ;;  %847 = vst.msk [vmem:[#allocation3 + $0xe0] sm:$0xff] %vm690_vm2, %v6042_v59  ;;  %v1159_v54 = vrot.slane %v6042_v59, 2  ;;  %v931_v20 = vsel %vm913_vm4, %v929_v44, %v930_v61 }
 0x131   : > { %v678_v12 = vmax.f32 %v612_v43, 0.0  ;;  %v945_v43 = vrot.slane %v5894_v57, 1 }
 0x132   : > { %1604 = vrot.lane.b32.xlu0 %v1131_v52, %s5438_s22 }
 0x133   : > { %767 = vst.msk [vmem:[#allocation2 + $0x109] sm:$0xff] %vm690_vm2, %v678_v12 }
 0x134   : > { %1606 = vrot.lane.b32.xlu1 %v1133_v60, %s5438_s22 }
 0x136   : > { %998 = vrot.lane.b32.xlu0 %v921_v33, %s5431_s25  ;;  %v6040_v24 = vld [vmem:[#allocation2 + $0xc8] sm:$0xff]  ;;  %v6052_v58 = vld [vmem:[#allocation2 + $0xd0] sm:$0x3] }
 0x137   : > { %850 = vst.msk [vmem:[#allocation3 + $0x110] sm:$0xff] %vm690_vm2, %v6040_v24  ;;  %v6050_v51 = vld [vmem:[#allocation2 + $0xb0] sm:$0xff]  ;;  %v1165_v26 = vrot.slane %v6040_v24, 2  ;;  %v1167_v49 = vrot.slane %v6052_v58, 2  ;;  %v6061_v53 = vld [vmem:[#allocation2 + $0xb8] sm:$0x3] }
 0x138   : > { %1000 = vrot.lane.b32.xlu1 %v923_v35, %s5431_s25  ;;  %848 = vst.msk [vmem:[#allocation3 + $0xf0] sm:$0xff] %vm690_vm2, %v6050_v51  ;;  %v1160_v31 = vrot.slane %v6050_v51, 2  ;;  %v1162_v33 = vrot.slane %v6061_v53, 2  ;;  %v950_v32 = vrot.slane %v6050_v51, 1 }
 0x139   : > { %v6067_v15 = vsel %vm1123_vm5, %v1164_v25, %v1165_v26  ;;  %v6070_v28 = vsel %vm1123_vm5, %v1165_v26, %v1167_v49 }
 0x13a   : > { %1208 = vrot.lane.b32.xlu0 %v1131_v52, %s5432_s26  ;;  %2048 = vst.msk [vmem:[#allocation3 + $0xc8] sm:$0xff] %vm690_vm2, %v6067_v15  ;;  %2049 = vst.msk [vmem:[#allocation3 + $0xd8] sm:$0xff] %vm690_vm2, %v6070_v28  ;;  %v6081_v34 = vsel %vm1123_vm5, %v1159_v54, %v1160_v31  ;;  %v6086_v35 = vsel %vm1123_vm5, %v1160_v31, %v1162_v33  ;;  %v6171_v31 = vld [vmem:[#allocation2 + $0x108] sm:$0xff] }
 0x13b   : > { %2046 = vst.msk [vmem:[#allocation3 + $0xa8] sm:$0xff] %vm690_vm2, %v6081_v34  ;;  %2047 = vst.msk [vmem:[#allocation3 + $0xb8] sm:$0xff] %vm690_vm2, %v6086_v35  ;;  %v1179_v12 = vrot.slane %v6171_v31, 2 }
 0x13c   : > { %1210 = vrot.lane.b32.xlu1 %v1133_v60, %s5432_s26  ;;  %v620_v60 = vadd.f32 %v5276_v56, %v5690_v4  ;;  %855 = vst.msk [vmem:[#allocation3 + $0x160] sm:$0xff] %vm690_vm2, %v6171_v31 }
 0x13e   : > { %1898 = vrot.lane.b32.xlu0 %v5782_v0, %s5436_s14  ;;  %v680_v3 = vmax.f32 %v620_v60, 0.0 }
 0x140   : > { %1900 = vrot.lane.b32.xlu1 %v963_v22, %s5436_s14  ;;  %769 = vst.msk [vmem:[#allocation2 + $0x121] sm:$0xff] %vm690_vm2, %v680_v3 }
 0x142   : > { %1502 = vrot.lane.b32.xlu0 %v5782_v0, %s5437_s19 }
 0x144   : > { %1504 = vrot.lane.b32.xlu1 %v963_v22, %s5437_s19 }
 0x146   : > { %1636 = vrot.lane.b32.xlu0 %v5805_v10, %s5438_s22 }
 0x148   : > { %1638 = vrot.lane.b32.xlu1 %v5808_v11, %s5438_s22 }
 0x14a   : > { %1030 = vrot.lane.b32.xlu0 %v5782_v0, %s5431_s25  ;;  %v934_v0 = vrot.slane %v5775_v62, 1 }
 0x14c   : > { %1032 = vrot.lane.b32.xlu1 %v963_v22, %s5431_s25  ;;  %v933_v22 = vsel %vm913_vm4, %v930_v61, %v932_v9  ;;  %v944_v61 = vrot.slane %v5884_v48, 1 }
 0x14e   : > { %1240 = vrot.lane.b32.xlu0 %v5805_v10, %s5432_s26  ;;  %v935_v10 = vrot.slane %v5792_v6, 1 }
 0x150   : > { %1242 = vrot.lane.b32.xlu1 %v5808_v11, %s5432_s26  ;;  %v937_v11 = vrot.slane %v5796_v7, 1  ;;  %v936_v46 = vsel %vm913_vm4, %v934_v0, %v935_v10 }
 0x152   : > { %1743 = vrot.lane.b32.xlu0 %v5775_v62, %s5433_s29  ;;  %v938_v47 = vsel %vm913_vm4, %v935_v10, %v937_v11 }
 0x154   : > { %1745 = vrot.lane.b32.xlu1 %v5792_v6, %s5433_s29 }
 0x156   : > { %1347 = vrot.lane.b32.xlu0 %v5775_v62, %s5434_s30 }
 0x158   : > { %1349 = vrot.lane.b32.xlu1 %v5792_v6, %s5434_s30 }
 0x15a   : > { %1739 = vrot.lane.b32.xlu0 %v5787_v2, %s5433_s29 }
 0x15c   : > { %1741 = vrot.lane.b32.xlu1 %v5842_v29, %s5433_s29 }
 0x15e   : > { %1343 = vrot.lane.b32.xlu0 %v5787_v2, %s5434_s30  ;;  %v623_v2 = vadd.f32 %v5277_v13, %v5690_v4 }
 0x160   : > { %1345 = vrot.lane.b32.xlu1 %v5842_v29, %s5434_s30  ;;  %v614_v29 = vpop.f32.mrb[7].mxu1  ;;  %v681_v30 = vmax.f32 %v623_v2, 0.0 }
 0x162   : > { %1878 = vrot.lane.b32.xlu0 %v936_v46, %s5436_s14  ;;  %770 = vst.msk [vmem:[#allocation2 + $0x129] sm:$0xff] %vm690_vm2, %v681_v30 }
 0x164   : > { %1880 = vrot.lane.b32.xlu1 %v938_v47, %s5436_s14 }
 0x166   : > { %1482 = vrot.lane.b32.xlu0 %v936_v46, %s5437_s19 }
 0x168   : > { %v6119_v62 = vpop.permute.xlu0 %1735  ;;  %1484 = vrot.lane.b32.xlu1 %v938_v47, %s5437_s19 }
 0x16a   : > { %v6122_v6 = vpop.permute.xlu1 %1737  ;;  %1616 = vrot.lane.b32.xlu0 %v5820_v16, %s5438_s22 }
 0x16c   : > { %v6126_v7 = vpop.permute.xlu0 %1339  ;;  %1618 = vrot.lane.b32.xlu1 %v5825_v18, %s5438_s22 }
 0x16e   : > { %v6130_v52 = vpop.permute.xlu1 %1341  ;;  %1010 = vrot.lane.b32.xlu0 %v936_v46, %s5431_s25 }
 0x170   : > { %v6133_v50 = vpop.permute.xlu0 %1767  ;;  %1012 = vrot.lane.b32.xlu1 %v938_v47, %s5431_s25 }
 0x172   : > { %v6140_v63 = vpop.permute.xlu1 %1769  ;;  %1220 = vrot.lane.b32.xlu0 %v5820_v16, %s5432_s26  ;;  %v615_v16 = vadd.f32 %v5690_v4, %v614_v29  ;;  %v947_v29 = vrot.slane %v5901_v45, 1 }
 0x174   : > { %v6145_v14 = vpop.permute.xlu0 %1371  ;;  %1222 = vrot.lane.b32.xlu1 %v5825_v18, %s5432_s26  ;;  %v679_v18 = vmax.f32 %v615_v16, 0.0  ;;  %v946_v16 = vsel %vm913_vm4, %v944_v61, %v945_v43  ;;  %v948_v30 = vsel %vm913_vm4, %v945_v43, %v947_v29 }
 0x176   : > { %v6154_v21 = vpop.permute.xlu1 %1373  ;;  %1874 = vrot.lane.b32.xlu0 %v931_v20, %s5436_s14  ;;  %768 = vst.msk [vmem:[#allocation2 + $0x111] sm:$0xff] %vm690_vm2, %v679_v18  ;;  %v6250_v18 = vld [vmem:[#allocation2 + $0x128] sm:$0xff] }
 0x177   : > { %858 = vst.msk [vmem:[#allocation3 + $0x190] sm:$0xff] %vm690_vm2, %v6250_v18  ;;  %v1185_v61 = vrot.slane %v6250_v18, 2 }
 0x178   : > { %1876 = vrot.lane.b32.xlu1 %v933_v22, %s5436_s14  ;;  %v1336_v25 = vpop.permute.xlu0 %1335 }
 0x179   : > { %1432 = vst.msk [vmem:[#allocation3] sm:$0xff] %vm1431_vm8, %v1336_v25 }
 0x17a   : > { %v1338_v26 = vpop.permute.xlu1 %1337  ;;  %1478 = vrot.lane.b32.xlu0 %v931_v20, %s5437_s19 }
 0x17b   : > { %1433 = vst.msk [vmem:[#allocation3 + $0x10] sm:$0xff] %vm1431_vm8, %v1338_v26 }
 0x17c   : > { %1480 = vrot.lane.b32.xlu1 %v933_v22, %s5437_s19  ;;  %v6165_v49 = vpop.permute.xlu0 %1763 }
 0x17d   : > { %8569 = vst [vmem:[#allocation6_spill] sm:$0xff] %v6165_v49  ;;  %v6179_v0 = vld [vmem:[#allocation2 + $0x110] sm:$0xff]  ;;  %v6220_v3 = vld [vmem:[#allocation2 + $0x118] sm:$0x3] }
 0x17e   : > { %v6167_v54 = vpop.permute.xlu1 %1765  ;;  %1612 = vrot.lane.b32.xlu0 %v5863_v39, %s5438_s22  ;;  %856 = vst.msk [vmem:[#allocation3 + $0x170] sm:$0xff] %vm690_vm2, %v6179_v0  ;;  %v1180_v13 = vrot.slane %v6179_v0, 2  ;;  %v1182_v2 = vrot.slane %v6220_v3, 2 }
 0x17f   : > { %8570 = vst [vmem:[#allocation7_spill] sm:$0xff] %v6167_v54 }
 0x180   : > { %1614 = vrot.lane.b32.xlu1 %v5866_v42, %s5438_s22  ;;  %v6177_v33 = vpop.permute.xlu0 %1367 }
 0x182   : > { %v6183_v10 = vpop.permute.xlu1 %1369  ;;  %1006 = vrot.lane.b32.xlu0 %v931_v20, %s5431_s25  ;;  %v6237_v20 = vsel %vm1123_vm5, %v1180_v13, %v1182_v2 }
 0x183   : > { %2055 = vst.msk [vmem:[#allocation3 + $0x138] sm:$0xff] %vm690_vm2, %v6237_v20 }
 0x184   : > { %1008 = vrot.lane.b32.xlu1 %v933_v22, %s5431_s25  ;;  %v6187_v11 = vpop.permute.xlu0 %1870  ;;  %v6248_v22 = vld [vmem:[#allocation2 + $0x120] sm:$0xff] }
 0x185   : > { %857 = vst.msk [vmem:[#allocation3 + $0x180] sm:$0xff] %vm690_vm2, %v6248_v22 }
 0x186   : > { %v6189_v46 = vpop.permute.xlu1 %1872  ;;  %1216 = vrot.lane.b32.xlu0 %v5863_v39, %s5432_s26 }
 0x188   : > { %1218 = vrot.lane.b32.xlu1 %v5866_v42, %s5432_s26  ;;  %v6195_v47 = vpop.permute.xlu0 %1474 }
 0x18a   : > { %v6197_v56 = vpop.permute.xlu1 %1476  ;;  %1751 = vrot.lane.b32.xlu0 %v5884_v48, %s5433_s29 }
 0x18c   : > { %1753 = vrot.lane.b32.xlu1 %v5894_v57, %s5433_s29  ;;  %v6203_v60 = vpop.permute.xlu0 %1608 }
 0x18e   : > { %v6205_v41 = vpop.permute.xlu1 %1610  ;;  %1355 = vrot.lane.b32.xlu0 %v5884_v48, %s5434_s30 }
 0x190   : > { %1357 = vrot.lane.b32.xlu1 %v5894_v57, %s5434_s30  ;;  %v1003_v39 = vpop.permute.xlu0 %1002  ;;  %v6234_v57 = vsel %vm1123_vm5, %v1179_v12, %v1180_v13 }
 0x191   : > { %1095 = vst.msk [vmem:[#allocation3 + $0x40] sm:$0xff] %vm1090_vm6, %v1003_v39  ;;  %v6262_v39 = vld [vmem:[#allocation2 + $0x130] sm:$0x3] }
 0x192   : > { %v1005_v42 = vpop.permute.xlu1 %1004  ;;  %1747 = vrot.lane.b32.xlu0 %v5889_v55, %s5433_s29  ;;  %2054 = vst.msk [vmem:[#allocation3 + $0x128] sm:$0xff] %vm690_vm2, %v6234_v57  ;;  %v1187_v43 = vrot.slane %v6262_v39, 2 }
 0x193   : > { %1096 = vst.msk [vmem:[#allocation3 + $0x50] sm:$0xff] %vm1090_vm6, %v1005_v42 }
 0x194   : > { %1749 = vrot.lane.b32.xlu1 %v5899_v38, %s5433_s29  ;;  %v1213_v44 = vpop.permute.xlu0 %1212  ;;  %v6276_v13 = vsel %vm1123_vm5, %v1185_v61, %v1187_v43 }
 0x195   : > { %1305 = vst.msk [vmem:[#allocation3 + $0x40] sm:$0xff] %vm1300_vm7, %v1213_v44  ;;  %v1184_v44 = vrot.slane %v6248_v22, 2 }
 0x196   : > { %v1215_v9 = vpop.permute.xlu1 %1214  ;;  %1351 = vrot.lane.b32.xlu0 %v5889_v55, %s5434_s30  ;;  %2057 = vst.msk [vmem:[#allocation3 + $0x158] sm:$0xff] %vm690_vm2, %v6276_v13 }
 0x197   : > { %1306 = vst.msk [vmem:[#allocation3 + $0x50] sm:$0xff] %vm1300_vm7, %v1215_v9  ;;  %v6273_v12 = vsel %vm1123_vm5, %v1184_v44, %v1185_v61 }
 0x198   : > { %1353 = vrot.lane.b32.xlu1 %v5899_v38, %s5434_s30  ;;  %v6231_v48 = vpop.permute.xlu0 %1902  ;;  %2056 = vst.msk [vmem:[#allocation3 + $0x148] sm:$0xff] %vm690_vm2, %v6273_v12 }
 0x19a   : > { %v6244_v45 = vpop.permute.xlu1 %1904  ;;  %1886 = vrot.lane.b32.xlu0 %v946_v16, %s5436_s14 }
 0x19c   : > { %1888 = vrot.lane.b32.xlu1 %v948_v30, %s5436_s14  ;;  %v6253_v25 = vpop.permute.xlu0 %1506 }
 0x19e   : > { %v6259_v26 = vpop.permute.xlu1 %1508  ;;  %1490 = vrot.lane.b32.xlu0 %v946_v16, %s5437_s19 }
 0x1a0   : > { %1492 = vrot.lane.b32.xlu1 %v948_v30, %s5437_s19  ;;  %v1471_v42 = vpop.permute.xlu0 %1470 }
 0x1a1   : > { %1567 = vst.msk [vmem:[#allocation3] sm:$0xff] %vm1566_vm9, %v1471_v42  ;;  %v5280_v42 = vpop.f32.mrb[8].mxu1 }
 0x1a2   : > { %v1473_v9 = vpop.permute.xlu1 %1472  ;;  %1624 = vrot.lane.b32.xlu0 %v5921_v5, %s5438_s22  ;;  %v636_v61 = vadd.f32 %v5280_v42, %v5690_v4  ;;  %v627_v43 = vpop.f32.mrb[9].mxu1 }
 0x1a3   : > { %1568 = vst.msk [vmem:[#allocation3 + $0x10] sm:$0xff] %vm1566_vm9, %v1473_v9 }
 0x1a4   : > { %1626 = vrot.lane.b32.xlu1 %v5924_v8, %s5438_s22  ;;  %v1605_v2 = vpop.permute.xlu0 %1604 }
 0x1a5   : > { %1701 = vst.msk [vmem:[#allocation3] sm:$0xff] %vm1700_vm10, %v1605_v2 }
 0x1a6   : > { %1832 = vst.msk [vmem:[#allocation3] sm:$0xff] %vm1831_vm11, %v6119_v62  ;;  %v1607_v29 = vpop.permute.xlu1 %1606  ;;  %1018 = vrot.lane.b32.xlu0 %v946_v16, %s5431_s25  ;;  %v939_v62 = vrot.slane %v5889_v55, 1  ;;  %v628_v16 = vadd.f32 %v5690_v4, %v627_v43  ;;  %v2075_v43 = vld [vmem:[#allocation3 + $0x38] sm:$0xff] }
 0x1a7   : > { %1967 = vst.msk [vmem:[#allocation3] sm:$0xff] %vm1966_vm12, %v6187_v11  ;;  %v940_v11 = vrot.slane %v5899_v38, 1 }
 0x1a8   : > { %1702 = vst.msk [vmem:[#allocation3 + $0x10] sm:$0xff] %vm1700_vm10, %v1607_v29  ;;  %1020 = vrot.lane.b32.xlu1 %v948_v30, %s5431_s25  ;;  %v999_v44 = vpop.permute.xlu0 %998  ;;  %v942_v30 = vrot.slane %v5915_v1, 1  ;;  %v682_v2 = vmax.f32 %v628_v16, 0.0  ;;  %v5281_v29 = vpop.f32.mrb[10].mxu1 }
 0x1a9   : > { %1833 = vst.msk [vmem:[#allocation3 + $0x10] sm:$0xff] %vm1831_vm11, %v6122_v6  ;;  %v684_v6 = vmax.f32 %v636_v61, 0.0  ;;  %v639_v55 = vadd.f32 %v5281_v29, %v5690_v4  ;;  %v630_v38 = vpop.f32.mrb[11].mxu1  ;;  %v2073_v61 = vld [vmem:[#allocation3 + $0x28] sm:$0xff] }
 0x1aa   : > { %1968 = vst.msk [vmem:[#allocation3 + $0x10] sm:$0xff] %vm1966_vm12, %v6189_v46  ;;  %v1001_v9 = vpop.permute.xlu1 %1000  ;;  %1228 = vrot.lane.b32.xlu0 %v5921_v5, %s5432_s26  ;;  %v941_v5 = vsel %vm913_vm4, %v939_v62, %v940_v11  ;;  %v631_v42 = vadd.f32 %v5690_v4, %v630_v38  ;;  %v955_v38 = vrot.slane %v6040_v24, 1 }
 0x1ab   : > { %1093 = vst.msk [vmem:[#allocation3 + $0x20] sm:$0xff] %vm1090_vm6, %v999_v44  ;;  %1094 = vst.msk [vmem:[#allocation3 + $0x30] sm:$0xff] %vm1090_vm6, %v1001_v9  ;;  %v943_v44 = vsel %vm913_vm4, %v940_v11, %v942_v30 }
 0x1ac   : > { %1230 = vrot.lane.b32.xlu1 %v5924_v8, %s5432_s26  ;;  %v1209_v46 = vpop.permute.xlu0 %1208  ;;  %773 = vst.msk [vmem:[#allocation2 + $0x151] sm:$0xff] %vm690_vm2, %v684_v6  ;;  %771 = vst.msk [vmem:[#allocation2 + $0x139] sm:$0xff] %vm690_vm2, %v682_v2  ;;  %v685_v8 = vmax.f32 %v639_v55, 0.0  ;;  %v683_v62 = vmax.f32 %v631_v42, 0.0 }
 0x1ad   : > { %1303 = vst.msk [vmem:[#allocation3 + $0x20] sm:$0xff] %vm1300_vm7, %v1209_v46 }
 0x1ae   : > { %1434 = vst.msk [vmem:[#allocation3 + $0x20] sm:$0xff] %vm1431_vm8, %v6126_v7  ;;  %v1211_v1 = vpop.permute.xlu1 %1210  ;;  %1882 = vrot.lane.b32.xlu0 %v941_v5, %s5436_s14  ;;  %v2068_v7 = vld [vmem:[#allocation3] sm:$0xff] }
 0x1af   : > { %1569 = vst.msk [vmem:[#allocation3 + $0x20] sm:$0xff] %vm1566_vm9, %v6195_v47 }
 0x1b0   : > { %1304 = vst.msk [vmem:[#allocation3 + $0x30] sm:$0xff] %vm1300_vm7, %v1211_v1  ;;  %1884 = vrot.lane.b32.xlu1 %v943_v44, %s5436_s14  ;;  %v6325_v4 = vpop.permute.xlu0 %1898 }
 0x1b1   : > { %1435 = vst.msk [vmem:[#allocation3 + $0x30] sm:$0xff] %vm1431_vm8, %v6130_v52  ;;  %8571 = vst [vmem:[#allocation8_spill] sm:$0xff] %v6325_v4  ;;  %v2070_v16 = vld [vmem:[#allocation3 + $0x10] sm:$0xff] }
 0x1b2   : > { %1703 = vst.msk [vmem:[#allocation3 + $0x20] sm:$0xff] %vm1700_vm10, %v6203_v60  ;;  %v2132_v47 = vpack.c.bf16 %v2070_v16, %v2068_v7  ;;  %v6333_v52 = vpop.permute.xlu1 %1900  ;;  %1486 = vrot.lane.b32.xlu0 %v941_v5, %s5437_s19  ;;  %v2135_v60 = vpack.c.bf16 %v2075_v43, %v2073_v61  ;;  %v957_v61 = vrot.slane %v6052_v58, 1 }
 0x1b3   : > { %774 = vst.msk [vmem:[#allocation2 + $0x159] sm:$0xff] %vm690_vm2, %v685_v8  ;;  %772 = vst.msk [vmem:[#allocation2 + $0x141] sm:$0xff] %vm690_vm2, %v683_v62  ;;  %v6425_v16 = vld [vmem:[#allocation2 + $0x150] sm:$0xff] }
 0x1b4   : > { %1570 = vst.msk [vmem:[#allocation3 + $0x30] sm:$0xff] %vm1566_vm9, %v6197_v56  ;;  %8572 = vst [vmem:[#allocation9_spill] sm:$0xff] %v6333_v52  ;;  %2324 = vmatmul.mubr.bf16.vlgmr.msra.gmra.mrb[16].mxu1 %v2132_v47  ;;  %1488 = vrot.lane.b32.xlu1 %v943_v44, %s5437_s19  ;;  %v6338_v11 = vpop.permute.xlu0 %1502  ;;  %v6344_v56 = vld [vmem:[#allocation2 + $0x138] sm:$0xff]  ;;  %v958_v7 = vsel %vm913_vm4, %v955_v38, %v957_v61  ;;  %v5284_v61 = vpop.f32.mrb[12].mxu1 }
 0x1b5   : > { %1704 = vst.msk [vmem:[#allocation3 + $0x30] sm:$0xff] %vm1700_vm10, %v6205_v41  ;;  %4994 = vmatprep.mubr.msk.bf16.mxu1 %vm690_vm2, %v2135_v60  ;;  %v1189_v1 = vrot.slane %v6344_v56, 2 }
 0x1b6   : > { %v6340_v9 = vpop.permute.xlu1 %1504  ;;  %1620 = vrot.lane.b32.xlu0 %v5938_v17, %s5438_s22  ;;  %859 = vst.msk [vmem:[#allocation3 + $0x1a0] sm:$0xff] %vm690_vm2, %v6344_v56  ;;  %861 = vst.msk [vmem:[#allocation3 + $0x1c0] sm:$0xff] %vm690_vm2, %v6425_v16 }
 0x1b8   : > { %1622 = vrot.lane.b32.xlu1 %v5945_v19, %s5438_s22  ;;  %v6350_v41 = vpop.permute.xlu0 %1636 }
 0x1ba   : > { %v6352_v6 = vld [vmem:[#allocation2 + $0x140] sm:$0xff]  ;;  %v6356_v30 = vpop.permute.xlu1 %1638  ;;  %1014 = vrot.lane.b32.xlu0 %v941_v5, %s5431_s25  ;;  %v6399_v5 = vld [vmem:[#allocation2 + $0x148] sm:$0x3]  ;;  %v6427_v47 = vld [vmem:[#allocation2 + $0x158] sm:$0xff] }
 0x1bb   : > { %860 = vst.msk [vmem:[#allocation3 + $0x1b0] sm:$0xff] %vm690_vm2, %v6352_v6  ;;  %v1190_v8 = vrot.slane %v6352_v6, 2  ;;  %862 = vst.msk [vmem:[#allocation3 + $0x1d0] sm:$0xff] %vm690_vm2, %v6427_v47 }
 0x1bc   : > { %1016 = vrot.lane.b32.xlu1 %v943_v44, %s5431_s25  ;;  %v1031_v2 = vpop.permute.xlu0 %1030  ;;  %v1192_v44 = vrot.slane %v6399_v5, 2 }
 0x1bd   : > { %1109 = vst.msk [vmem:[#allocation3 + $0x120] sm:$0xff] %vm1090_vm6, %v1031_v2 }
 0x1be   : > { %v1033_v29 = vpop.permute.xlu1 %1032  ;;  %1224 = vrot.lane.b32.xlu0 %v5938_v17, %s5432_s26  ;;  %v6414_v43 = vsel %vm1123_vm5, %v1190_v8, %v1192_v44 }
 0x1bf   : > { %1110 = vst.msk [vmem:[#allocation3 + $0x130] sm:$0xff] %vm1090_vm6, %v1033_v29 }
 0x1c0   : > { %1226 = vrot.lane.b32.xlu1 %v5945_v19, %s5432_s26  ;;  %v1241_v46 = vpop.permute.xlu0 %1240  ;;  %2059 = vst.msk [vmem:[#allocation3 + $0x178] sm:$0xff] %vm690_vm2, %v6414_v43 }
 0x1c1   : > { %1319 = vst.msk [vmem:[#allocation3 + $0x120] sm:$0xff] %vm1300_vm7, %v1241_v46  ;;  %v6442_v46 = vld [vmem:[#allocation2 + $0x160] sm:$0x3] }
 0x1c2   : > { %1450 = vst.msk [vmem:[#allocation3 + $0x120] sm:$0xff] %vm1431_vm8, %v6145_v14  ;;  %v1243_v55 = vpop.permute.xlu1 %1242  ;;  %1759 = vrot.lane.b32.xlu0 %v6038_v23, %s5433_s29 }
 0x1c3   : > { %1585 = vst.msk [vmem:[#allocation3 + $0x120] sm:$0xff] %vm1566_vm9, %v6253_v25 }
 0x1c4   : > { %1320 = vst.msk [vmem:[#allocation3 + $0x130] sm:$0xff] %vm1300_vm7, %v1243_v55  ;;  %1761 = vrot.lane.b32.xlu1 %v6040_v24, %s5433_s29  ;;  %v6378_v17 = vpop.permute.xlu0 %1743  ;;  %v1194_v55 = vrot.slane %v6425_v16, 2 }
 0x1c5   : > { %1451 = vst.msk [vmem:[#allocation3 + $0x130] sm:$0xff] %vm1431_vm8, %v6154_v21 }
 0x1c6   : > { %1586 = vst.msk [vmem:[#allocation3 + $0x130] sm:$0xff] %vm1566_vm9, %v6259_v26  ;;  %v6382_v19 = vpop.permute.xlu1 %1745  ;;  %1363 = vrot.lane.b32.xlu0 %v6038_v23, %s5434_s30  ;;  %v954_v26 = vrot.slane %v6038_v23, 1 }
 0x1c8   : > { %1365 = vrot.lane.b32.xlu1 %v6040_v24, %s5434_s30  ;;  %v6388_v14 = vpop.permute.xlu0 %1347  ;;  %v6411_v24 = vsel %vm1123_vm5, %v1189_v1, %v1190_v8  ;;  %v956_v62 = vsel %vm913_vm4, %v954_v26, %v955_v38  ;;  %v1195_v26 = vrot.slane %v6427_v47, 2  ;;  %v1197_v38 = vrot.slane %v6442_v46, 2 }
 0x1c9   : > { %2058 = vst.msk [vmem:[#allocation3 + $0x168] sm:$0xff] %vm690_vm2, %v6411_v24 }
 0x1ca   : > { %v6390_v25 = vpop.permute.xlu1 %1349  ;;  %1755 = vrot.lane.b32.xlu0 %v6042_v59, %s5433_s29  ;;  %v6456_v1 = vsel %vm1123_vm5, %v1194_v55, %v1195_v26  ;;  %v6459_v8 = vsel %vm1123_vm5, %v1195_v26, %v1197_v38  ;;  %v643_v26 = vpop.f32.mrb[13].mxu1  ;;  %v949_v38 = vrot.slane %v6042_v59, 1 }
 0x1cb   : > { %2060 = vst.msk [vmem:[#allocation3 + $0x188] sm:$0xff] %vm690_vm2, %v6456_v1  ;;  %2061 = vst.msk [vmem:[#allocation3 + $0x198] sm:$0xff] %vm690_vm2, %v6459_v8  ;;  %v5285_v49 = vpop.f32.mrb[14].mxu1 }
 0x1cc   : > { %1757 = vrot.lane.b32.xlu1 %v6050_v51, %s5433_s29  ;;  %v1740_v21 = vpop.permute.xlu0 %1739 }
 0x1cd   : > { %1834 = vst.msk [vmem:[#allocation3 + $0x20] sm:$0xff] %vm1831_vm11, %v1740_v21 }
 0x1ce   : > { %v1742_v42 = vpop.permute.xlu1 %1741  ;;  %1359 = vrot.lane.b32.xlu0 %v6042_v59, %s5434_s30 }
 0x1cf   : > { %1835 = vst.msk [vmem:[#allocation3 + $0x30] sm:$0xff] %vm1831_vm11, %v1742_v42 }
 0x1d0   : > { %1361 = vrot.lane.b32.xlu1 %v6050_v51, %s5434_s30  ;;  %v1344_v23 = vpop.permute.xlu0 %1343  ;;  %v646_v51 = vpop.f32.mrb[15].mxu1 }
 0x1d1   : > { %1436 = vst.msk [vmem:[#allocation3 + $0x40] sm:$0xff] %vm1431_vm8, %v1344_v23 }
 0x1d2   : > { %v1346_v58 = vpop.permute.xlu1 %1345  ;;  %1894 = vrot.lane.b32.xlu0 %v956_v62, %s5436_s14 }
 0x1d3   : > { %1437 = vst.msk [vmem:[#allocation3 + $0x50] sm:$0xff] %vm1431_vm8, %v1346_v58  ;;  %v5419_v58 = vld [vmem:[%s8557_s2] ss:$0 sm:$0xff] }
 0x1d4   : > { %1896 = vrot.lane.b32.xlu1 %v958_v7, %s5436_s14  ;;  %v6430_v60 = vpop.permute.xlu0 %1878  ;;  %v652_v55 = vadd.f32 %v5419_v58, %v5284_v61  ;;  %v644_v52 = vadd.f32 %v5419_v58, %v643_v26  ;;  %v655_v59 = vadd.f32 %v5419_v58, %v5285_v49 }
 0x1d6   : > { %v6436_v2 = vpop.permute.xlu1 %1880  ;;  %1498 = vrot.lane.b32.xlu0 %v956_v62, %s5437_s19  ;;  %v686_v4 = vmax.f32 %v644_v52, 0.0 }
 0x1d8   : > { %1500 = vrot.lane.b32.xlu1 %v958_v7, %s5437_s19  ;;  %v6440_v29 = vpop.permute.xlu0 %1482  ;;  %775 = vst.msk [vmem:[#allocation2 + $0x169] sm:$0xff] %vm690_vm2, %v686_v4 }
 0x1da   : > { %v6445_v21 = vpop.permute.xlu1 %1484  ;;  %1632 = vrot.lane.b32.xlu0 %v6067_v15, %s5438_s22 }
 0x1dc   : > { %1634 = vrot.lane.b32.xlu1 %v6070_v28, %s5438_s22  ;;  %v6453_v42 = vpop.permute.xlu0 %1616 }
 0x1de   : > { %v6465_v44 = vpop.permute.xlu1 %1618  ;;  %1026 = vrot.lane.b32.xlu0 %v956_v62, %s5431_s25  ;;  %v688_v62 = vmax.f32 %v652_v55, 0.0 }
 0x1df   : > { %v6501_v26 = vld [vmem:[#allocation2 + $0x168] sm:$0xff] }
 0x1e0   : > { %1028 = vrot.lane.b32.xlu1 %v958_v7, %s5431_s25  ;;  %v1011_v23 = vpop.permute.xlu0 %1010  ;;  %v952_v7 = vrot.slane %v6061_v53, 1  ;;  %777 = vst.msk [vmem:[#allocation2 + $0x181] sm:$0xff] %vm690_vm2, %v688_v62  ;;  %v689_v53 = vmax.f32 %v655_v59, 0.0  ;;  %v2077_v62 = vld [vmem:[#allocation3 + $0x48] sm:$0xff]  ;;  %863 = vst.msk [vmem:[#allocation3 + $0x1e0] sm:$0xff] %vm690_vm2, %v6501_v26 }
 0x1e1   : > { %1099 = vst.msk [vmem:[#allocation3 + $0x80] sm:$0xff] %vm1090_vm6, %v1011_v23  ;;  %v951_v23 = vsel %vm913_vm4, %v949_v38, %v950_v32 }
 0x1e2   : > { %v1013_v54 = vpop.permute.xlu1 %1012  ;;  %1236 = vrot.lane.b32.xlu0 %v6067_v15, %s5432_s26  ;;  %v647_v15 = vadd.f32 %v5419_v58, %v646_v51  ;;  %778 = vst.msk [vmem:[#allocation2 + $0x189] sm:$0xff] %vm690_vm2, %v689_v53 }
 0x1e3   : > { %1100 = vst.msk [vmem:[#allocation3 + $0x90] sm:$0xff] %vm1090_vm6, %v1013_v54 }
 0x1e4   : > { %1238 = vrot.lane.b32.xlu1 %v6070_v28, %s5432_s26  ;;  %v1221_v61 = vpop.permute.xlu0 %1220  ;;  %v953_v28 = vsel %vm913_vm4, %v950_v32, %v952_v7  ;;  %v687_v52 = vmax.f32 %v647_v15, 0.0  ;;  %v2079_v7 = vld [vmem:[#allocation3 + $0x58] sm:$0xff] }
 0x1e5   : > { %1309 = vst.msk [vmem:[#allocation3 + $0x80] sm:$0xff] %vm1300_vm7, %v1221_v61  ;;  %v2137_v53 = vpack.c.bf16 %v2079_v7, %v2077_v62 }
 0x1e6   : > { %v1223_v54 = vpop.permute.xlu1 %1222  ;;  %1890 = vrot.lane.b32.xlu0 %v951_v23, %s5436_s14  ;;  %776 = vst.msk [vmem:[#allocation2 + $0x171] sm:$0xff] %vm690_vm2, %v687_v52 }
 0x1e7   : > { %1310 = vst.msk [vmem:[#allocation3 + $0x90] sm:$0xff] %vm1300_vm7, %v1223_v54 }
 0x1e8   : > { %1892 = vrot.lane.b32.xlu1 %v953_v28, %s5436_s14  ;;  %v1875_v49 = vpop.permute.xlu0 %1874 }
 0x1e9   : > { %1969 = vst.msk [vmem:[#allocation3 + $0x20] sm:$0xff] %vm1966_vm12, %v1875_v49  ;;  %v972_v49 = vrot.slane %v6220_v3, 1 }
 0x1ea   : > { %v1877_v4 = vpop.permute.xlu1 %1876  ;;  %1494 = vrot.lane.b32.xlu0 %v951_v23, %s5437_s19 }
 0x1eb   : > { %1970 = vst.msk [vmem:[#allocation3 + $0x30] sm:$0xff] %vm1966_vm12, %v1877_v4 }
 0x1ec   : > { %1496 = vrot.lane.b32.xlu1 %v953_v28, %s5437_s19  ;;  %v1479_v58 = vpop.permute.xlu0 %1478 }
 0x1ed   : > { %1571 = vst.msk [vmem:[#allocation3 + $0x40] sm:$0xff] %vm1566_vm9, %v1479_v58  ;;  %v6503_v38 = vld [vmem:[#allocation2 + $0x170] sm:$0xff]  ;;  %v6581_v7 = vld [vmem:[#allocation2 + $0x178] sm:$0x3] }
 0x1ee   : > { %v1481_v32 = vpop.permute.xlu1 %1480  ;;  %1628 = vrot.lane.b32.xlu0 %v6081_v34, %s5438_s22  ;;  %864 = vst.msk [vmem:[#allocation3 + $0x1f0] sm:$0xff] %vm690_vm2, %v6503_v38 }
 0x1ef   : > { %1572 = vst.msk [vmem:[#allocation3 + $0x50] sm:$0xff] %vm1566_vm9, %v1481_v32 }
 0x1f0   : > { %1630 = vrot.lane.b32.xlu1 %v6086_v35, %s5438_s22  ;;  %v1613_v55 = vpop.permute.xlu0 %1612  ;;  %v2072_v59 = vld [vmem:[#allocation3 + $0x20] sm:$0xff] }
 0x1f1   : > { %1705 = vst.msk [vmem:[#allocation3 + $0x40] sm:$0xff] %vm1700_vm10, %v1613_v55 }
 0x1f2   : > { %1836 = vst.msk [vmem:[#allocation3 + $0x40] sm:$0xff] %vm1831_vm11, %v6378_v17  ;;  %v1615_v61 = vpop.permute.xlu1 %1614  ;;  %1022 = vrot.lane.b32.xlu0 %v951_v23, %s5431_s25  ;;  %v2074_v51 = vld [vmem:[#allocation3 + $0x30] sm:$0xff]  ;;  %v969_v23 = vrot.slane %v6171_v31, 1 }
 0x1f3   : > { %1971 = vst.msk [vmem:[#allocation3 + $0x40] sm:$0xff] %vm1966_vm12, %v6430_v60  ;;  %v2134_v15 = vpack.c.bf16 %v2074_v51, %v2072_v59 }
 0x1f4   : > { %1706 = vst.msk [vmem:[#allocation3 + $0x50] sm:$0xff] %vm1700_vm10, %v1615_v61  ;;  %1024 = vrot.lane.b32.xlu1 %v953_v28, %s5431_s25  ;;  %v1007_v54 = vpop.permute.xlu0 %1006  ;;  %v8573_v61 = vmov 0.0  }
 0x1f5   : > { %1837 = vst.msk [vmem:[#allocation3 + $0x50] sm:$0xff] %vm1831_vm11, %v6382_v19  ;;  %2332 = vmatmul.mubr.bf16.gmra.mrb[20].mxu1 %v2134_v15 }
 0x1f6   : > { %1972 = vst.msk [vmem:[#allocation3 + $0x50] sm:$0xff] %vm1966_vm12, %v6436_v2  ;;  %v1009_v17 = vpop.permute.xlu1 %1008  ;;  %1232 = vrot.lane.b32.xlu0 %v6081_v34, %s5432_s26  ;;  %4995 = vmatprep.mubr.msk.bf16.mxu1 %vm690_vm2, %v2137_v53  ;;  %v2081_v34 = vld [vmem:[#allocation3 + $0x68] sm:$0xff]  ;;  %v2083_v2 = vld [vmem:[#allocation3 + $0x78] sm:$0xff] }
 0x1f7   : > { %1097 = vst.msk [vmem:[#allocation3 + $0x60] sm:$0xff] %vm1090_vm6, %v1007_v54  ;;  %1098 = vst.msk [vmem:[#allocation3 + $0x70] sm:$0xff] %vm1090_vm6, %v1009_v17  ;;  %v6713_v54 = vld [vmem:[#allocation2 + $0x180] sm:$0xff]  ;;  %v6715_v53 = vld [vmem:[#allocation2 + $0x188] sm:$0xff] }
 0x1f8   : > { %1234 = vrot.lane.b32.xlu1 %v6086_v35, %s5432_s26  ;;  %v1217_v19 = vpop.permute.xlu0 %1216  ;;  %v970_v35 = vrot.slane %v6179_v0, 1  ;;  %2489 = vst.msk [vmem:[#allocation4 + $0x18] sm:$0xff] %vm2484_vm13, %v8573_v61  ;;  %2490 = vst.msk [vmem:[#allocation4 + $0x20] sm:$0xff] %vm2484_vm13, %v8573_v61 }
 0x1f9   : > { %1307 = vst.msk [vmem:[#allocation3 + $0x60] sm:$0xff] %vm1300_vm7, %v1217_v19  ;;  %v6721_v19 = vld [vmem:[#allocation2 + $0x190] sm:$0x3] }
 0x1fa   : > { %1438 = vst.msk [vmem:[#allocation3 + $0x60] sm:$0xff] %vm1431_vm8, %v6388_v14  ;;  %v1219_v60 = vpop.permute.xlu1 %1218  ;;  %1640 = vrot.lane.b32.xlu0 %v5857_v36, %s5438_s22  ;;  %v6556_v4 = vsel %vm913_vm4, %v969_v23, %v970_v35  ;;  %v6564_v3 = vsel %vm913_vm4, %v970_v35, %v972_v49  ;;  %v975_v49 = vrot.slane %v6250_v18, 1 }
 0x1fb   : > { %1573 = vst.msk [vmem:[#allocation3 + $0x60] sm:$0xff] %vm1566_vm9, %v6440_v29  ;;  %v2076_v29 = vld [vmem:[#allocation3 + $0x40] sm:$0xff] }
 0x1fc   : > { %1308 = vst.msk [vmem:[#allocation3 + $0x70] sm:$0xff] %vm1300_vm7, %v1219_v60  ;;  %1642 = vrot.lane.b32.xlu1 %v5860_v37, %s5438_s22  ;;  %v6544_v14 = vpop.permute.xlu0 %1751 }
 0x1fd   : > { %1439 = vst.msk [vmem:[#allocation3 + $0x70] sm:$0xff] %vm1431_vm8, %v6390_v25  ;;  %v2078_v28 = vld [vmem:[#allocation3 + $0x50] sm:$0xff] }
 0x1fe   : > { %1707 = vst.msk [vmem:[#allocation3 + $0x60] sm:$0xff] %vm1700_vm10, %v6453_v42  ;;  %v2136_v52 = vpack.c.bf16 %v2078_v28, %v2076_v29  ;;  %v6551_v25 = vpop.permute.xlu1 %1753  ;;  %1771 = vrot.lane.b32.xlu0 %v6171_v31, %s5433_s29  ;;  %v2139_v42 = vpack.c.bf16 %v2083_v2, %v2081_v34  ;;  %v1600_v34 = vrot.slane %v6715_v53, 2 }
 0x1ff   : > { %1574 = vst.msk [vmem:[#allocation3 + $0x70] sm:$0xff] %vm1566_vm9, %v6445_v21 }
 0x200   : > { %1708 = vst.msk [vmem:[#allocation3 + $0x70] sm:$0xff] %vm1700_vm10, %v6465_v44  ;;  %2340 = vmatmul.mubr.bf16.gmra.mrb[24].mxu1 %v2136_v52  ;;  %1773 = vrot.lane.b32.xlu1 %v6179_v0, %s5433_s29  ;;  %v6560_v21 = vpop.permute.xlu0 %1355  ;;  %v974_v52 = vrot.slane %v6248_v22, 1 }
 0x201   : > { %4996 = vmatprep.mubr.msk.bf16.mxu1 %vm690_vm2, %v2139_v42  ;;  %2485 = vst.msk [vmem:[#allocation4] sm:$0xff] %vm2484_vm13, %v8573_v61  ;;  %2486 = vst.msk [vmem:[#allocation4 + $0x8] sm:$0xff] %vm2484_vm13, %v8573_v61 }
 0x202   : > { %v6566_v44 = vpop.permute.xlu1 %1357  ;;  %1906 = vrot.lane.b32.xlu0 %v6556_v4, %s5436_s14  ;;  %2492 = vst.msk [vmem:[#allocation4 + $0x30] sm:$0xff] %vm2484_vm13, %v8573_v61  ;;  %2493 = vst.msk [vmem:[#allocation4 + $0x38] sm:$0xff] %vm2484_vm13, %v8573_v61 }
 0x203   : > { %2495 = vst.msk [vmem:[#allocation4 + $0x48] sm:$0xff] %vm2484_vm13, %v8573_v61  ;;  %2496 = vst.msk [vmem:[#allocation4 + $0x50] sm:$0xff] %vm2484_vm13, %v8573_v61 }
 0x204   : > { %1908 = vrot.lane.b32.xlu1 %v6564_v3, %s5436_s14  ;;  %v1748_v58 = vpop.permute.xlu0 %1747  ;;  %2498 = vst.msk [vmem:[#allocation4 + $0x60] sm:$0xff] %vm2484_vm13, %v8573_v61  ;;  %2499 = vst.msk [vmem:[#allocation4 + $0x68] sm:$0xff] %vm2484_vm13, %v8573_v61 }
 0x205   : > { %1838 = vst.msk [vmem:[#allocation3 + $0x60] sm:$0xff] %vm1831_vm11, %v1748_v58  ;;  %v977_v58 = vrot.slane %v6262_v39, 1 }
 0x206   : > { %v1750_v32 = vpop.permute.xlu1 %1749  ;;  %1034 = vrot.lane.b32.xlu0 %v5979_v27, %s5431_s25  ;;  %2501 = vst.msk [vmem:[#allocation4 + $0x78] sm:$0xff] %vm2484_vm13, %v8573_v61  ;;  %2502 = vst.msk [vmem:[#allocation4 + $0x80] sm:$0xff] %vm2484_vm13, %v8573_v61  ;;  %v1200_v27 = vrot.slane %v6503_v38, 2 }
 0x207   : > { %1839 = vst.msk [vmem:[#allocation3 + $0x70] sm:$0xff] %vm1831_vm11, %v1750_v32 }
 0x208   : > { %1036 = vrot.lane.b32.xlu1 %v5985_v40, %s5431_s25  ;;  %v1352_v55 = vpop.permute.xlu0 %1351  ;;  %2504 = vst.msk [vmem:[#allocation4 + $0x90] sm:$0xff] %vm2484_vm13, %v8573_v61  ;;  %2505 = vst.msk [vmem:[#allocation4 + $0x98] sm:$0xff] %vm2484_vm13, %v8573_v61  ;;  %v1202_v40 = vrot.slane %v6581_v7, 2 }
 0x209   : > { %1440 = vst.msk [vmem:[#allocation3 + $0x80] sm:$0xff] %vm1431_vm8, %v1352_v55  ;;  %v6761_v55 = vsel %vm913_vm4, %v974_v52, %v975_v49  ;;  %v2087_v52 = vld [vmem:[#allocation3 + $0x98] sm:$0xff] }
 0x20a   : > { %v1354_v62 = vpop.permute.xlu1 %1353  ;;  %1244 = vrot.lane.b32.xlu0 %v5857_v36, %s5432_s26  ;;  %2507 = vst.msk [vmem:[#allocation4 + $0xa8] sm:$0xff] %vm2484_vm13, %v8573_v61  ;;  %2508 = vst.msk [vmem:[#allocation4 + $0xb0] sm:$0xff] %vm2484_vm13, %v8573_v61  ;;  %v1199_v36 = vrot.slane %v6501_v26, 2  ;;  %v6703_v51 = vsel %vm1123_vm5, %v1200_v27, %v1202_v40 }
 0x20b   : > { %2510 = vst.msk [vmem:[#allocation4 + $0xc0] sm:$0xff] %vm2484_vm13, %v8573_v61  ;;  %2511 = vst.msk [vmem:[#allocation4 + $0xc8] sm:$0xff] %vm2484_vm13, %v8573_v61 }
 0x20c   : > { %2513 = vst.msk [vmem:[#allocation4 + $0xd8] sm:$0xff] %vm2484_vm13, %v8573_v61  ;;  %2514 = vst.msk [vmem:[#allocation4 + $0xe0] sm:$0xff] %vm2484_vm13, %v8573_v61  ;;  %1246 = vrot.lane.b32.xlu1 %v5860_v37, %s5432_s26  ;;  %v6661_v59 = vpop.permute.xlu0 %1886  ;;  %v6700_v37 = vsel %vm1123_vm5, %v1199_v36, %v1200_v27 }
 0x20d   : > { %2516 = vst.msk [vmem:[#allocation4 + $0xf0] sm:$0xff] %vm2484_vm13, %v8573_v61  ;;  %2517 = vst.msk [vmem:[#allocation4 + $0xf8] sm:$0xff] %vm2484_vm13, %v8573_v61 }
 0x20e   : > { %2519 = vst.msk [vmem:[#allocation4 + $0x108] sm:$0xff] %vm2484_vm13, %v8573_v61  ;;  %2520 = vst.msk [vmem:[#allocation4 + $0x110] sm:$0xff] %vm2484_vm13, %v8573_v61  ;;  %v6705_v15 = vpop.permute.xlu1 %1888  ;;  %1375 = vrot.lane.b32.xlu0 %v6171_v31, %s5434_s30  ;;  %v1599_v31 = vrot.slane %v6713_v54, 2 }
 0x20f   : > { %2522 = vst.msk [vmem:[#allocation4 + $0x120] sm:$0xff] %vm2484_vm13, %v8573_v61  ;;  %2523 = vst.msk [vmem:[#allocation4 + $0x128] sm:$0xff] %vm2484_vm13, %v8573_v61 }
 0x210   : > { %2525 = vst.msk [vmem:[#allocation4 + $0x138] sm:$0xff] %vm2484_vm13, %v8573_v61  ;;  %2526 = vst.msk [vmem:[#allocation4 + $0x140] sm:$0xff] %vm2484_vm13, %v8573_v61  ;;  %1377 = vrot.lane.b32.xlu1 %v6179_v0, %s5434_s30  ;;  %v6719_v17 = vpop.permute.xlu0 %1490  ;;  %v1602_v0 = vrot.slane %v6721_v19, 2  ;;  %v6739_v35 = vsel %vm1123_vm5, %v1599_v31, %v1600_v34  ;;  %v6781_v31 = vld [vmem:[#allocation2 + $0x198] sm:$0xff] }
 0x211   : > { %2528 = vst.msk [vmem:[#allocation4 + $0x150] sm:$0xff] %vm2484_vm13, %v8573_v61  ;;  %2529 = vst.msk [vmem:[#allocation4 + $0x158] sm:$0xff] %vm2484_vm13, %v8573_v61 }
 0x212   : > { %2531 = vst.msk [vmem:[#allocation4 + $0x168] sm:$0xff] %vm2484_vm13, %v8573_v61  ;;  %2532 = vst.msk [vmem:[#allocation4 + $0x170] sm:$0xff] %vm2484_vm13, %v8573_v61  ;;  %v6723_v60 = vpop.permute.xlu1 %1492  ;;  %1510 = vrot.lane.b32.xlu0 %v6556_v4, %s5437_s19  ;;  %v6742_v29 = vsel %vm1123_vm5, %v1600_v34, %v1602_v0  ;;  %v6783_v34 = vld [vmem:[#allocation2 + $0x1a0] sm:$0xff]  ;;  %v1999_v0 = vrot.slane %v6781_v31, 2 }
 0x213   : > { %2534 = vst.msk [vmem:[#allocation4 + $0x180] sm:$0xff] %vm2484_vm13, %v8573_v61  ;;  %2535 = vst.msk [vmem:[#allocation4 + $0x188] sm:$0xff] %vm2484_vm13, %v8573_v61 }
 0x214   : > { %2537 = vst.msk [vmem:[#allocation4 + $0x198] sm:$0xff] %vm2484_vm13, %v8573_v61  ;;  %2538 = vst.msk [vmem:[#allocation4 + $0x1a0] sm:$0xff] %vm2484_vm13, %v8573_v61  ;;  %1512 = vrot.lane.b32.xlu1 %v6564_v3, %s5437_s19  ;;  %v6731_v2 = vpop.permute.xlu0 %1624 }
 0x215   : > { %1441 = vst.msk [vmem:[#allocation3 + $0x90] sm:$0xff] %vm1431_vm8, %v1354_v62 }
 0x216   : > { %2491 = vst.msk [vmem:[#allocation4 + $0x28] sm:$0x3] %vm2487_vm14, %v8573_v61  ;;  %2488 = vst.msk [vmem:[#allocation4 + $0x10] sm:$0x3] %vm2487_vm14, %v8573_v61  ;;  %v6734_v23 = vpop.permute.xlu1 %1626  ;;  %1644 = vrot.lane.b32.xlu0 %v6234_v57, %s5438_s22 }
 0x217   : > { %2494 = vst.msk [vmem:[#allocation4 + $0x40] sm:$0x3] %vm2487_vm14, %v8573_v61  ;;  %2497 = vst.msk [vmem:[#allocation4 + $0x58] sm:$0x3] %vm2487_vm14, %v8573_v61 }
 0x218   : > { %2500 = vst.msk [vmem:[#allocation4 + $0x70] sm:$0x3] %vm2487_vm14, %v8573_v61  ;;  %2503 = vst.msk [vmem:[#allocation4 + $0x88] sm:$0x3] %vm2487_vm14, %v8573_v61  ;;  %1646 = vrot.lane.b32.xlu1 %v6237_v20, %s5438_s22  ;;  %v1019_v28 = vpop.permute.xlu0 %1018 }
 0x219   : > { %2506 = vst.msk [vmem:[#allocation4 + $0xa0] sm:$0x3] %vm2487_vm14, %v8573_v61  ;;  %2509 = vst.msk [vmem:[#allocation4 + $0xb8] sm:$0x3] %vm2487_vm14, %v8573_v61 }
 0x21a   : > { %2512 = vst.msk [vmem:[#allocation4 + $0xd0] sm:$0x3] %vm2487_vm14, %v8573_v61  ;;  %2515 = vst.msk [vmem:[#allocation4 + $0xe8] sm:$0x3] %vm2487_vm14, %v8573_v61  ;;  %v1021_v42 = vpop.permute.xlu1 %1020  ;;  %1775 = vrot.lane.b32.xlu0 %v6248_v22, %s5433_s29 }
 0x21b   : > { %2518 = vst.msk [vmem:[#allocation4 + $0x100] sm:$0x3] %vm2487_vm14, %v8573_v61  ;;  %2521 = vst.msk [vmem:[#allocation4 + $0x118] sm:$0x3] %vm2487_vm14, %v8573_v61 }
 0x21c   : > { %2524 = vst.msk [vmem:[#allocation4 + $0x130] sm:$0x3] %vm2487_vm14, %v8573_v61  ;;  %2527 = vst.msk [vmem:[#allocation4 + $0x148] sm:$0x3] %vm2487_vm14, %v8573_v61  ;;  %1777 = vrot.lane.b32.xlu1 %v6250_v18, %s5433_s29  ;;  %v1229_v32 = vpop.permute.xlu0 %1228 }
 0x21d   : > { %2530 = vst.msk [vmem:[#allocation4 + $0x160] sm:$0x3] %vm2487_vm14, %v8573_v61  ;;  %2533 = vst.msk [vmem:[#allocation4 + $0x178] sm:$0x3] %vm2487_vm14, %v8573_v61 }
 0x21e   : > { %2536 = vst.msk [vmem:[#allocation4 + $0x190] sm:$0x3] %vm2487_vm14, %v8573_v61  ;;  %2539 = vst.msk [vmem:[#allocation4 + $0x1a8] sm:$0x3] %vm2487_vm14, %v8573_v61  ;;  %v1231_v62 = vpop.permute.xlu1 %1230  ;;  %1910 = vrot.lane.b32.xlu0 %v6761_v55, %s5436_s14  ;;  %v6767_v61 = vsel %vm913_vm4, %v975_v49, %v977_v58 }
 0x21f   : > { %2062 = vst.msk [vmem:[#allocation3 + $0x1a8] sm:$0xff] %vm690_vm2, %v6700_v37  ;;  %2063 = vst.msk [vmem:[#allocation3 + $0x1b8] sm:$0xff] %vm690_vm2, %v6703_v51 }
 0x220   : > { %2064 = vst.msk [vmem:[#allocation3 + $0x1c8] sm:$0xff] %vm690_vm2, %v6739_v35  ;;  %2065 = vst.msk [vmem:[#allocation3 + $0x1d8] sm:$0xff] %vm690_vm2, %v6742_v29  ;;  %1912 = vrot.lane.b32.xlu1 %v6767_v61, %s5436_s14  ;;  %v1883_v39 = vpop.permute.xlu0 %1882 }
 0x221   : > { %1103 = vst.msk [vmem:[#allocation3 + $0xc0] sm:$0xff] %vm1090_vm6, %v1019_v28  ;;  %1104 = vst.msk [vmem:[#allocation3 + $0xd0] sm:$0xff] %vm1090_vm6, %v1021_v42  ;;  %v2085_v28 = vld [vmem:[#allocation3 + $0x88] sm:$0xff] }
 0x222   : > { %1313 = vst.msk [vmem:[#allocation3 + $0xc0] sm:$0xff] %vm1300_vm7, %v1229_v32  ;;  %1314 = vst.msk [vmem:[#allocation3 + $0xd0] sm:$0xff] %vm1300_vm7, %v1231_v62  ;;  %v1885_v36 = vpop.permute.xlu1 %1884  ;;  %1038 = vrot.lane.b32.xlu0 %v6556_v4, %s5431_s25  ;;  %v6799_v32 = vld [vmem:[#allocation2 + $0x1a8] sm:$0x3] }
 0x223   : > { %1973 = vst.msk [vmem:[#allocation3 + $0x60] sm:$0xff] %vm1966_vm12, %v1883_v39  ;;  %1974 = vst.msk [vmem:[#allocation3 + $0x70] sm:$0xff] %vm1966_vm12, %v1885_v36  ;;  %v2002_v62 = vrot.slane %v6799_v32, 2  ;;  %v6815_v39 = vld [vmem:[#allocation4 + $0x8] sm:$0xff] }
 0x224   : > { %1040 = vrot.lane.b32.xlu1 %v6564_v3, %s5431_s25  ;;  %v1487_v27 = vpop.permute.xlu0 %1486  ;;  %v2000_v3 = vrot.slane %v6783_v34, 2  ;;  %2628 = vst.msk [vmem:[#allocation5 + $0x18] sm:$0xff] %vm2484_vm13, %v6815_v39 }
 0x225   : > { %1575 = vst.msk [vmem:[#allocation3 + $0x80] sm:$0xff] %vm1566_vm9, %v1487_v27  ;;  %v2708_v27 = vrot.slane %v6815_v39, 1 }
 0x226   : > { %v1489_v40 = vpop.permute.xlu1 %1488  ;;  %1248 = vrot.lane.b32.xlu0 %v6234_v57, %s5432_s26 }
 0x227   : > { %1576 = vst.msk [vmem:[#allocation3 + $0x90] sm:$0xff] %vm1566_vm9, %v1489_v40 }
 0x228   : > { %1250 = vrot.lane.b32.xlu1 %v6237_v20, %s5432_s26  ;;  %v1621_v4 = vpop.permute.xlu0 %1620  ;;  %v2001_v20 = vsel %vm1123_vm5, %v1999_v0, %v2000_v3  ;;  %v2089_v0 = vld [vmem:[#allocation3 + $0xa8] sm:$0xff] }
 0x229   : > { %1709 = vst.msk [vmem:[#allocation3 + $0x80] sm:$0xff] %vm1700_vm10, %v1621_v4 }
 0x22a   : > { %1840 = vst.msk [vmem:[#allocation3 + $0x80] sm:$0xff] %vm1831_vm11, %v6544_v14  ;;  %v1623_v57 = vpop.permute.xlu1 %1622  ;;  %1379 = vrot.lane.b32.xlu0 %v6248_v22, %s5434_s30  ;;  %v2080_v49 = vld [vmem:[#allocation3 + $0x60] sm:$0xff]  ;;  %v2082_v42 = vld [vmem:[#allocation3 + $0x70] sm:$0xff]  ;;  %v2141_v14 = vpack.c.bf16 %v2087_v52, %v2085_v28  ;;  %v979_v28 = vrot.slane %v6344_v56, 1 }
 0x22b   : > { %1975 = vst.msk [vmem:[#allocation3 + $0x80] sm:$0xff] %vm1966_vm12, %v6661_v59  ;;  %v2138_v58 = vpack.c.bf16 %v2082_v42, %v2080_v49 }
 0x22c   : > { %1710 = vst.msk [vmem:[#allocation3 + $0x90] sm:$0xff] %vm1700_vm10, %v1623_v57  ;;  %1381 = vrot.lane.b32.xlu1 %v6250_v18, %s5434_s30  ;;  %v1015_v22 = vpop.permute.xlu0 %1014  ;;  %v2573_v18 = vld [vmem:[#allocation4] sm:$0xff]  ;;  %v2917_v57 = vrot.slane %v6815_v39, 2 }
 0x22d   : > { %2066 = vst.msk [vmem:[#allocation3 + $0x1e8] sm:$0xff] %vm690_vm2, %v2001_v20  ;;  %2348 = vmatmul.mubr.bf16.gmra.mrb[28].mxu1 %v2138_v58  ;;  %v2707_v36 = vrot.slane %v2573_v18, 1  ;;  %v2916_v52 = vrot.slane %v2573_v18, 2  ;;  %v982_v58 = vrot.slane %v6399_v5, 1 }
 0x22e   : > { %1841 = vst.msk [vmem:[#allocation3 + $0x90] sm:$0xff] %vm1831_vm11, %v6551_v25  ;;  %v1017_v59 = vpop.permute.xlu1 %1016  ;;  %1514 = vrot.lane.b32.xlu0 %v6761_v55, %s5437_s19  ;;  %4997 = vmatprep.mubr.msk.bf16.mxu1 %vm690_vm2, %v2141_v14  ;;  %v2003_v25 = vsel %vm1123_vm5, %v2000_v3, %v2002_v62  ;;  %v2091_v3 = vld [vmem:[#allocation3 + $0xb8] sm:$0xff] }
 0x22f   : > { %1976 = vst.msk [vmem:[#allocation3 + $0x90] sm:$0xff] %vm1966_vm12, %v6705_v15  ;;  %v6831_v4 = vsel %vm913_vm4, %v2707_v36, %v2708_v27 }
 0x230   : > { %1101 = vst.msk [vmem:[#allocation3 + $0xa0] sm:$0xff] %vm1090_vm6, %v1015_v22  ;;  %1102 = vst.msk [vmem:[#allocation3 + $0xb0] sm:$0xff] %vm1090_vm6, %v1017_v59  ;;  %1516 = vrot.lane.b32.xlu1 %v6767_v61, %s5437_s19  ;;  %v1225_v15 = vpop.permute.xlu0 %1224  ;;  %v2143_v22 = vpack.c.bf16 %v2091_v3, %v2089_v0  ;;  %v987_v3 = vrot.slane %v6442_v46, 1 }
 0x231   : > { %2067 = vst.msk [vmem:[#allocation3 + $0x1f8] sm:$0xff] %vm690_vm2, %v2003_v25 }
 0x232   : > { %2627 = vst.msk [vmem:[#allocation5] sm:$0xff] %vm2484_vm13, %v2573_v18  ;;  %v1227_v40 = vpop.permute.xlu1 %1226  ;;  %1648 = vrot.lane.b32.xlu0 %v6273_v12, %s5438_s22  ;;  %v2084_v49 = vld [vmem:[#allocation3 + $0x80] sm:$0xff] }
 0x233   : > { %1311 = vst.msk [vmem:[#allocation3 + $0xa0] sm:$0xff] %vm1300_vm7, %v1225_v15  ;;  %1312 = vst.msk [vmem:[#allocation3 + $0xb0] sm:$0xff] %vm1300_vm7, %v1227_v40  ;;  %v985_v40 = vrot.slane %v6427_v47, 1 }
 0x234   : > { %1442 = vst.msk [vmem:[#allocation3 + $0xa0] sm:$0xff] %vm1431_vm8, %v6560_v21  ;;  %v980_v21 = vrot.slane %v6352_v6, 1  ;;  %1443 = vst.msk [vmem:[#allocation3 + $0xb0] sm:$0xff] %vm1431_vm8, %v6566_v44  ;;  %1650 = vrot.lane.b32.xlu1 %v6276_v13, %s5438_s22  ;;  %v6853_v44 = vsel %vm1123_vm5, %v2916_v52, %v2917_v57 }
 0x235   : > { %1577 = vst.msk [vmem:[#allocation3 + $0xa0] sm:$0xff] %vm1566_vm9, %v6719_v17  ;;  %v6845_v17 = vpop.permute.xlu0 %1759  ;;  %1578 = vst.msk [vmem:[#allocation3 + $0xb0] sm:$0xff] %vm1566_vm9, %v6723_v60  ;;  %v6925_v46 = vsel %vm913_vm4, %v985_v40, %v987_v3 }
 0x236   : > { %1711 = vst.msk [vmem:[#allocation3 + $0xa0] sm:$0xff] %vm1700_vm10, %v6731_v2  ;;  %v2086_v42 = vld [vmem:[#allocation3 + $0x90] sm:$0xff]  ;;  %1712 = vst.msk [vmem:[#allocation3 + $0xb0] sm:$0xff] %vm1700_vm10, %v6734_v23  ;;  %v6857_v2 = vpop.permute.xlu1 %1761  ;;  %1779 = vrot.lane.b32.xlu0 %v6344_v56, %s5433_s29  ;;  %v981_v60 = vsel %vm913_vm4, %v979_v28, %v980_v21  ;;  %v983_v14 = vsel %vm913_vm4, %v980_v21, %v982_v58  ;;  %v989_v58 = vrot.slane %v6501_v26, 1 }
 0x237   : > { %v2140_v20 = vpack.c.bf16 %v2086_v42, %v2084_v49  ;;  %v2097_v42 = vld [vmem:[#allocation3 + $0xe8] sm:$0xff] }
 0x238   : > { %1781 = vrot.lane.b32.xlu1 %v6352_v6, %s5433_s29 }
 0x239   : > { %2356 = vmatmul.mubr.bf16.gmra.mrb[32].mxu1 %v2140_v20  ;;  %v6864_v5 = vpop.permute.xlu0 %1363  ;;  %v2099_v20 = vld [vmem:[#allocation3 + $0xf8] sm:$0xff] }
 0x23a   : > { %4998 = vmatprep.mubr.msk.bf16.mxu1 %vm690_vm2, %v2143_v22  ;;  %v6868_v62 = vpop.permute.xlu1 %1365  ;;  %1914 = vrot.lane.b32.xlu0 %v981_v60, %s5436_s14 }
 0x23c   : > { %1916 = vrot.lane.b32.xlu1 %v983_v14, %s5436_s14 }
 0x23d   : > { %v1756_v23 = vpop.permute.xlu0 %1755 }
 0x23e   : > { %1842 = vst.msk [vmem:[#allocation3 + $0xa0] sm:$0xff] %vm1831_vm11, %v1756_v23  ;;  %v1758_v59 = vpop.permute.xlu1 %1757  ;;  %1042 = vrot.lane.b32.xlu0 %v6761_v55, %s5431_s25 }
 0x23f   : > { %1843 = vst.msk [vmem:[#allocation3 + $0xb0] sm:$0xff] %vm1831_vm11, %v1758_v59  ;;  %v992_v59 = vrot.slane %v6581_v7, 1  ;;  %v8577_v7 = vld [vmem:[#allocation9_spill] sm:$0xff] }
 0x240   : > { %1044 = vrot.lane.b32.xlu1 %v6767_v61, %s5431_s25 }
 0x241   : > { %v1360_v25 = vpop.permute.xlu0 %1359 }
 0x242   : > { %1444 = vst.msk [vmem:[#allocation3 + $0xc0] sm:$0xff] %vm1431_vm8, %v1360_v25  ;;  %v1362_v18 = vpop.permute.xlu1 %1361  ;;  %1252 = vrot.lane.b32.xlu0 %v6273_v12, %s5432_s26  ;;  %v8575_v25 = vld [vmem:[#allocation8_spill] sm:$0xff] }
 0x243   : > { %1445 = vst.msk [vmem:[#allocation3 + $0xd0] sm:$0xff] %vm1431_vm8, %v1362_v18  ;;  %v2147_v18 = vpack.c.bf16 %v2099_v20, %v2097_v42 }
 0x244   : > { %1254 = vrot.lane.b32.xlu1 %v6276_v13, %s5432_s26 }
 0x245   : > { %v1895_v15 = vpop.permute.xlu0 %1894 }
 0x246   : > { %v6884_v36 = vpop.permute.xlu1 %1896  ;;  %1383 = vrot.lane.b32.xlu0 %v6344_v56, %s5434_s30 }
 0x248   : > { %1385 = vrot.lane.b32.xlu1 %v6352_v6, %s5434_s30  ;;  %v984_v6 = vrot.slane %v6425_v16, 1 }
 0x249   : > { %v6890_v55 = vpop.permute.xlu0 %1498 }
 0x24a   : > { %v6892_v61 = vpop.permute.xlu1 %1500  ;;  %1518 = vrot.lane.b32.xlu0 %v981_v60, %s5437_s19  ;;  %v6915_v21 = vsel %vm913_vm4, %v984_v6, %v985_v40  ;;  %v2101_v6 = vld [vmem:[#allocation3 + $0x108] sm:$0xff]  ;;  %v2103_v40 = vld [vmem:[#allocation3 + $0x118] sm:$0xff] }
 0x24c   : > { %1520 = vrot.lane.b32.xlu1 %v983_v14, %s5437_s19 }
 0x24d   : > { %v6896_v12 = vpop.permute.xlu0 %1632 }
 0x24e   : > { %v6898_v13 = vpop.permute.xlu1 %1634  ;;  %1652 = vrot.lane.b32.xlu0 %v6411_v24, %s5438_s22 }
 0x250   : > { %1654 = vrot.lane.b32.xlu1 %v6414_v43, %s5438_s22 }
 0x251   : > { %v1027_v56 = vpop.permute.xlu0 %1026 }
 0x252   : > { %1107 = vst.msk [vmem:[#allocation3 + $0x100] sm:$0xff] %vm1090_vm6, %v1027_v56  ;;  %v1029_v0 = vpop.permute.xlu1 %1028  ;;  %1783 = vrot.lane.b32.xlu0 %v6425_v16, %s5433_s29 }
 0x253   : > { %1108 = vst.msk [vmem:[#allocation3 + $0x110] sm:$0xff] %vm1090_vm6, %v1029_v0 }
 0x254   : > { %1785 = vrot.lane.b32.xlu1 %v6427_v47, %s5433_s29 }
 0x255   : > { %v1237_v28 = vpop.permute.xlu0 %1236 }
 0x256   : > { %1317 = vst.msk [vmem:[#allocation3 + $0x100] sm:$0xff] %vm1300_vm7, %v1237_v28  ;;  %v1239_v52 = vpop.permute.xlu1 %1238  ;;  %1918 = vrot.lane.b32.xlu0 %v6915_v21, %s5436_s14 }
 0x257   : > { %1448 = vst.msk [vmem:[#allocation3 + $0x100] sm:$0xff] %vm1431_vm8, %v6177_v33 }
 0x258   : > { %1583 = vst.msk [vmem:[#allocation3 + $0x100] sm:$0xff] %vm1566_vm9, %v6338_v11  ;;  %1920 = vrot.lane.b32.xlu1 %v6925_v46, %s5436_s14 }
 0x259   : > { %1318 = vst.msk [vmem:[#allocation3 + $0x110] sm:$0xff] %vm1300_vm7, %v1239_v52  ;;  %v1891_v33 = vpop.permute.xlu0 %1890 }
 0x25a   : > { %1717 = vst.msk [vmem:[#allocation3 + $0x100] sm:$0xff] %vm1700_vm10, %v6350_v41  ;;  %v1893_v11 = vpop.permute.xlu1 %1892  ;;  %1046 = vrot.lane.b32.xlu0 %v981_v60, %s5431_s25 }
 0x25b   : > { %1449 = vst.msk [vmem:[#allocation3 + $0x110] sm:$0xff] %vm1431_vm8, %v6183_v10 }
 0x25c   : > { %1848 = vst.msk [vmem:[#allocation3 + $0x100] sm:$0xff] %vm1831_vm11, %v6133_v50  ;;  %1048 = vrot.lane.b32.xlu1 %v983_v14, %s5431_s25  ;;  %v8574_v14 = vld [vmem:[#allocation6_spill] sm:$0xff] }
 0x25d   : > { %1584 = vst.msk [vmem:[#allocation3 + $0x110] sm:$0xff] %vm1566_vm9, %v6340_v9  ;;  %v1495_v50 = vpop.permute.xlu0 %1494  ;;  %v2095_v9 = vld [vmem:[#allocation3 + $0xd8] sm:$0xff] }
 0x25e   : > { %1977 = vst.msk [vmem:[#allocation3 + $0xa0] sm:$0xff] %vm1966_vm12, %v1891_v33  ;;  %1983 = vst.msk [vmem:[#allocation3 + $0x100] sm:$0xff] %vm1966_vm12, %v6231_v48  ;;  %v1497_v10 = vpop.permute.xlu1 %1496  ;;  %1256 = vrot.lane.b32.xlu0 %v6411_v24, %s5432_s26  ;;  %v2093_v48 = vld [vmem:[#allocation3 + $0xc8] sm:$0xff]  ;;  %v2149_v33 = vpack.c.bf16 %v2103_v40, %v2101_v6 }
 0x25f   : > { %1718 = vst.msk [vmem:[#allocation3 + $0x110] sm:$0xff] %vm1700_vm10, %v6356_v30  ;;  %v2145_v49 = vpack.c.bf16 %v2095_v9, %v2093_v48 }
 0x260   : > { %1849 = vst.msk [vmem:[#allocation3 + $0x110] sm:$0xff] %vm1831_vm11, %v6140_v63  ;;  %1258 = vrot.lane.b32.xlu1 %v6414_v43, %s5432_s26 }
 0x261   : > { %1978 = vst.msk [vmem:[#allocation3 + $0xb0] sm:$0xff] %vm1966_vm12, %v1893_v11  ;;  %1984 = vst.msk [vmem:[#allocation3 + $0x110] sm:$0xff] %vm1966_vm12, %v6244_v45  ;;  %v1629_v63 = vpop.permute.xlu0 %1628 }
 0x262   : > { %1579 = vst.msk [vmem:[#allocation3 + $0xc0] sm:$0xff] %vm1566_vm9, %v1495_v50  ;;  %1580 = vst.msk [vmem:[#allocation3 + $0xd0] sm:$0xff] %vm1566_vm9, %v1497_v10  ;;  %v1631_v45 = vpop.permute.xlu1 %1630  ;;  %1387 = vrot.lane.b32.xlu0 %v6425_v16, %s5434_s30  ;;  %v2105_v10 = vld [vmem:[#allocation3 + $0x128] sm:$0xff] }
 0x263   : > { %1713 = vst.msk [vmem:[#allocation3 + $0xc0] sm:$0xff] %vm1700_vm10, %v1629_v63  ;;  %1714 = vst.msk [vmem:[#allocation3 + $0xd0] sm:$0xff] %vm1700_vm10, %v1631_v45  ;;  %v2107_v63 = vld [vmem:[#allocation3 + $0x138] sm:$0xff] }
 0x264   : > { %1844 = vst.msk [vmem:[#allocation3 + $0xc0] sm:$0xff] %vm1831_vm11, %v6845_v17  ;;  %1845 = vst.msk [vmem:[#allocation3 + $0xd0] sm:$0xff] %vm1831_vm11, %v6857_v2  ;;  %1389 = vrot.lane.b32.xlu1 %v6427_v47, %s5434_s30  ;;  %v990_v2 = vrot.slane %v6503_v38, 1 }
 0x265   : > { %v2088_v41 = vld [vmem:[#allocation3 + $0xa0] sm:$0xff]  ;;  %1979 = vst.msk [vmem:[#allocation3 + $0xc0] sm:$0xff] %vm1966_vm12, %v1895_v15  ;;  %v1023_v43 = vpop.permute.xlu0 %1022  ;;  %1980 = vst.msk [vmem:[#allocation3 + $0xd0] sm:$0xff] %vm1966_vm12, %v6884_v36  ;;  %v8576_v15 = vld [vmem:[#allocation7_spill] sm:$0xff] }
 0x266   : > { %1105 = vst.msk [vmem:[#allocation3 + $0xe0] sm:$0xff] %vm1090_vm6, %v1023_v43  ;;  %v1025_v16 = vpop.permute.xlu1 %1024  ;;  %1522 = vrot.lane.b32.xlu0 %v6915_v21, %s5437_s19  ;;  %v7007_v36 = vsel %vm913_vm4, %v989_v58, %v990_v2  ;;  %v2111_v43 = vld [vmem:[#allocation3 + $0x158] sm:$0xff] }
 0x267   : > { %1106 = vst.msk [vmem:[#allocation3 + $0xf0] sm:$0xff] %vm1090_vm6, %v1025_v16 }
 0x268   : > { %v2090_v30 = vld [vmem:[#allocation3 + $0xb0] sm:$0xff]  ;;  %1524 = vrot.lane.b32.xlu1 %v6925_v46, %s5437_s19 }
 0x269   : > { %v2142_v24 = vpack.c.bf16 %v2090_v30, %v2088_v41  ;;  %v1233_v47 = vpop.permute.xlu0 %1232  ;;  %v7052_v30 = vld [vmem:[%s8559_s4] ss:$0 sm:$0xff] }
 0x26a   : > { %1315 = vst.msk [vmem:[#allocation3 + $0xe0] sm:$0xff] %vm1300_vm7, %v1233_v47  ;;  %v1235_v17 = vpop.permute.xlu1 %1234  ;;  %1656 = vrot.lane.b32.xlu0 %v6456_v1, %s5438_s22 }
 0x26b   : > { %2364 = vmatmul.mubr.bf16.gmra.mrb[36].mxu1 %v2142_v24  ;;  %1446 = vst.msk [vmem:[#allocation3 + $0xe0] sm:$0xff] %vm1431_vm8, %v6864_v5  ;;  %v2109_v24 = vld [vmem:[#allocation3 + $0x148] sm:$0xff] }
 0x26c   : > { %4999 = vmatprep.mubr.msk.bf16.mxu1 %vm690_vm2, %v2145_v49  ;;  %1581 = vst.msk [vmem:[#allocation3 + $0xe0] sm:$0xff] %vm1566_vm9, %v6890_v55  ;;  %1658 = vrot.lane.b32.xlu1 %v6459_v8, %s5438_s22  ;;  %v2092_v60 = vld [vmem:[#allocation3 + $0xc0] sm:$0xff]  ;;  %v2094_v5 = vld [vmem:[#allocation3 + $0xd0] sm:$0xff] }
 0x26d   : > { %1316 = vst.msk [vmem:[#allocation3 + $0xf0] sm:$0xff] %vm1300_vm7, %v1235_v17  ;;  %v1641_v22 = vpop.permute.xlu0 %1640  ;;  %v2144_v23 = vpack.c.bf16 %v2094_v5, %v2092_v60 }
 0x26e   : > { %1715 = vst.msk [vmem:[#allocation3 + $0xe0] sm:$0xff] %vm1700_vm10, %v6896_v12  ;;  %1719 = vst.msk [vmem:[#allocation3 + $0x120] sm:$0xff] %vm1700_vm10, %v1641_v22  ;;  %1787 = vrot.lane.b32.xlu0 %v6501_v26, %s5433_s29 }
 0x26f   : > { %1447 = vst.msk [vmem:[#allocation3 + $0xf0] sm:$0xff] %vm1431_vm8, %v6868_v62  ;;  %v1643_v62 = vpop.permute.xlu1 %1642 }
 0x270   : > { %1846 = vst.msk [vmem:[#allocation3 + $0xe0] sm:$0xff] %vm1831_vm11, %v8574_v14  ;;  %1789 = vrot.lane.b32.xlu1 %v6503_v38, %s5433_s29  ;;  %v1465_v14 = vrot.slane %v6713_v54, 1 }
 0x271   : > { %1582 = vst.msk [vmem:[#allocation3 + $0xf0] sm:$0xff] %vm1566_vm9, %v6892_v61  ;;  %v1772_v55 = vpop.permute.xlu0 %1771  ;;  %v7016_v61 = vsel %vm913_vm4, %v990_v2, %v992_v59  ;;  %v2153_v2 = vpack.c.bf16 %v2111_v43, %v2109_v24 }
 0x272   : > { %1981 = vst.msk [vmem:[#allocation3 + $0xe0] sm:$0xff] %vm1966_vm12, %v8575_v25  ;;  %1922 = vrot.lane.b32.xlu0 %v7007_v36, %s5436_s14 }
 0x273   : > { %1716 = vst.msk [vmem:[#allocation3 + $0xf0] sm:$0xff] %vm1700_vm10, %v6898_v13  ;;  %1720 = vst.msk [vmem:[#allocation3 + $0x130] sm:$0xff] %vm1700_vm10, %v1643_v62  ;;  %2372 = vmatmul.mubr.bf16.gmra.mrb[40].mxu1 %v2144_v23  ;;  %v1774_v12 = vpop.permute.xlu1 %1773  ;;  %v1466_v23 = vrot.slane %v6715_v53, 1  ;;  %v1468_v62 = vrot.slane %v6721_v19, 1 }
 0x274   : > { %1847 = vst.msk [vmem:[#allocation3 + $0xf0] sm:$0xff] %vm1831_vm11, %v8576_v15  ;;  %5000 = vmatprep.mubr.msk.bf16.mxu1 %vm690_vm2, %v2147_v18  ;;  %1850 = vst.msk [vmem:[#allocation3 + $0x120] sm:$0xff] %vm1831_vm11, %v1772_v55  ;;  %1924 = vrot.lane.b32.xlu1 %v7016_v61, %s5436_s14 }
 0x275   : > { %1982 = vst.msk [vmem:[#allocation3 + $0xf0] sm:$0xff] %vm1966_vm12, %v8577_v7  ;;  %v1907_v13 = vpop.permute.xlu0 %1906  ;;  %v1467_v15 = vsel %vm913_vm4, %v1465_v14, %v1466_v23  ;;  %v1469_v55 = vsel %vm913_vm4, %v1466_v23, %v1468_v62 }
 0x276   : > { %1851 = vst.msk [vmem:[#allocation3 + $0x130] sm:$0xff] %vm1831_vm11, %v1774_v12  ;;  %1050 = vrot.lane.b32.xlu0 %v6915_v21, %s5431_s25 }
 0x277   : > { %1985 = vst.msk [vmem:[#allocation3 + $0x120] sm:$0xff] %vm1966_vm12, %v1907_v13  ;;  %v1909_v56 = vpop.permute.xlu1 %1908 }
 0x278   : > { %1986 = vst.msk [vmem:[#allocation3 + $0x130] sm:$0xff] %vm1966_vm12, %v1909_v56  ;;  %1052 = vrot.lane.b32.xlu1 %v6925_v46, %s5431_s25  ;;  %v2102_v46 = vld [vmem:[#allocation3 + $0x110] sm:$0xff] }
 0x279   : > { %v2096_v0 = vld [vmem:[#allocation3 + $0xe0] sm:$0xff]  ;;  %v1035_v28 = vpop.permute.xlu0 %1034 }
 0x27a   : > { %1111 = vst.msk [vmem:[#allocation3 + $0x140] sm:$0xff] %vm1090_vm6, %v1035_v28  ;;  %1260 = vrot.lane.b32.xlu0 %v6456_v1, %s5432_s26  ;;  %v2100_v1 = vld [vmem:[#allocation3 + $0x100] sm:$0xff] }
 0x27b   : > { %v1037_v11 = vpop.permute.xlu1 %1036  ;;  %v2148_v9 = vpack.c.bf16 %v2102_v46, %v2100_v1 }
 0x27c   : > { %v2098_v3 = vld [vmem:[#allocation3 + $0xf0] sm:$0xff]  ;;  %1112 = vst.msk [vmem:[#allocation3 + $0x150] sm:$0xff] %vm1090_vm6, %v1037_v11  ;;  %1262 = vrot.lane.b32.xlu1 %v6459_v8, %s5432_s26  ;;  %v2151_v8 = vpack.c.bf16 %v2107_v63, %v2105_v10  ;;  %v2115_v11 = vld [vmem:[#allocation3 + $0x178] sm:$0xff] }
 0x27d   : > { %v2146_v52 = vpack.c.bf16 %v2098_v3, %v2096_v0  ;;  %v1245_v21 = vpop.permute.xlu0 %1244 }
 0x27e   : > { %1321 = vst.msk [vmem:[#allocation3 + $0x140] sm:$0xff] %vm1300_vm7, %v1245_v21  ;;  %1391 = vrot.lane.b32.xlu0 %v6501_v26, %s5434_s30  ;;  %v2104_v26 = vld [vmem:[#allocation3 + $0x120] sm:$0xff] }
 0x27f   : > { %2380 = vmatmul.mubr.bf16.gmra.mrb[44].mxu1 %v2146_v52  ;;  %v1247_v50 = vpop.permute.xlu1 %1246  ;;  %v2106_v41 = vld [vmem:[#allocation3 + $0x130] sm:$0xff] }
 0x280   : > { %5001 = vmatprep.mubr.msk.bf16.mxu1 %vm690_vm2, %v2149_v33  ;;  %1322 = vst.msk [vmem:[#allocation3 + $0x150] sm:$0xff] %vm1300_vm7, %v1247_v50  ;;  %1393 = vrot.lane.b32.xlu1 %v6503_v38, %s5434_s30  ;;  %v2150_v47 = vpack.c.bf16 %v2106_v41, %v2104_v26  ;;  %v2575_v41 = vld [vmem:[#allocation4 + $0x10] sm:$0x3] }
 0x281   : > { %v1376_v48 = vpop.permute.xlu0 %1375  ;;  %v2710_v24 = vrot.slane %v2575_v41, 1 }
 0x282   : > { %1452 = vst.msk [vmem:[#allocation3 + $0x140] sm:$0xff] %vm1431_vm8, %v1376_v48  ;;  %1526 = vrot.lane.b32.xlu0 %v7007_v36, %s5437_s19 }
 0x283   : > { %v1378_v45 = vpop.permute.xlu1 %1377 }
 0x284   : > { %1453 = vst.msk [vmem:[#allocation3 + $0x150] sm:$0xff] %vm1431_vm8, %v1378_v45  ;;  %1528 = vrot.lane.b32.xlu1 %v7016_v61, %s5437_s19  ;;  %v1868_v45 = vrot.slane %v6799_v32, 1  ;;  %v5398_v32 = vld [vmem:[%s8560_s5 + $0x80] sm:$0xff]  }
 0x285   : > { %v1511_v38 = vpop.permute.xlu0 %1510  ;;  %5286 = vmatprep.subr.bf16.mxu1 %v5398_v32 }
 0x286   : > { %1587 = vst.msk [vmem:[#allocation3 + $0x140] sm:$0xff] %vm1566_vm9, %v1511_v38  ;;  %1660 = vrot.lane.b32.xlu0 %v6700_v37, %s5438_s22  ;;  %5287 = vmatpush3.bf16.msra.mxu1 %v5398_v32 }
 0x287   : > { %2388 = vmatmul.mubr.bf16.gmra.mrb[48].mxu1 %v2148_v9  ;;  %v1513_v49 = vpop.permute.xlu1 %1512  ;;  %v2325_v16 = vpop.f32.mrb[16].mxu1  ;;  %v1866_v9 = vrot.slane %v6783_v34, 1 }
 0x288   : > { %5002 = vmatprep.mubr.msk.bf16.mxu1 %vm690_vm2, %v2151_v8  ;;  %1588 = vst.msk [vmem:[#allocation3 + $0x150] sm:$0xff] %vm1566_vm9, %v1513_v49  ;;  %v2326_v17 = vadd.f32 %v7052_v30, %v2325_v16  ;;  %v2327_v42 = vpop.f32.mrb[17].mxu1  ;;  %1662 = vrot.lane.b32.xlu1 %v6703_v51, %s5438_s22  ;;  %v2919_v49 = vrot.slane %v2575_v41, 2  ;;  %v5399_v16 = vld [vmem:[%s8560_s5 + $0x88] sm:$0xff]  }
 0x289   : > { %v2328_v20 = vpop.f32.mrb[18].mxu1  ;;  %v1645_v58 = vpop.permute.xlu0 %1644  ;;  %5288 = vmatprep.subr.bf16.mxu1 %v5399_v16 }
 0x28a   : > { %v2452_v22 = vmax.f32 %v2326_v17, 0.0  ;;  %v2329_v60 = vadd.f32 %v7052_v30, %v2328_v20  ;;  %1721 = vst.msk [vmem:[#allocation3 + $0x140] sm:$0xff] %vm1700_vm10, %v1645_v58  ;;  %v2330_v5 = vpop.f32.mrb[19].mxu1  ;;  %1791 = vrot.lane.b32.xlu0 %v6713_v54, %s5433_s29  ;;  %5289 = vmatpush3.bf16.msra.mxu1 %v5399_v16 }
 0x28b   : > { %v1647_v59 = vpop.permute.xlu1 %1646 }
 0x28c   : > { %2541 = vst.msk [vmem:[#allocation4 + $0x19] sm:$0xff] %vm2484_vm13, %v2452_v22  ;;  %v2453_v25 = vmax.f32 %v2329_v60, 0.0  ;;  %1793 = vrot.lane.b32.xlu1 %v6715_v53, %s5433_s29  ;;  %v2119_v22 = vld [vmem:[#allocation3 + $0x198] sm:$0xff] }
 0x28d   : > { %1722 = vst.msk [vmem:[#allocation3 + $0x150] sm:$0xff] %vm1700_vm10, %v1647_v59  ;;  %v1776_v18 = vpop.permute.xlu0 %1775 }
 0x28e   : > { %2542 = vst.msk [vmem:[#allocation4 + $0x21] sm:$0xff] %vm2484_vm13, %v2453_v25  ;;  %1926 = vrot.lane.b32.xlu0 %v1467_v15, %s5436_s14 }
 0x28f   : > { %2396 = vmatmul.mubr.bf16.gmra.mrb[52].mxu1 %v2150_v47  ;;  %1852 = vst.msk [vmem:[#allocation3 + $0x140] sm:$0xff] %vm1831_vm11, %v1776_v18  ;;  %v1778_v7 = vpop.permute.xlu1 %1777 }
 0x290   : > { %5003 = vmatprep.mubr.msk.bf16.mxu1 %vm690_vm2, %v2153_v2  ;;  %1853 = vst.msk [vmem:[#allocation3 + $0x150] sm:$0xff] %vm1831_vm11, %v1778_v7  ;;  %1928 = vrot.lane.b32.xlu1 %v1469_v55, %s5436_s14  ;;  %v2117_v2 = vld [vmem:[#allocation3 + $0x188] sm:$0xff]  ;;  %v5400_v7 = vld [vmem:[%s8560_s5 + $0x40] sm:$0xff]  }
 0x291   : > { %v1911_v19 = vpop.permute.xlu0 %1910  ;;  %v2157_v23 = vpack.c.bf16 %v2119_v22, %v2117_v2  ;;  %5086 = vmatprep.subr.bf16.mxu0 %v5400_v7 }
 0x292   : > { %1987 = vst.msk [vmem:[#allocation3 + $0x140] sm:$0xff] %vm1966_vm12, %v1911_v19  ;;  %1054 = vrot.lane.b32.xlu0 %v7007_v36, %s5431_s25  ;;  %v5402_v19 = vld [vmem:[%s8560_s5 + $0x48] sm:$0xff]  }
 0x293   : > { %v1913_v12 = vpop.permute.xlu1 %1912  ;;  %v7083_v13 = vld [vmem:[#allocation4 + $0x18] sm:$0xff] }
 0x294   : > { %1988 = vst.msk [vmem:[#allocation3 + $0x150] sm:$0xff] %vm1966_vm12, %v1913_v12  ;;  %1056 = vrot.lane.b32.xlu1 %v7016_v61, %s5431_s25  ;;  %v2712_v0 = vrot.slane %v7083_v13, 1 }
 0x295   : > { %2629 = vst.msk [vmem:[#allocation5 + $0x30] sm:$0xff] %vm2484_vm13, %v7083_v13  ;;  %v1039_v56 = vpop.permute.xlu0 %1038  ;;  %v7090_v6 = vld [vmem:[#allocation4 + $0x20] sm:$0xff]  ;;  %v7092_v40 = vld [vmem:[#allocation4 + $0x28] sm:$0x3] }
 0x296   : > { %1113 = vst.msk [vmem:[#allocation3 + $0x160] sm:$0xff] %vm1090_vm6, %v1039_v56  ;;  %v2713_v36 = vrot.slane %v7090_v6, 1  ;;  %v2715_v3 = vrot.slane %v7092_v40, 1  ;;  %1264 = vrot.lane.b32.xlu0 %v6700_v37, %s5432_s26  ;;  %v2113_v37 = vld [vmem:[#allocation3 + $0x168] sm:$0xff]  ;;  %v2922_v58 = vrot.slane %v7090_v6, 2  ;;  %v2924_v5 = vrot.slane %v7092_v40, 2 }
 0x297   : > { %2630 = vst.msk [vmem:[#allocation5 + $0x48] sm:$0xff] %vm2484_vm13, %v7090_v6  ;;  %v1041_v28 = vpop.permute.xlu1 %1040  ;;  %v2155_v63 = vpack.c.bf16 %v2115_v11, %v2113_v37  ;;  %v5403_v40 = vld [vmem:[%s8560_s5 + $0x8] sm:$0xff]   ;;  %v5406_v11 = vld [vmem:[%s8560_s5 + $0x58] sm:$0xff]  }
 0x298   : > { %1114 = vst.msk [vmem:[#allocation3 + $0x170] sm:$0xff] %vm1090_vm6, %v1041_v28  ;;  %v7104_v61 = vsel %vm913_vm4, %v2712_v0, %v2713_v36  ;;  %v7107_v52 = vsel %vm913_vm4, %v2713_v36, %v2715_v3  ;;  %1266 = vrot.lane.b32.xlu1 %v6703_v51, %s5432_s26  ;;  %v2925_v62 = vsel %vm1123_vm5, %v2922_v58, %v2924_v5 }
 0x299   : > { %v1249_v33 = vpop.permute.xlu0 %1248  ;;  %3294 = vst.msk [vmem:[#allocation5 + $0x8] sm:$0xff] %vm2484_vm13, %v7104_v61  ;;  %3295 = vst.msk [vmem:[#allocation5 + $0x20] sm:$0xff] %vm2484_vm13, %v7107_v52  ;;  %v2108_v46 = vld [vmem:[#allocation3 + $0x140] sm:$0xff] }
 0x29a   : > { %1323 = vst.msk [vmem:[#allocation3 + $0x160] sm:$0xff] %vm1300_vm7, %v1249_v33  ;;  %1395 = vrot.lane.b32.xlu0 %v6713_v54, %s5434_s30 }
 0x29b   : > { %v1251_v21 = vpop.permute.xlu1 %1250  ;;  %v2110_v50 = vld [vmem:[#allocation3 + $0x150] sm:$0xff] }
 0x29c   : > { %1324 = vst.msk [vmem:[#allocation3 + $0x170] sm:$0xff] %vm1300_vm7, %v1251_v21  ;;  %v2152_v51 = vpack.c.bf16 %v2110_v50, %v2108_v46  ;;  %1397 = vrot.lane.b32.xlu1 %v6715_v53, %s5434_s30  ;;  %v1865_v53 = vrot.slane %v6781_v31, 1 }
 0x29d   : > { %v1380_v10 = vpop.permute.xlu0 %1379 }
 0x29e   : > { %1454 = vst.msk [vmem:[#allocation3 + $0x160] sm:$0xff] %vm1431_vm8, %v1380_v10  ;;  %2404 = vmatmul.mubr.bf16.gmra.mrb[56].mxu1 %v2152_v51  ;;  %1530 = vrot.lane.b32.xlu0 %v1467_v15, %s5437_s19 }
 0x29f   : > { %v1382_v1 = vpop.permute.xlu1 %1381  ;;  %5004 = vmatprep.mubr.msk.bf16.mxu1 %vm690_vm2, %v2155_v63  ;;  %v5407_v63 = vld [vmem:[%s8560_s5 + $0x18] sm:$0xff]  }
 0x2a0   : > { %1455 = vst.msk [vmem:[#allocation3 + $0x170] sm:$0xff] %vm1431_vm8, %v1382_v1  ;;  %1532 = vrot.lane.b32.xlu1 %v1469_v55, %s5437_s19  ;;  %v5401_v55 = vld [vmem:[%s8560_s5] sm:$0xff]  }
 0x2a1   : > { %v1515_v54 = vpop.permute.xlu0 %1514  ;;  %5087 = vmatpush3.bf16.msra.mxu0 %v5401_v55  ;;  %v5412_v55 = vld [vmem:[%s8560_s5 + $0x70] sm:$0xff]  }
 0x2a2   : > { %1589 = vst.msk [vmem:[#allocation3 + $0x160] sm:$0xff] %vm1566_vm9, %v1515_v54  ;;  %1664 = vrot.lane.b32.xlu0 %v6739_v35, %s5438_s22  ;;  %v1867_v35 = vsel %vm913_vm4, %v1865_v53, %v1866_v9  ;;  %5088 = vmatprep.subr.bf16.mxu0 %v5402_v19  ;;  %v2123_v53 = vld [vmem:[#allocation3 + $0x1b8] sm:$0xff]  ;;  %v5413_v19 = vld [vmem:[%s8560_s5 + $0x30] sm:$0xff]  }
 0x2a3   : > { %v1517_v48 = vpop.permute.xlu1 %1516 }
 0x2a4   : > { %1590 = vst.msk [vmem:[#allocation3 + $0x170] sm:$0xff] %vm1566_vm9, %v1517_v48  ;;  %1666 = vrot.lane.b32.xlu1 %v6742_v29, %s5438_s22  ;;  %v1869_v29 = vsel %vm913_vm4, %v1866_v9, %v1868_v45  ;;  %v2121_v48 = vld [vmem:[#allocation3 + $0x1a8] sm:$0xff] }
 0x2a5   : > { %v1649_v8 = vpop.permute.xlu0 %1648  ;;  %5089 = vmatpush3.bf16.msra.mxu0 %v5403_v40 }
 0x2a6   : > { %1723 = vst.msk [vmem:[#allocation3 + $0x160] sm:$0xff] %vm1700_vm10, %v1649_v8  ;;  %1795 = vrot.lane.b32.xlu0 %v6781_v31, %s5433_s29 }
 0x2a7   : > { %v1651_v26 = vpop.permute.xlu1 %1650 }
 0x2a8   : > { %1724 = vst.msk [vmem:[#allocation3 + $0x170] sm:$0xff] %vm1700_vm10, %v1651_v26  ;;  %1797 = vrot.lane.b32.xlu1 %v6783_v34, %s5433_s29  ;;  %v2711_v34 = vsel %vm913_vm4, %v2708_v27, %v2710_v24  ;;  %v2920_v27 = vsel %vm1123_vm5, %v2917_v57, %v2919_v49  ;;  %v2921_v57 = vrot.slane %v7083_v13, 2 }
 0x2a9   : > { %v1780_v38 = vpop.permute.xlu0 %1779 }
 0x2aa   : > { %1854 = vst.msk [vmem:[#allocation3 + $0x160] sm:$0xff] %vm1831_vm11, %v1780_v38  ;;  %1930 = vrot.lane.b32.xlu0 %v1867_v35, %s5436_s14  ;;  %v2923_v59 = vsel %vm1123_vm5, %v2921_v57, %v2922_v58 }
 0x2ab   : > { %v1782_v43 = vpop.permute.xlu1 %1781 }
 0x2ac   : > { %1855 = vst.msk [vmem:[#allocation3 + $0x170] sm:$0xff] %vm1831_vm11, %v1782_v43  ;;  %1932 = vrot.lane.b32.xlu1 %v1869_v29, %s5436_s14  ;;  %v2159_v43 = vpack.c.bf16 %v2123_v53, %v2121_v48  ;;  %v2125_v48 = vld [vmem:[#allocation3 + $0x1c8] sm:$0xff]  ;;  %v2127_v53 = vld [vmem:[#allocation3 + $0x1d8] sm:$0xff] }
 0x2ad   : > { %v1915_v31 = vpop.permute.xlu0 %1914 }
 0x2ae   : > { %1989 = vst.msk [vmem:[#allocation3 + $0x160] sm:$0xff] %vm1966_vm12, %v1915_v31  ;;  %2787 = vrot.lane.b32.xlu0 %v6831_v4, %s5432_s26 }
 0x2af   : > { %v1917_v47 = vpop.permute.xlu1 %1916 }
 0x2b0   : > { %1990 = vst.msk [vmem:[#allocation3 + $0x170] sm:$0xff] %vm1966_vm12, %v1917_v47  ;;  %2789 = vrot.lane.b32.xlu1 %v2711_v34, %s5432_s26 }
 0x2b1   : > { %v1043_v17 = vpop.permute.xlu0 %1042 }
 0x2b2   : > { %1115 = vst.msk [vmem:[#allocation3 + $0x180] sm:$0xff] %vm1090_vm6, %v1043_v17  ;;  %2996 = vrot.lane.b32.xlu0 %v6853_v44, %s5437_s19 }
 0x2b3   : > { %v1045_v42 = vpop.permute.xlu1 %1044 }
 0x2b4   : > { %1116 = vst.msk [vmem:[#allocation3 + $0x190] sm:$0xff] %vm1090_vm6, %v1045_v42  ;;  %2998 = vrot.lane.b32.xlu1 %v2920_v27, %s5437_s19 }
 0x2b5   : > { %v1253_v4 = vpop.permute.xlu0 %1252  ;;  %v2112_v20 = vld [vmem:[#allocation3 + $0x160] sm:$0xff] }
 0x2b6   : > { %1325 = vst.msk [vmem:[#allocation3 + $0x180] sm:$0xff] %vm1300_vm7, %v1253_v4  ;;  %3127 = vrot.lane.b32.xlu0 %v7083_v13, %s5433_s29  ;;  %v5408_v4 = vld [vmem:[%s8560_s5 + $0x60] sm:$0xff]  }
 0x2b7   : > { %v1255_v60 = vpop.permute.xlu1 %1254  ;;  %v2114_v39 = vld [vmem:[#allocation3 + $0x170] sm:$0xff] }
 0x2b8   : > { %1326 = vst.msk [vmem:[#allocation3 + $0x190] sm:$0xff] %vm1300_vm7, %v1255_v60  ;;  %v2154_v44 = vpack.c.bf16 %v2114_v39, %v2112_v20  ;;  %3129 = vrot.lane.b32.xlu1 %v7090_v6, %s5433_s29  ;;  %v5409_v60 = vld [vmem:[%s8560_s5 + $0x20] sm:$0xff]  }
 0x2b9   : > { %v1384_v14 = vpop.permute.xlu0 %1383 }
 0x2ba   : > { %1456 = vst.msk [vmem:[#allocation3 + $0x180] sm:$0xff] %vm1431_vm8, %v1384_v14  ;;  %2412 = vmatmul.mubr.bf16.gmra.mrb[60].mxu1 %v2154_v44  ;;  %3331 = vrot.lane.b32.xlu0 %v2923_v59, %s5432_s26 }
 0x2bb   : > { %v1386_v25 = vpop.permute.xlu1 %1385  ;;  %5005 = vmatprep.mubr.msk.bf16.mxu1 %vm690_vm2, %v2157_v23 }
 0x2bc   : > { %1457 = vst.msk [vmem:[#allocation3 + $0x190] sm:$0xff] %vm1431_vm8, %v1386_v25  ;;  %3333 = vrot.lane.b32.xlu1 %v2925_v62, %s5432_s26  ;;  %v5410_v25 = vld [vmem:[%s8560_s5 + $0x68] sm:$0xff]  }
 0x2bd   : > { %v1519_v18 = vpop.permute.xlu0 %1518 }
 0x2be   : > { %1591 = vst.msk [vmem:[#allocation3 + $0x180] sm:$0xff] %vm1566_vm9, %v1519_v18  ;;  %2791 = vrot.lane.b32.xlu0 %v7104_v61, %s5432_s26  ;;  %v5404_v61 = vld [vmem:[%s8560_s5 + $0x50] sm:$0xff]  }
 0x2bf   : > { %v1521_v15 = vpop.permute.xlu1 %1520  ;;  %5090 = vmatprep.subr.bf16.mxu0 %v5404_v61 }
 0x2c0   : > { %1592 = vst.msk [vmem:[#allocation3 + $0x190] sm:$0xff] %vm1566_vm9, %v1521_v15  ;;  %2793 = vrot.lane.b32.xlu1 %v7107_v52, %s5432_s26  ;;  %v5405_v52 = vld [vmem:[%s8560_s5 + $0x10] sm:$0xff]  }
 0x2c1   : > { %v1653_v12 = vpop.permute.xlu0 %1652  ;;  %5091 = vmatpush3.bf16.msra.mxu0 %v5405_v52  ;;  %v5414_v52 = vld [vmem:[%s8560_s5 + $0x78] sm:$0xff]  }
 0x2c2   : > { %1725 = vst.msk [vmem:[#allocation3 + $0x180] sm:$0xff] %vm1700_vm10, %v1653_v12  ;;  %3000 = vrot.lane.b32.xlu0 %v2923_v59, %s5437_s19  ;;  %5092 = vmatprep.subr.bf16.mxu0 %v5406_v11 }
 0x2c3   : > { %v1655_v13 = vpop.permute.xlu1 %1654 }
 0x2c4   : > { %1726 = vst.msk [vmem:[#allocation3 + $0x190] sm:$0xff] %vm1700_vm10, %v1655_v13  ;;  %3002 = vrot.lane.b32.xlu1 %v2925_v62, %s5437_s19  ;;  %v5411_v62 = vld [vmem:[%s8560_s5 + $0x28] sm:$0xff]  }
 0x2c5   : > { %v1784_v56 = vpop.permute.xlu0 %1783  ;;  %5093 = vmatpush3.bf16.msra.mxu0 %v5407_v63 }
 0x2c6   : > { %1856 = vst.msk [vmem:[#allocation3 + $0x180] sm:$0xff] %vm1831_vm11, %v1784_v56  ;;  %5094 = vmatprep.subr.bf16.mxu0 %v5408_v4 }
 0x2c7   : > { %v1786_v6 = vpop.permute.xlu1 %1785 }
 0x2c8   : > { %1857 = vst.msk [vmem:[#allocation3 + $0x190] sm:$0xff] %vm1831_vm11, %v1786_v6  ;;  %v2333_v36 = vpop.f32.mrb[20].mxu1 }
 0x2c9   : > { %v1919_v0 = vpop.permute.xlu0 %1918  ;;  %v2334_v3 = vadd.f32 %v7052_v30, %v2333_v36  ;;  %v2335_v28 = vpop.f32.mrb[21].mxu1  ;;  %5095 = vmatpush3.bf16.msra.mxu0 %v5409_v60  ;;  %v2129_v60 = vld [vmem:[#allocation3 + $0x1e8] sm:$0xff] }
 0x2ca   : > { %1991 = vst.msk [vmem:[#allocation3 + $0x180] sm:$0xff] %vm1966_vm12, %v1919_v0  ;;  %v2336_v37 = vpop.f32.mrb[22].mxu1  ;;  %5096 = vmatprep.subr.bf16.mxu0 %v5410_v25 }
 0x2cb   : > { %v1921_v33 = vpop.permute.xlu1 %1920  ;;  %v2454_v21 = vmax.f32 %v2334_v3, 0.0  ;;  %v2337_v46 = vadd.f32 %v7052_v30, %v2336_v37  ;;  %v2338_v50 = vpop.f32.mrb[23].mxu1 }
 0x2cc   : > { %1992 = vst.msk [vmem:[#allocation3 + $0x190] sm:$0xff] %vm1966_vm12, %v1921_v33 }
 0x2cd   : > { %v1047_v51 = vpop.permute.xlu0 %1046  ;;  %2543 = vst.msk [vmem:[#allocation4 + $0x31] sm:$0xff] %vm2484_vm13, %v2454_v21  ;;  %v2455_v10 = vmax.f32 %v2337_v46, 0.0  ;;  %5097 = vmatpush3.bf16.msra.mxu0 %v5411_v62  ;;  %v5415_v46 = vld [vmem:[%s8560_s5 + $0x38] sm:$0xff]  }
 0x2ce   : > { %1117 = vst.msk [vmem:[#allocation3 + $0x1a0] sm:$0xff] %vm1090_vm6, %v1047_v51  ;;  %5098 = vmatprep.subr.bf16.mxu0 %v5412_v55 }
 0x2cf   : > { %v1049_v1 = vpop.permute.xlu1 %1048  ;;  %2544 = vst.msk [vmem:[#allocation4 + $0x39] sm:$0xff] %vm2484_vm13, %v2455_v10 }
 0x2d0   : > { %1118 = vst.msk [vmem:[#allocation3 + $0x1b0] sm:$0xff] %vm1090_vm6, %v1049_v1 }
 0x2d1   : > { %v1257_v54 = vpop.permute.xlu0 %1256  ;;  %v2116_v45 = vld [vmem:[#allocation3 + $0x180] sm:$0xff]  ;;  %5099 = vmatpush3.bf16.msra.mxu0 %v5413_v19 }
 0x2d2   : > { %1327 = vst.msk [vmem:[#allocation3 + $0x1a0] sm:$0xff] %vm1300_vm7, %v1257_v54  ;;  %5100 = vmatprep.subr.bf16.mxu0 %v5414_v52 }
 0x2d3   : > { %v1259_v9 = vpop.permute.xlu1 %1258  ;;  %v2341_v8 = vpop.f32.mrb[24].mxu1  ;;  %v2118_v26 = vld [vmem:[#allocation3 + $0x190] sm:$0xff] }
 0x2d4   : > { %1328 = vst.msk [vmem:[#allocation3 + $0x1b0] sm:$0xff] %vm1300_vm7, %v1259_v9  ;;  %v2342_v41 = vadd.f32 %v7052_v30, %v2341_v8  ;;  %v2343_v35 = vpop.f32.mrb[25].mxu1  ;;  %v2156_v38 = vpack.c.bf16 %v2118_v26, %v2116_v45  ;;  %v2579_v32 = vld [vmem:[#allocation4 + $0x30] sm:$0xff] }
 0x2d5   : > { %v1388_v29 = vpop.permute.xlu0 %1387  ;;  %v2344_v24 = vpop.f32.mrb[26].mxu1  ;;  %3461 = vrot.lane.b32.xlu0 %v2579_v32, %s5437_s19  ;;  %2631 = vst.msk [vmem:[#allocation5 + $0x60] sm:$0xff] %vm2484_vm13, %v2579_v32  ;;  %v2717_v17 = vrot.slane %v2579_v32, 1  ;;  %v2926_v42 = vrot.slane %v2579_v32, 2  ;;  %5101 = vmatpush3.bf16.msra.mxu0 %v5415_v46 }
 0x2d6   : > { %v2456_v31 = vmax.f32 %v2342_v41, 0.0  ;;  %1458 = vst.msk [vmem:[#allocation3 + $0x1a0] sm:$0xff] %vm1431_vm8, %v1388_v29  ;;  %v2345_v34 = vadd.f32 %v7052_v30, %v2344_v24  ;;  %v2346_v49 = vpop.f32.mrb[27].mxu1  ;;  %2420 = vmatmul.mubr.bf16.gmra.mrb[64].mxu1 %v2156_v38  ;;  %v2580_v47 = vld [vmem:[#allocation4 + $0x38] sm:$0xff]  ;;  %v2581_v27 = vld [vmem:[#allocation4 + $0x40] sm:$0x3]  ;;  %v2161_v41 = vpack.c.bf16 %v2127_v53, %v2125_v48 }
 0x2d7   : > { %v1390_v16 = vpop.permute.xlu1 %1389  ;;  %5006 = vmatprep.mubr.msk.bf16.mxu1 %vm690_vm2, %v2159_v43  ;;  %3463 = vrot.lane.b32.xlu1 %v2580_v47, %s5437_s19  ;;  %2632 = vst.msk [vmem:[#allocation5 + $0x78] sm:$0xff] %vm2484_vm13, %v2580_v47  ;;  %v2718_v58 = vrot.slane %v2580_v47, 1  ;;  %v2720_v2 = vrot.slane %v2581_v27, 1  ;;  %v2927_v22 = vrot.slane %v2580_v47, 2  ;;  %v2929_v57 = vrot.slane %v2581_v27, 2 }
 0x2d8   : > { %2545 = vst.msk [vmem:[#allocation4 + $0x49] sm:$0xff] %vm2484_vm13, %v2456_v31  ;;  %v2457_v20 = vmax.f32 %v2345_v34, 0.0 }
 0x2d9   : > { %1459 = vst.msk [vmem:[#allocation3 + $0x1b0] sm:$0xff] %vm1431_vm8, %v1390_v16  ;;  %v1523_v39 = vpop.permute.xlu0 %1522  ;;  %3131 = vrot.lane.b32.xlu0 %v2579_v32, %s5433_s29  ;;  %v2719_v44 = vsel %vm913_vm4, %v2717_v17, %v2718_v58  ;;  %v2721_v5 = vsel %vm913_vm4, %v2718_v58, %v2720_v2  ;;  %v2928_v14 = vsel %vm1123_vm5, %v2926_v42, %v2927_v22 }
 0x2da   : > { %2546 = vst.msk [vmem:[#allocation4 + $0x51] sm:$0xff] %vm2484_vm13, %v2457_v20  ;;  %3296 = vst.msk [vmem:[#allocation5 + $0x38] sm:$0xff] %vm2484_vm13, %v2719_v44  ;;  %v2930_v59 = vsel %vm1123_vm5, %v2927_v22, %v2929_v57 }
 0x2db   : > { %1593 = vst.msk [vmem:[#allocation3 + $0x1a0] sm:$0xff] %vm1566_vm9, %v1523_v39  ;;  %v1525_v23 = vpop.permute.xlu1 %1524  ;;  %3133 = vrot.lane.b32.xlu1 %v2580_v47, %s5433_s29  ;;  %v2131_v39 = vld [vmem:[#allocation3 + $0x1f8] sm:$0xff] }
 0x2dc   : > { %3297 = vst.msk [vmem:[#allocation5 + $0x50] sm:$0xff] %vm2484_vm13, %v2721_v5  ;;  %3760 = vst.msk [vmem:[#allocation5 + $0x10] sm:$0xff] %vm2484_vm13, %v2928_v14 }
 0x2dd   : > { %1594 = vst.msk [vmem:[#allocation3 + $0x1b0] sm:$0xff] %vm1566_vm9, %v1525_v23  ;;  %v1657_v18 = vpop.permute.xlu0 %1656  ;;  %3595 = vrot.lane.b32.xlu0 %v2719_v44, %s5433_s29 }
 0x2de   : > { %3761 = vst.msk [vmem:[#allocation5 + $0x28] sm:$0xff] %vm2484_vm13, %v2930_v59 }
 0x2df   : > { %1727 = vst.msk [vmem:[#allocation3 + $0x1a0] sm:$0xff] %vm1700_vm10, %v1657_v18  ;;  %v1659_v15 = vpop.permute.xlu1 %1658  ;;  %v2582_v7 = vld [vmem:[#allocation4 + $0x48] sm:$0xff]  ;;  %3597 = vrot.lane.b32.xlu1 %v2721_v5, %s5433_s29 }
 0x2e0   : > { %1728 = vst.msk [vmem:[#allocation3 + $0x1b0] sm:$0xff] %vm1700_vm10, %v1659_v15  ;;  %v2722_v56 = vrot.slane %v2582_v7, 1  ;;  %v2931_v40 = vrot.slane %v2582_v7, 2 }
 0x2e1   : > { %2633 = vst.msk [vmem:[#allocation5 + $0x90] sm:$0xff] %vm2484_vm13, %v2582_v7  ;;  %v1788_v12 = vpop.permute.xlu0 %1787  ;;  %v2583_v13 = vld [vmem:[#allocation4 + $0x50] sm:$0xff]  ;;  %v2584_v6 = vld [vmem:[#allocation4 + $0x58] sm:$0x3]  ;;  %3335 = vrot.lane.b32.xlu0 %v2928_v14, %s5432_s26 }
 0x2e2   : > { %1858 = vst.msk [vmem:[#allocation3 + $0x1a0] sm:$0xff] %vm1831_vm11, %v1788_v12  ;;  %v2723_v0 = vrot.slane %v2583_v13, 1  ;;  %v2725_v36 = vrot.slane %v2584_v6, 1  ;;  %v2932_v3 = vrot.slane %v2583_v13, 2  ;;  %v2934_v28 = vrot.slane %v2584_v6, 2 }
 0x2e3   : > { %2634 = vst.msk [vmem:[#allocation5 + $0xa8] sm:$0xff] %vm2484_vm13, %v2583_v13  ;;  %v1790_v61 = vpop.permute.xlu1 %1789  ;;  %3337 = vrot.lane.b32.xlu1 %v2930_v59, %s5432_s26 }
 0x2e4   : > { %1859 = vst.msk [vmem:[#allocation3 + $0x1b0] sm:$0xff] %vm1831_vm11, %v1790_v61  ;;  %v2724_v33 = vsel %vm913_vm4, %v2722_v56, %v2723_v0  ;;  %v2726_v37 = vsel %vm913_vm4, %v2723_v0, %v2725_v36  ;;  %v7288_v11 = vsel %vm1123_vm5, %v2931_v40, %v2932_v3  ;;  %v7291_v21 = vsel %vm1123_vm5, %v2932_v3, %v2934_v28 }
 0x2e5   : > { %v1923_v50 = vpop.permute.xlu0 %1922  ;;  %3298 = vst.msk [vmem:[#allocation5 + $0x68] sm:$0xff] %vm2484_vm13, %v2724_v33  ;;  %3299 = vst.msk [vmem:[#allocation5 + $0x80] sm:$0xff] %vm2484_vm13, %v2726_v37  ;;  %2795 = vrot.lane.b32.xlu0 %v2719_v44, %s5432_s26 }
 0x2e6   : > { %3762 = vst.msk [vmem:[#allocation5 + $0x40] sm:$0xff] %vm2484_vm13, %v7288_v11  ;;  %3763 = vst.msk [vmem:[#allocation5 + $0x58] sm:$0xff] %vm2484_vm13, %v7291_v21 }
 0x2e7   : > { %1993 = vst.msk [vmem:[#allocation3 + $0x1a0] sm:$0xff] %vm1966_vm12, %v1923_v50  ;;  %v1925_v51 = vpop.permute.xlu1 %1924  ;;  %2797 = vrot.lane.b32.xlu1 %v2721_v5, %s5432_s26 }
 0x2e8   : > { %1994 = vst.msk [vmem:[#allocation3 + $0x1b0] sm:$0xff] %vm1966_vm12, %v1925_v51 }
 0x2e9   : > { %v1051_v10 = vpop.permute.xlu0 %1050  ;;  %3004 = vrot.lane.b32.xlu0 %v2928_v14, %s5437_s19 }
 0x2ea   : > { %1119 = vst.msk [vmem:[#allocation3 + $0x1c0] sm:$0xff] %vm1090_vm6, %v1051_v10 }
 0x2eb   : > { %v1053_v63 = vpop.permute.xlu1 %1052  ;;  %3006 = vrot.lane.b32.xlu1 %v2930_v59, %s5437_s19  ;;  %v2163_v59 = vpack.c.bf16 %v2131_v39, %v2129_v60 }
 0x2ec   : > { %1120 = vst.msk [vmem:[#allocation3 + $0x1d0] sm:$0xff] %vm1090_vm6, %v1053_v63 }
 0x2ed   : > { %v1261_v1 = vpop.permute.xlu0 %1260  ;;  %3465 = vrot.lane.b32.xlu0 %v2582_v7, %s5437_s19  ;;  %v3800_v39 = vld [vmem:[#allocation5 + $0x40] sm:$0xff] }
 0x2ee   : > { %v2120_v54 = vld [vmem:[#allocation3 + $0x1a0] sm:$0xff]  ;;  %1329 = vst.msk [vmem:[#allocation3 + $0x1c0] sm:$0xff] %vm1300_vm7, %v1261_v1 }
 0x2ef   : > { %v1263_v9 = vpop.permute.xlu1 %1262  ;;  %v2122_v8 = vld [vmem:[#allocation3 + $0x1b0] sm:$0xff]  ;;  %3467 = vrot.lane.b32.xlu1 %v2583_v13, %s5437_s19 }
 0x2f0   : > { %1330 = vst.msk [vmem:[#allocation3 + $0x1d0] sm:$0xff] %vm1300_vm7, %v1263_v9  ;;  %v2158_v45 = vpack.c.bf16 %v2122_v8, %v2120_v54 }
 0x2f1   : > { %v1392_v26 = vpop.permute.xlu0 %1391  ;;  %3135 = vrot.lane.b32.xlu0 %v2582_v7, %s5433_s29 }
 0x2f2   : > { %1460 = vst.msk [vmem:[#allocation3 + $0x1c0] sm:$0xff] %vm1431_vm8, %v1392_v26  ;;  %2428 = vmatmul.mubr.bf16.gmra.mrb[68].mxu1 %v2158_v45 }
 0x2f3   : > { %v1394_v35 = vpop.permute.xlu1 %1393  ;;  %5007 = vmatprep.mubr.msk.bf16.mxu1 %vm690_vm2, %v2161_v41  ;;  %3137 = vrot.lane.b32.xlu1 %v2583_v13, %s5433_s29 }
 0x2f4   : > { %1461 = vst.msk [vmem:[#allocation3 + $0x1d0] sm:$0xff] %vm1431_vm8, %v1394_v35 }
 0x2f5   : > { %v1527_v38 = vpop.permute.xlu0 %1526  ;;  %3599 = vrot.lane.b32.xlu0 %v2724_v33, %s5433_s29 }
 0x2f6   : > { %1595 = vst.msk [vmem:[#allocation3 + $0x1c0] sm:$0xff] %vm1566_vm9, %v1527_v38 }
 0x2f7   : > { %v1529_v29 = vpop.permute.xlu1 %1528  ;;  %3601 = vrot.lane.b32.xlu1 %v2726_v37, %s5433_s29 }
 0x2f8   : > { %1596 = vst.msk [vmem:[#allocation3 + $0x1d0] sm:$0xff] %vm1566_vm9, %v1529_v29 }
 0x2f9   : > { %v1661_v24 = vpop.permute.xlu0 %1660  ;;  %3339 = vrot.lane.b32.xlu0 %v7288_v11, %s5432_s26 }
 0x2fa   : > { %1729 = vst.msk [vmem:[#allocation3 + $0x1c0] sm:$0xff] %vm1700_vm10, %v1661_v24 }
 0x2fb   : > { %v1663_v32 = vpop.permute.xlu1 %1662  ;;  %3341 = vrot.lane.b32.xlu1 %v7291_v21, %s5432_s26 }
 0x2fc   : > { %1730 = vst.msk [vmem:[#allocation3 + $0x1d0] sm:$0xff] %vm1700_vm10, %v1663_v32 }
 0x2fd   : > { %v1792_v43 = vpop.permute.xlu0 %1791  ;;  %2799 = vrot.lane.b32.xlu0 %v2724_v33, %s5432_s26 }
 0x2fe   : > { %1860 = vst.msk [vmem:[#allocation3 + $0x1c0] sm:$0xff] %vm1831_vm11, %v1792_v43 }
 0x2ff   : > { %v1794_v31 = vpop.permute.xlu1 %1793  ;;  %2801 = vrot.lane.b32.xlu1 %v2726_v37, %s5432_s26 }
 0x300   : > { %1861 = vst.msk [vmem:[#allocation3 + $0x1d0] sm:$0xff] %vm1831_vm11, %v1794_v31  ;;  %v2349_v49 = vpop.f32.mrb[28].mxu1 }
 0x301   : > { %v1927_v34 = vpop.permute.xlu0 %1926  ;;  %v2350_v16 = vadd.f32 %v7052_v30, %v2349_v49  ;;  %v2351_v47 = vpop.f32.mrb[29].mxu1  ;;  %3008 = vrot.lane.b32.xlu0 %v7288_v11, %s5437_s19 }
 0x302   : > { %1995 = vst.msk [vmem:[#allocation3 + $0x1c0] sm:$0xff] %vm1966_vm12, %v1927_v34  ;;  %v2352_v27 = vpop.f32.mrb[30].mxu1 }
 0x303   : > { %v1929_v17 = vpop.permute.xlu1 %1928  ;;  %v2458_v42 = vmax.f32 %v2350_v16, 0.0  ;;  %v2353_v4 = vadd.f32 %v7052_v30, %v2352_v27  ;;  %v2354_v20 = vpop.f32.mrb[31].mxu1  ;;  %3010 = vrot.lane.b32.xlu1 %v7291_v21, %s5437_s19  ;;  %v3797_v27 = vld [vmem:[#allocation5 + $0x28] sm:$0xff] }
 0x304   : > { %1996 = vst.msk [vmem:[#allocation3 + $0x1d0] sm:$0xff] %vm1966_vm12, %v1929_v17  ;;  %v3794_v17 = vld [vmem:[#allocation5 + $0x10] sm:$0xff] }
 0x305   : > { %v1055_v58 = vpop.permute.xlu0 %1054  ;;  %2547 = vst.msk [vmem:[#allocation4 + $0x61] sm:$0xff] %vm2484_vm13, %v2458_v42  ;;  %v2459_v2 = vmax.f32 %v2353_v4, 0.0 }
 0x306   : > { %1121 = vst.msk [vmem:[#allocation3 + $0x1e0] sm:$0xff] %vm1090_vm6, %v1055_v58 }
 0x307   : > { %v1057_v22 = vpop.permute.xlu1 %1056  ;;  %2548 = vst.msk [vmem:[#allocation4 + $0x69] sm:$0xff] %vm2484_vm13, %v2459_v2  ;;  %v3890_v2 = vpack.c.bf16 %v3797_v27, %v3794_v17 }
 0x308   : > { %1122 = vst.msk [vmem:[#allocation3 + $0x1f0] sm:$0xff] %vm1090_vm6, %v1057_v22 }
 0x309   : > { %v1265_v57 = vpop.permute.xlu0 %1264  ;;  %v2124_v14 = vld [vmem:[#allocation3 + $0x1c0] sm:$0xff] }
 0x30a   : > { %1331 = vst.msk [vmem:[#allocation3 + $0x1e0] sm:$0xff] %vm1300_vm7, %v1265_v57  ;;  %v3803_v57 = vld [vmem:[#allocation5 + $0x58] sm:$0xff] }
 0x30b   : > { %v1267_v44 = vpop.permute.xlu1 %1266  ;;  %v2126_v23 = vld [vmem:[#allocation3 + $0x1d0] sm:$0xff] }
 0x30c   : > { %v2357_v5 = vpop.f32.mrb[32].mxu1  ;;  %1332 = vst.msk [vmem:[#allocation3 + $0x1f0] sm:$0xff] %vm1300_vm7, %v1267_v44  ;;  %v2160_v18 = vpack.c.bf16 %v2126_v23, %v2124_v14  ;;  %v2585_v55 = vld [vmem:[#allocation4 + $0x60] sm:$0xff]  ;;  %v3893_v23 = vpack.c.bf16 %v3803_v57, %v3800_v39 }
 0x30d   : > { %v2358_v25 = vadd.f32 %v7052_v30, %v2357_v5  ;;  %v2359_v62 = vpop.f32.mrb[33].mxu1  ;;  %v1396_v15 = vpop.permute.xlu0 %1395  ;;  %3469 = vrot.lane.b32.xlu0 %v2585_v55, %s5437_s19  ;;  %2635 = vst.msk [vmem:[#allocation5 + $0xc0] sm:$0xff] %vm2484_vm13, %v2585_v55  ;;  %v2727_v40 = vrot.slane %v2585_v55, 1  ;;  %v2936_v36 = vrot.slane %v2585_v55, 2 }
 0x30e   : > { %v2360_v7 = vpop.f32.mrb[34].mxu1  ;;  %1462 = vst.msk [vmem:[#allocation3 + $0x1e0] sm:$0xff] %vm1431_vm8, %v1396_v15  ;;  %2436 = vmatmul.mubr.bf16.gmra.mrb[72].mxu1 %v2160_v18  ;;  %v2586_v6 = vld [vmem:[#allocation4 + $0x68] sm:$0xff]  ;;  %v2587_v0 = vld [vmem:[#allocation4 + $0x70] sm:$0x3] }
 0x30f   : > { %v2460_v19 = vmax.f32 %v2358_v25, 0.0  ;;  %v2361_v12 = vadd.f32 %v7052_v30, %v2360_v7  ;;  %v2362_v13 = vpop.f32.mrb[35].mxu1  ;;  %v1398_v56 = vpop.permute.xlu1 %1397  ;;  %5008 = vmatprep.mubr.msk.bf16.mxu1 %vm690_vm2, %v2163_v59  ;;  %3471 = vrot.lane.b32.xlu1 %v2586_v6, %s5437_s19  ;;  %2636 = vst.msk [vmem:[#allocation5 + $0xd8] sm:$0xff] %vm2484_vm13, %v2586_v6  ;;  %v2728_v30 = vrot.slane %v2586_v6, 1  ;;  %v2730_v28 = vrot.slane %v2587_v0, 1 }
 0x310   : > { %1463 = vst.msk [vmem:[#allocation3 + $0x1f0] sm:$0xff] %vm1431_vm8, %v1398_v56  ;;  %v2937_v61 = vrot.slane %v2586_v6, 2  ;;  %v2939_v33 = vrot.slane %v2587_v0, 2  ;;  %v7440_v13 = vld [vmem:[%s8559_s4] ss:$0 sm:$0xff] }
 0x311   : > { %2549 = vst.msk [vmem:[#allocation4 + $0x79] sm:$0xff] %vm2484_vm13, %v2460_v19  ;;  %v2461_v3 = vmax.f32 %v2361_v12, 0.0  ;;  %v1531_v52 = vpop.permute.xlu0 %1530  ;;  %3139 = vrot.lane.b32.xlu0 %v2585_v55, %s5433_s29  ;;  %v2729_v37 = vsel %vm913_vm4, %v2727_v40, %v2728_v30  ;;  %v2731_v11 = vsel %vm913_vm4, %v2728_v30, %v2730_v28 }
 0x312   : > { %1597 = vst.msk [vmem:[#allocation3 + $0x1e0] sm:$0xff] %vm1566_vm9, %v1531_v52  ;;  %v2938_v21 = vsel %vm1123_vm5, %v2936_v36, %v2937_v61  ;;  %v2940_v50 = vsel %vm1123_vm5, %v2937_v61, %v2939_v33 }
 0x313   : > { %2550 = vst.msk [vmem:[#allocation4 + $0x81] sm:$0xff] %vm2484_vm13, %v2461_v3  ;;  %v1533_v46 = vpop.permute.xlu1 %1532  ;;  %3300 = vst.msk [vmem:[#allocation5 + $0x98] sm:$0xff] %vm2484_vm13, %v2729_v37  ;;  %3141 = vrot.lane.b32.xlu1 %v2586_v6, %s5433_s29 }
 0x314   : > { %3301 = vst.msk [vmem:[#allocation5 + $0xb0] sm:$0xff] %vm2484_vm13, %v2731_v11  ;;  %3764 = vst.msk [vmem:[#allocation5 + $0x70] sm:$0xff] %vm2484_vm13, %v2938_v21 }
 0x315   : > { %1598 = vst.msk [vmem:[#allocation3 + $0x1f0] sm:$0xff] %vm1566_vm9, %v1533_v46  ;;  %v1665_v51 = vpop.permute.xlu0 %1664  ;;  %3603 = vrot.lane.b32.xlu0 %v2729_v37, %s5433_s29 }
 0x316   : > { %3765 = vst.msk [vmem:[#allocation5 + $0x88] sm:$0xff] %vm2484_vm13, %v2940_v50 }
 0x317   : > { %1731 = vst.msk [vmem:[#allocation3 + $0x1e0] sm:$0xff] %vm1700_vm10, %v1665_v51  ;;  %v1667_v10 = vpop.permute.xlu1 %1666  ;;  %3605 = vrot.lane.b32.xlu1 %v2731_v11, %s5433_s29 }
 0x318   : > { %v2588_v63 = vld [vmem:[#allocation4 + $0x78] sm:$0xff]  ;;  %1732 = vst.msk [vmem:[#allocation3 + $0x1f0] sm:$0xff] %vm1700_vm10, %v1667_v10 }
 0x319   : > { %2637 = vst.msk [vmem:[#allocation5 + $0xf0] sm:$0xff] %vm2484_vm13, %v2588_v63  ;;  %v1796_v1 = vpop.permute.xlu0 %1795  ;;  %v2732_v48 = vrot.slane %v2588_v63, 1  ;;  %v2941_v9 = vrot.slane %v2588_v63, 2  ;;  %3343 = vrot.lane.b32.xlu0 %v2938_v21, %s5432_s26 }
 0x31a   : > { %v2589_v54 = vld [vmem:[#allocation4 + $0x80] sm:$0xff]  ;;  %v2590_v53 = vld [vmem:[#allocation4 + $0x88] sm:$0x3]  ;;  %1862 = vst.msk [vmem:[#allocation3 + $0x1e0] sm:$0xff] %vm1831_vm11, %v1796_v1 }
 0x31b   : > { %2638 = vst.msk [vmem:[#allocation5 + $0x108] sm:$0xff] %vm2484_vm13, %v2589_v54  ;;  %v2733_v8 = vrot.slane %v2589_v54, 1  ;;  %v2735_v45 = vrot.slane %v2590_v53, 1  ;;  %v2942_v26 = vrot.slane %v2589_v54, 2  ;;  %v2944_v41 = vrot.slane %v2590_v53, 2  ;;  %v1798_v35 = vpop.permute.xlu1 %1797  ;;  %3345 = vrot.lane.b32.xlu1 %v2940_v50, %s5432_s26  ;;  %v3806_v44 = vld [vmem:[#allocation5 + $0x70] sm:$0xff] }
 0x31c   : > { %1863 = vst.msk [vmem:[#allocation3 + $0x1f0] sm:$0xff] %vm1831_vm11, %v1798_v35 }
 0x31d   : > { %v7381_v38 = vsel %vm913_vm4, %v2732_v48, %v2733_v8  ;;  %v7384_v29 = vsel %vm913_vm4, %v2733_v8, %v2735_v45  ;;  %v7387_v24 = vsel %vm1123_vm5, %v2941_v9, %v2942_v26  ;;  %v1931_v32 = vpop.permute.xlu0 %1930  ;;  %v7396_v43 = vsel %vm1123_vm5, %v2942_v26, %v2944_v41  ;;  %2803 = vrot.lane.b32.xlu0 %v2729_v37, %s5432_s26  ;;  %v3809_v5 = vld [vmem:[#allocation5 + $0x88] sm:$0xff] }
 0x31e   : > { %3302 = vst.msk [vmem:[#allocation5 + $0xc8] sm:$0xff] %vm2484_vm13, %v7381_v38  ;;  %3303 = vst.msk [vmem:[#allocation5 + $0xe0] sm:$0xff] %vm2484_vm13, %v7384_v29  ;;  %v3896_v25 = vpack.c.bf16 %v3809_v5, %v3806_v44 }
 0x31f   : > { %3766 = vst.msk [vmem:[#allocation5 + $0xa0] sm:$0xff] %vm2484_vm13, %v7387_v24  ;;  %3767 = vst.msk [vmem:[#allocation5 + $0xb8] sm:$0xff] %vm2484_vm13, %v7396_v43  ;;  %v1933_v31 = vpop.permute.xlu1 %1932  ;;  %2805 = vrot.lane.b32.xlu1 %v2731_v11, %s5432_s26 }
 0x320   : > { %1997 = vst.msk [vmem:[#allocation3 + $0x1e0] sm:$0xff] %vm1966_vm12, %v1931_v32  ;;  %1998 = vst.msk [vmem:[#allocation3 + $0x1f0] sm:$0xff] %vm1966_vm12, %v1933_v31 }
 0x321   : > { %v2788_v34 = vpop.permute.xlu0 %2787  ;;  %3012 = vrot.lane.b32.xlu0 %v2938_v21, %s5437_s19 }
 0x322   : > { %2884 = vst.msk [vmem:[#allocation5] sm:$0xff] %vm2883_vm15, %v2788_v34 }
 0x323   : > { %v2790_v49 = vpop.permute.xlu1 %2789  ;;  %3014 = vrot.lane.b32.xlu1 %v2940_v50, %s5437_s19 }
 0x324   : > { %2885 = vst.msk [vmem:[#allocation5 + $0x18] sm:$0xff] %vm2883_vm15, %v2790_v49 }
 0x325   : > { %v2997_v16 = vpop.permute.xlu0 %2996  ;;  %3473 = vrot.lane.b32.xlu0 %v2588_v63, %s5437_s19 }
 0x326   : > { %3093 = vst.msk [vmem:[#allocation5] sm:$0xff] %vm3092_vm0, %v2997_v16  ;;  %v3812_v15 = vld [vmem:[#allocation5 + $0xa0] sm:$0xff]  ;;  %v3815_v7 = vld [vmem:[#allocation5 + $0xb8] sm:$0xff] }
 0x327   : > { %v2128_v47 = vld [vmem:[#allocation3 + $0x1e0] sm:$0xff]  ;;  %v2999_v42 = vpop.permute.xlu1 %2998  ;;  %v2130_v4 = vld [vmem:[#allocation3 + $0x1f0] sm:$0xff]  ;;  %3475 = vrot.lane.b32.xlu1 %v2589_v54, %s5437_s19  ;;  %v3899_v19 = vpack.c.bf16 %v3815_v7, %v3812_v15 }
 0x328   : > { %3094 = vst.msk [vmem:[#allocation5 + $0x18] sm:$0xff] %vm3092_vm0, %v2999_v42  ;;  %v2162_v20 = vpack.c.bf16 %v2130_v4, %v2128_v47 }
 0x329   : > { %v3128_v58 = vpop.permute.xlu0 %3127  ;;  %3143 = vrot.lane.b32.xlu0 %v2588_v63, %s5433_s29 }
 0x32a   : > { %3224 = vst.msk [vmem:[#allocation5] sm:$0xff] %vm3223_vm1, %v3128_v58  ;;  %2444 = vmatmul.mubr.bf16.gmra.mrb[76].mxu1 %v2162_v20 }
 0x32b   : > { %v3130_v22 = vpop.permute.xlu1 %3129  ;;  %5290 = vmatprep.mubr.msk.bf16.mxu1 %vm2484_vm13, %v3890_v2  ;;  %3145 = vrot.lane.b32.xlu1 %v2589_v54, %s5433_s29 }
 0x32c   : > { %3225 = vst.msk [vmem:[#allocation5 + $0x18] sm:$0xff] %vm3223_vm1, %v3130_v22 }
 0x32d   : > { %v3332_v60 = vpop.permute.xlu0 %3331  ;;  %3607 = vrot.lane.b32.xlu0 %v7381_v38, %s5433_s29 }
 0x32e   : > { %3427 = vst.msk [vmem:[#allocation5 + $0x8] sm:$0xff] %vm2883_vm15, %v3332_v60 }
 0x32f   : > { %v3334_v14 = vpop.permute.xlu1 %3333  ;;  %3609 = vrot.lane.b32.xlu1 %v7384_v29, %s5433_s29 }
 0x330   : > { %3428 = vst.msk [vmem:[#allocation5 + $0x20] sm:$0xff] %vm2883_vm15, %v3334_v14 }
 0x331   : > { %v2792_v59 = vpop.permute.xlu0 %2791  ;;  %3347 = vrot.lane.b32.xlu0 %v7387_v24, %s5432_s26 }
 0x332   : > { %2886 = vst.msk [vmem:[#allocation5 + $0x30] sm:$0xff] %vm2883_vm15, %v2792_v59  ;;  %5291 = vmatmul.mubr.msk.bf16.vlgmr.msra.gmra.mrb[80].mxu1 %vm2484_vm13, %v3893_v23 }
 0x333   : > { %v2794_v62 = vpop.permute.xlu1 %2793  ;;  %5294 = vmatprep.mubr.msk.bf16.mxu1 %vm2484_vm13, %v3896_v25  ;;  %3349 = vrot.lane.b32.xlu1 %v7396_v43, %s5432_s26 }
 0x334   : > { %2887 = vst.msk [vmem:[#allocation5 + $0x48] sm:$0xff] %vm2883_vm15, %v2794_v62 }
 0x335   : > { %v3001_v18 = vpop.permute.xlu0 %3000  ;;  %2807 = vrot.lane.b32.xlu0 %v7381_v38, %s5432_s26 }
 0x336   : > { %3095 = vst.msk [vmem:[#allocation5 + $0x30] sm:$0xff] %vm3092_vm0, %v3001_v18 }
 0x337   : > { %v3003_v55 = vpop.permute.xlu1 %3002  ;;  %2809 = vrot.lane.b32.xlu1 %v7384_v29, %s5432_s26 }
 0x338   : > { %3096 = vst.msk [vmem:[#allocation5 + $0x48] sm:$0xff] %vm3092_vm0, %v3003_v55 }
 0x339   : > { %3016 = vrot.lane.b32.xlu0 %v7387_v24, %s5437_s19 }
 0x33a   : > { %5295 = vmatmul.mubr.msk.bf16.gmra.mrb[84].mxu1 %vm2484_vm13, %v3899_v19 }
 0x33b   : > { %3018 = vrot.lane.b32.xlu1 %v7396_v43, %s5437_s19 }
 0x33e   : > { %v2365_v12 = vpop.f32.mrb[36].mxu1 }
 0x33f   : > { %v2366_v56 = vadd.f32 %v7440_v13, %v2365_v12  ;;  %v2367_v6 = vpop.f32.mrb[37].mxu1 }
 0x340   : > { %v2368_v40 = vpop.f32.mrb[38].mxu1 }
 0x341   : > { %v2462_v0 = vmax.f32 %v2366_v56, 0.0  ;;  %v2369_v36 = vadd.f32 %v7440_v13, %v2368_v40  ;;  %v2370_v3 = vpop.f32.mrb[39].mxu1 }
 0x342   : > { %v3795_v3 = vld [vmem:[#allocation5 + $0x18] sm:$0xff] }
 0x343   : > { %2551 = vst.msk [vmem:[#allocation4 + $0x91] sm:$0xff] %vm2484_vm13, %v2462_v0  ;;  %v2463_v30 = vmax.f32 %v2369_v36, 0.0 }
 0x345   : > { %2552 = vst.msk [vmem:[#allocation4 + $0x99] sm:$0xff] %vm2484_vm13, %v2463_v30 }
 0x346   : > { %v2373_v28 = vpop.f32.mrb[40].mxu1 }
 0x347   : > { %v2374_v61 = vadd.f32 %v7440_v13, %v2373_v28  ;;  %v2375_v52 = vpop.f32.mrb[41].mxu1  ;;  %v3462_v54 = vpop.permute.xlu0 %3461 }
 0x348   : > { %v2376_v33 = vpop.f32.mrb[42].mxu1  ;;  %3557 = vst.msk [vmem:[#allocation5 + $0x8] sm:$0xff] %vm3092_vm0, %v3462_v54 }
 0x349   : > { %v2464_v11 = vmax.f32 %v2374_v61, 0.0  ;;  %v2377_v21 = vadd.f32 %v7440_v13, %v2376_v33  ;;  %v2378_v46 = vpop.f32.mrb[43].mxu1  ;;  %v3464_v45 = vpop.permute.xlu1 %3463 }
 0x34a   : > { %v2591_v37 = vld [vmem:[#allocation4 + $0x90] sm:$0xff]  ;;  %3558 = vst.msk [vmem:[#allocation5 + $0x20] sm:$0xff] %vm3092_vm0, %v3464_v45 }
 0x34b   : > { %3477 = vrot.lane.b32.xlu0 %v2591_v37, %s5437_s19  ;;  %2639 = vst.msk [vmem:[#allocation5 + $0x120] sm:$0xff] %vm2484_vm13, %v2591_v37  ;;  %v2737_v51 = vrot.slane %v2591_v37, 1  ;;  %v2946_v63 = vrot.slane %v2591_v37, 2  ;;  %2553 = vst.msk [vmem:[#allocation4 + $0xa9] sm:$0xff] %vm2484_vm13, %v2464_v11  ;;  %v2465_v1 = vmax.f32 %v2377_v21, 0.0  ;;  %v3132_v29 = vpop.permute.xlu0 %3131  ;;  %v3792_v11 = vld [vmem:[#allocation5] sm:$0xff] }
 0x34c   : > { %v2592_v50 = vld [vmem:[#allocation4 + $0x98] sm:$0xff]  ;;  %v2593_v10 = vld [vmem:[#allocation4 + $0xa0] sm:$0x3]  ;;  %3226 = vst.msk [vmem:[#allocation5 + $0x30] sm:$0xff] %vm3223_vm1, %v3132_v29 }
 0x34d   : > { %3479 = vrot.lane.b32.xlu1 %v2592_v50, %s5437_s19  ;;  %2640 = vst.msk [vmem:[#allocation5 + $0x138] sm:$0xff] %vm2484_vm13, %v2592_v50  ;;  %v2738_v48 = vrot.slane %v2592_v50, 1  ;;  %v2740_v53 = vrot.slane %v2593_v10, 1  ;;  %v2947_v9 = vrot.slane %v2592_v50, 2  ;;  %v2949_v8 = vrot.slane %v2593_v10, 2  ;;  %2554 = vst.msk [vmem:[#allocation4 + $0xb1] sm:$0xff] %vm2484_vm13, %v2465_v1  ;;  %v3134_v32 = vpop.permute.xlu1 %3133 }
 0x34e   : > { %3227 = vst.msk [vmem:[#allocation5 + $0x48] sm:$0xff] %vm3223_vm1, %v3134_v32 }
 0x34f   : > { %3147 = vrot.lane.b32.xlu0 %v2591_v37, %s5433_s29  ;;  %v2739_v26 = vsel %vm913_vm4, %v2737_v51, %v2738_v48  ;;  %v2741_v41 = vsel %vm913_vm4, %v2738_v48, %v2740_v53  ;;  %v7464_v35 = vsel %vm1123_vm5, %v2946_v63, %v2947_v9  ;;  %v7472_v38 = vsel %vm1123_vm5, %v2947_v9, %v2949_v8  ;;  %v3596_v16 = vpop.permute.xlu0 %3595 }
 0x350   : > { %3304 = vst.msk [vmem:[#allocation5 + $0xf8] sm:$0xff] %vm2484_vm13, %v2739_v26  ;;  %3305 = vst.msk [vmem:[#allocation5 + $0x110] sm:$0xff] %vm2484_vm13, %v2741_v41  ;;  %v3888_v51 = vpack.c.bf16 %v3795_v3, %v3792_v11 }
 0x351   : > { %3768 = vst.msk [vmem:[#allocation5 + $0xd0] sm:$0xff] %vm2484_vm13, %v7464_v35  ;;  %3149 = vrot.lane.b32.xlu1 %v2592_v50, %s5433_s29  ;;  %3769 = vst.msk [vmem:[#allocation5 + $0xe8] sm:$0xff] %vm2484_vm13, %v7472_v38  ;;  %v3598_v2 = vpop.permute.xlu1 %3597 }
 0x352   : > { %v2381_v24 = vpop.f32.mrb[44].mxu1  ;;  %v7481_v34 = vld [vmem:[#allocation4 + $0xa8] sm:$0xff]  ;;  %3691 = vst.msk [vmem:[#allocation5 + $0x8] sm:$0xff] %vm3223_vm1, %v3596_v16  ;;  %3692 = vst.msk [vmem:[#allocation5 + $0x20] sm:$0xff] %vm3223_vm1, %v3598_v2 }
 0x353   : > { %3611 = vrot.lane.b32.xlu0 %v2739_v26, %s5433_s29  ;;  %v2382_v43 = vadd.f32 %v7440_v13, %v2381_v24  ;;  %v2383_v31 = vpop.f32.mrb[45].mxu1  ;;  %v2951_v47 = vrot.slane %v7481_v34, 2  ;;  %2641 = vst.msk [vmem:[#allocation5 + $0x150] sm:$0xff] %vm2484_vm13, %v7481_v34  ;;  %v2742_v58 = vrot.slane %v7481_v34, 1  ;;  %v3336_v23 = vpop.permute.xlu0 %3335 }
 0x354   : > { %v2384_v49 = vpop.f32.mrb[46].mxu1  ;;  %v7489_v4 = vld [vmem:[#allocation4 + $0xb0] sm:$0xff]  ;;  %v2596_v20 = vld [vmem:[#allocation4 + $0xb8] sm:$0x3]  ;;  %3429 = vst.msk [vmem:[#allocation5 + $0x38] sm:$0xff] %vm2883_vm15, %v3336_v23 }
 0x355   : > { %3613 = vrot.lane.b32.xlu1 %v2741_v41, %s5433_s29  ;;  %v2466_v17 = vmax.f32 %v2382_v43, 0.0  ;;  %v2385_v27 = vadd.f32 %v7440_v13, %v2384_v49  ;;  %v2386_v42 = vpop.f32.mrb[47].mxu1  ;;  %v2952_v60 = vrot.slane %v7489_v4, 2  ;;  %v2954_v39 = vrot.slane %v2596_v20, 2  ;;  %2642 = vst.msk [vmem:[#allocation5 + $0x168] sm:$0xff] %vm2484_vm13, %v7489_v4  ;;  %v3338_v55 = vpop.permute.xlu1 %3337 }
 0x356   : > { %v2743_v57 = vrot.slane %v7489_v4, 1  ;;  %v2745_v44 = vrot.slane %v2596_v20, 1  ;;  %3430 = vst.msk [vmem:[#allocation5 + $0x50] sm:$0xff] %vm2883_vm15, %v3338_v55 }
 0x357   : > { %3351 = vrot.lane.b32.xlu0 %v7464_v35, %s5432_s26  ;;  %2555 = vst.msk [vmem:[#allocation4 + $0xc1] sm:$0xff] %vm2484_vm13, %v2466_v17  ;;  %v2467_v5 = vmax.f32 %v2385_v27, 0.0  ;;  %v7503_v25 = vsel %vm1123_vm5, %v2951_v47, %v2952_v60  ;;  %v7506_v62 = vsel %vm1123_vm5, %v2952_v60, %v2954_v39  ;;  %v2796_v6 = vpop.permute.xlu0 %2795 }
 0x358   : > { %v3818_v22 = vld [vmem:[#allocation5 + $0xd0] sm:$0xff]  ;;  %v3821_v14 = vld [vmem:[#allocation5 + $0xe8] sm:$0xff]  ;;  %v7509_v18 = vsel %vm913_vm4, %v2742_v58, %v2743_v57  ;;  %3770 = vst.msk [vmem:[#allocation5 + $0x100] sm:$0xff] %vm2484_vm13, %v7503_v25  ;;  %3771 = vst.msk [vmem:[#allocation5 + $0x118] sm:$0xff] %vm2484_vm13, %v7506_v62  ;;  %v7520_v15 = vsel %vm913_vm4, %v2743_v57, %v2745_v44 }
 0x359   : > { %3353 = vrot.lane.b32.xlu1 %v7472_v38, %s5432_s26  ;;  %v3902_v59 = vpack.c.bf16 %v3821_v14, %v3818_v22  ;;  %2556 = vst.msk [vmem:[#allocation4 + $0xc9] sm:$0xff] %vm2484_vm13, %v2467_v5  ;;  %3306 = vst.msk [vmem:[#allocation5 + $0x128] sm:$0xff] %vm2484_vm13, %v7509_v18  ;;  %v2798_v28 = vpop.permute.xlu1 %2797  ;;  %v3793_v61 = vld [vmem:[#allocation5 + $0x8] sm:$0xff]  ;;  %v3796_v52 = vld [vmem:[#allocation5 + $0x20] sm:$0xff] }
 0x35a   : > { %v2389_v7 = vpop.f32.mrb[48].mxu1  ;;  %3307 = vst.msk [vmem:[#allocation5 + $0x140] sm:$0xff] %vm2484_vm13, %v7520_v15  ;;  %v3889_v37 = vpack.c.bf16 %v3796_v52, %v3793_v61 }
 0x35b   : > { %5298 = vmatprep.mubr.msk.bf16.mxu1 %vm2484_vm13, %v3902_v59  ;;  %2811 = vrot.lane.b32.xlu0 %v2739_v26, %s5432_s26  ;;  %v2390_v19 = vadd.f32 %v7440_v13, %v2389_v7  ;;  %v2391_v12 = vpop.f32.mrb[49].mxu1  ;;  %2888 = vst.msk [vmem:[#allocation5 + $0x60] sm:$0xff] %vm2883_vm15, %v2796_v6  ;;  %2889 = vst.msk [vmem:[#allocation5 + $0x78] sm:$0xff] %vm2883_vm15, %v2798_v28  ;;  %v3005_v50 = vpop.permute.xlu0 %3004 }
 0x35c   : > { %v2392_v56 = vpop.f32.mrb[50].mxu1  ;;  %3097 = vst.msk [vmem:[#allocation5 + $0x60] sm:$0xff] %vm3092_vm0, %v3005_v50  ;;  %4167 = vmatprep.mubr.bf16.mxu0 %v3889_v37 }
 0x35d   : > { %2813 = vrot.lane.b32.xlu1 %v2741_v41, %s5432_s26  ;;  %v2468_v40 = vmax.f32 %v2390_v19, 0.0  ;;  %v2393_v0 = vadd.f32 %v7440_v13, %v2392_v56  ;;  %v2394_v36 = vpop.f32.mrb[51].mxu1  ;;  %v3007_v45 = vpop.permute.xlu1 %3006  ;;  %4168 = vmatmul.mubr.bf16.vlgmr.msra.gmra.mrb[16].mxu0 %v3888_v51 }
 0x35e   : > { %v7531_v30 = vld [vmem:[#allocation4 + $0xc0] sm:$0xff]  ;;  %3098 = vst.msk [vmem:[#allocation5 + $0x78] sm:$0xff] %vm3092_vm0, %v3007_v45 }
 0x35f   : > { %3020 = vrot.lane.b32.xlu0 %v7464_v35, %s5437_s19  ;;  %2643 = vst.msk [vmem:[#allocation5 + $0x180] sm:$0xff] %vm2484_vm13, %v7531_v30  ;;  %2557 = vst.msk [vmem:[#allocation4 + $0xd9] sm:$0xff] %vm2484_vm13, %v2468_v40  ;;  %v2469_v33 = vmax.f32 %v2393_v0, 0.0  ;;  %v3824_v10 = vld [vmem:[#allocation5 + $0x100] sm:$0xff]  ;;  %v2956_v63 = vrot.slane %v7531_v30, 2  ;;  %v2747_v1 = vrot.slane %v7531_v30, 1  ;;  %v3466_v43 = vpop.permute.xlu0 %3465 }
 0x360   : > { %v7539_v21 = vld [vmem:[#allocation4 + $0xc8] sm:$0xff]  ;;  %v2599_v46 = vld [vmem:[#allocation4 + $0xd0] sm:$0x3]  ;;  %3559 = vst.msk [vmem:[#allocation5 + $0x38] sm:$0xff] %vm3092_vm0, %v3466_v43  ;;  %v3798_v43 = vld [vmem:[#allocation5 + $0x30] sm:$0xff] }
 0x361   : > { %3022 = vrot.lane.b32.xlu1 %v7472_v38, %s5437_s19  ;;  %v2959_v54 = vrot.slane %v2599_v46, 2  ;;  %2644 = vst.msk [vmem:[#allocation5 + $0x198] sm:$0xff] %vm2484_vm13, %v7539_v21  ;;  %2558 = vst.msk [vmem:[#allocation4 + $0xe1] sm:$0xff] %vm2484_vm13, %v2469_v33  ;;  %v3827_v48 = vld [vmem:[#allocation5 + $0x118] sm:$0xff]  ;;  %v2957_v53 = vrot.slane %v7539_v21, 2  ;;  %v2748_v9 = vrot.slane %v7539_v21, 1  ;;  %v3468_v42 = vpop.permute.xlu1 %3467 }
 0x362   : > { %v2750_v8 = vrot.slane %v2599_v46, 1  ;;  %v3905_v26 = vpack.c.bf16 %v3827_v48, %v3824_v10  ;;  %v2397_v41 = vpop.f32.mrb[52].mxu1  ;;  %3560 = vst.msk [vmem:[#allocation5 + $0x50] sm:$0xff] %vm3092_vm0, %v3468_v42 }
 0x363   : > { %3481 = vrot.lane.b32.xlu0 %v7481_v34, %s5437_s19  ;;  %v2398_v35 = vadd.f32 %v7440_v13, %v2397_v41  ;;  %v7556_v38 = vsel %vm1123_vm5, %v2956_v63, %v2957_v53  ;;  %v7559_v29 = vsel %vm1123_vm5, %v2957_v53, %v2959_v54  ;;  %v2399_v24 = vpop.f32.mrb[53].mxu1  ;;  %v7562_v32 = vsel %vm913_vm4, %v2747_v1, %v2748_v9  ;;  %v3136_v22 = vpop.permute.xlu0 %3135 }
 0x364   : > { %5299 = vmatmul.mubr.msk.bf16.gmra.mrb[88].mxu1 %vm2484_vm13, %v3905_v26  ;;  %3772 = vst.msk [vmem:[#allocation5 + $0x130] sm:$0xff] %vm2484_vm13, %v7556_v38  ;;  %3773 = vst.msk [vmem:[#allocation5 + $0x148] sm:$0xff] %vm2484_vm13, %v7559_v29  ;;  %v2400_v31 = vpop.f32.mrb[54].mxu1  ;;  %v7574_v49 = vsel %vm913_vm4, %v2748_v9, %v2750_v8  ;;  %v3801_v9 = vld [vmem:[#allocation5 + $0x48] sm:$0xff] }
 0x365   : > { %3483 = vrot.lane.b32.xlu1 %v7489_v4, %s5437_s19  ;;  %3308 = vst.msk [vmem:[#allocation5 + $0x158] sm:$0xff] %vm2484_vm13, %v7562_v32  ;;  %v2470_v16 = vmax.f32 %v2398_v35, 0.0  ;;  %v2401_v47 = vadd.f32 %v7440_v13, %v2400_v31  ;;  %v2402_v17 = vpop.f32.mrb[55].mxu1  ;;  %3309 = vst.msk [vmem:[#allocation5 + $0x170] sm:$0xff] %vm2484_vm13, %v7574_v49  ;;  %v3138_v14 = vpop.permute.xlu1 %3137  ;;  %v3891_v42 = vpack.c.bf16 %v3801_v9, %v3798_v43 }
 0x366   : > { %v7580_v27 = vld [vmem:[#allocation4 + $0xd8] sm:$0xff]  ;;  %3228 = vst.msk [vmem:[#allocation5 + $0x60] sm:$0xff] %vm3223_vm1, %v3136_v22  ;;  %3229 = vst.msk [vmem:[#allocation5 + $0x78] sm:$0xff] %vm3223_vm1, %v3138_v14 }
 0x367   : > { %3151 = vrot.lane.b32.xlu0 %v7481_v34, %s5433_s29  ;;  %2645 = vst.msk [vmem:[#allocation5 + $0x1b0] sm:$0xff] %vm2484_vm13, %v7580_v27  ;;  %2559 = vst.msk [vmem:[#allocation4 + $0xf1] sm:$0xff] %vm2484_vm13, %v2470_v16  ;;  %v2471_v20 = vmax.f32 %v2401_v47, 0.0  ;;  %v2961_v60 = vrot.slane %v7580_v27, 2  ;;  %v2752_v39 = vrot.slane %v7580_v27, 1  ;;  %v3600_v12 = vpop.permute.xlu0 %3599 }
 0x368   : > { %v7588_v58 = vld [vmem:[#allocation4 + $0xe0] sm:$0xff]  ;;  %v2602_v2 = vld [vmem:[#allocation4 + $0xe8] sm:$0x3]  ;;  %3693 = vst.msk [vmem:[#allocation5 + $0x38] sm:$0xff] %vm3223_vm1, %v3600_v12 }
 0x369   : > { %3153 = vrot.lane.b32.xlu1 %v7489_v4, %s5433_s29  ;;  %v2964_v34 = vrot.slane %v2602_v2, 2  ;;  %2646 = vst.msk [vmem:[#allocation5 + $0x1c8] sm:$0xff] %vm2484_vm13, %v7588_v58  ;;  %2560 = vst.msk [vmem:[#allocation4 + $0xf9] sm:$0xff] %vm2484_vm13, %v2471_v20  ;;  %v2962_v57 = vrot.slane %v7588_v58, 2  ;;  %v2753_v44 = vrot.slane %v7588_v58, 1  ;;  %v2755_v5 = vrot.slane %v2602_v2, 1  ;;  %v3602_v40 = vpop.permute.xlu1 %3601 }
 0x36a   : > { %3694 = vst.msk [vmem:[#allocation5 + $0x50] sm:$0xff] %vm3223_vm1, %v3602_v40 }
 0x36b   : > { %3615 = vrot.lane.b32.xlu0 %v7509_v18, %s5433_s29  ;;  %v3830_v4 = vld [vmem:[#allocation5 + $0x130] sm:$0xff]  ;;  %v3833_v23 = vld [vmem:[#allocation5 + $0x148] sm:$0xff]  ;;  %v7604_v59 = vsel %vm1123_vm5, %v2961_v60, %v2962_v57  ;;  %v7607_v7 = vsel %vm1123_vm5, %v2962_v57, %v2964_v34  ;;  %v7610_v55 = vsel %vm913_vm4, %v2752_v39, %v2753_v44  ;;  %v7613_v19 = vsel %vm913_vm4, %v2753_v44, %v2755_v5  ;;  %v3340_v61 = vpop.permute.xlu0 %3339 }
 0x36c   : > { %v3908_v56 = vpack.c.bf16 %v3833_v23, %v3830_v4  ;;  %3774 = vst.msk [vmem:[#allocation5 + $0x160] sm:$0xff] %vm2484_vm13, %v7604_v59  ;;  %3775 = vst.msk [vmem:[#allocation5 + $0x178] sm:$0xff] %vm2484_vm13, %v7607_v7 }
 0x36d   : > { %3617 = vrot.lane.b32.xlu1 %v7520_v15, %s5433_s29  ;;  %3310 = vst.msk [vmem:[#allocation5 + $0x188] sm:$0xff] %vm2484_vm13, %v7610_v55  ;;  %3311 = vst.msk [vmem:[#allocation5 + $0x1a0] sm:$0xff] %vm2484_vm13, %v7613_v19  ;;  %v3342_v46 = vpop.permute.xlu1 %3341  ;;  %v3807_v9 = vld [vmem:[#allocation5 + $0x78] sm:$0xff] }
 0x36e   : > { %v7626_v6 = vld [vmem:[#allocation4 + $0xf0] sm:$0xff]  ;;  %5302 = vmatprep.mubr.msk.bf16.mxu1 %vm2484_vm13, %v3908_v56  ;;  %3431 = vst.msk [vmem:[#allocation5 + $0x68] sm:$0xff] %vm2883_vm15, %v3340_v61  ;;  %3432 = vst.msk [vmem:[#allocation5 + $0x80] sm:$0xff] %vm2883_vm15, %v3342_v46 }
 0x36f   : > { %3355 = vrot.lane.b32.xlu0 %v7503_v25, %s5432_s26  ;;  %2647 = vst.msk [vmem:[#allocation5 + $0x1e0] sm:$0xff] %vm2484_vm13, %v7626_v6  ;;  %v2966_v0 = vrot.slane %v7626_v6, 2  ;;  %v2757_v36 = vrot.slane %v7626_v6, 1  ;;  %v2800_v54 = vpop.permute.xlu0 %2799  ;;  %v3799_v26 = vld [vmem:[#allocation5 + $0x38] sm:$0xff] }
 0x370   : > { %v7636_v3 = vld [vmem:[#allocation4 + $0xf8] sm:$0xff]  ;;  %v2605_v28 = vld [vmem:[#allocation4 + $0x100] sm:$0x3]  ;;  %2890 = vst.msk [vmem:[#allocation5 + $0x90] sm:$0xff] %vm2883_vm15, %v2800_v54 }
 0x371   : > { %3357 = vrot.lane.b32.xlu1 %v7506_v62, %s5432_s26  ;;  %v2969_v52 = vrot.slane %v2605_v28, 2  ;;  %2648 = vst.msk [vmem:[#allocation5 + $0x1f8] sm:$0xff] %vm2484_vm13, %v7636_v3  ;;  %v2967_v33 = vrot.slane %v7636_v3, 2  ;;  %v2758_v37 = vrot.slane %v7636_v3, 1  ;;  %v2760_v11 = vrot.slane %v2605_v28, 1  ;;  %v2405_v53 = vpop.f32.mrb[56].mxu1  ;;  %v2802_v45 = vpop.permute.xlu1 %2801 }
 0x372   : > { %v2407_v8 = vpop.f32.mrb[57].mxu1  ;;  %v3802_v41 = vld [vmem:[#allocation5 + $0x50] sm:$0xff]  ;;  %2891 = vst.msk [vmem:[#allocation5 + $0xa8] sm:$0xff] %vm2883_vm15, %v2802_v45 }
 0x373   : > { %2815 = vrot.lane.b32.xlu0 %v7509_v18, %s5432_s26  ;;  %v3836_v50 = vld [vmem:[#allocation5 + $0x160] sm:$0xff]  ;;  %v3839_v51 = vld [vmem:[#allocation5 + $0x178] sm:$0xff]  ;;  %v7649_v10 = vsel %vm1123_vm5, %v2966_v0, %v2967_v33  ;;  %v7652_v63 = vsel %vm1123_vm5, %v2967_v33, %v2969_v52  ;;  %v7655_v1 = vsel %vm913_vm4, %v2757_v36, %v2758_v37  ;;  %v7666_v18 = vsel %vm913_vm4, %v2758_v37, %v2760_v11  ;;  %v2408_v35 = vpop.f32.mrb[58].mxu1  ;;  %v3009_v17 = vpop.permute.xlu0 %3008 }
 0x374   : > { %v3911_v48 = vpack.c.bf16 %v3839_v51, %v3836_v50  ;;  %3776 = vst.msk [vmem:[#allocation5 + $0x190] sm:$0xff] %vm2484_vm13, %v7649_v10  ;;  %3777 = vst.msk [vmem:[#allocation5 + $0x1a8] sm:$0xff] %vm2484_vm13, %v7652_v63  ;;  %v3892_v24 = vpack.c.bf16 %v3802_v41, %v3799_v26  ;;  %v2409_v16 = vadd.f32 %v7440_v13, %v2408_v35  ;;  %v2410_v47 = vpop.f32.mrb[59].mxu1  ;;  %v3804_v35 = vld [vmem:[#allocation5 + $0x60] sm:$0xff] }
 0x375   : > { %2817 = vrot.lane.b32.xlu1 %v7520_v15, %s5432_s26  ;;  %3312 = vst.msk [vmem:[#allocation5 + $0x1b8] sm:$0xff] %vm2484_vm13, %v7655_v1  ;;  %3313 = vst.msk [vmem:[#allocation5 + $0x1d0] sm:$0xff] %vm2484_vm13, %v7666_v18  ;;  %v2406_v15 = vadd.f32 %v7440_v13, %v2405_v53  ;;  %v3011_v20 = vpop.permute.xlu1 %3010  ;;  %v3894_v43 = vpack.c.bf16 %v3807_v9, %v3804_v35 }
 0x376   : > { %5303 = vmatmul.mubr.msk.bf16.gmra.mrb[92].mxu1 %vm2484_vm13, %v3911_v48  ;;  %3099 = vst.msk [vmem:[#allocation5 + $0x90] sm:$0xff] %vm3092_vm0, %v3009_v17  ;;  %4175 = vmatprep.mubr.bf16.mxu0 %v3892_v24  ;;  %3100 = vst.msk [vmem:[#allocation5 + $0xa8] sm:$0xff] %vm3092_vm0, %v3011_v20 }
 0x377   : > { %3024 = vrot.lane.b32.xlu0 %v7503_v25, %s5437_s19  ;;  %v2472_v31 = vmax.f32 %v2406_v15, 0.0  ;;  %v2473_v25 = vmax.f32 %v2409_v16, 0.0  ;;  %4176 = vmatmul.mubr.bf16.gmra.mrb[20].mxu0 %v3891_v42 }
 0x379   : > { %3026 = vrot.lane.b32.xlu1 %v7506_v62, %s5437_s19  ;;  %2561 = vst.msk [vmem:[#allocation4 + $0x109] sm:$0xff] %vm2484_vm13, %v2472_v31  ;;  %2562 = vst.msk [vmem:[#allocation4 + $0x111] sm:$0xff] %vm2484_vm13, %v2473_v25 }
 0x37b   : > { %3485 = vrot.lane.b32.xlu0 %v7531_v30, %s5437_s19  ;;  %v3842_v2 = vld [vmem:[#allocation5 + $0x190] sm:$0xff]  ;;  %v3845_v22 = vld [vmem:[#allocation5 + $0x1a8] sm:$0xff] }
 0x37c   : > { %v3914_v62 = vpack.c.bf16 %v3845_v22, %v3842_v2 }
 0x37d   : > { %3487 = vrot.lane.b32.xlu1 %v7539_v21, %s5437_s19 }
 0x37e   : > { %5306 = vmatprep.mubr.msk.bf16.mxu1 %vm2484_vm13, %v3914_v62 }
 0x37f   : > { %3155 = vrot.lane.b32.xlu0 %v7531_v30, %s5433_s29 }
 0x380   : > { %v7692_v60 = vld [vmem:[#allocation4 + $0x108] sm:$0xff]  ;;  %v7698_v39 = vld [vmem:[#allocation4 + $0x110] sm:$0xff]  ;;  %v2608_v34 = vld [vmem:[#allocation4 + $0x118] sm:$0x3] }
 0x381   : > { %3157 = vrot.lane.b32.xlu1 %v7539_v21, %s5433_s29  ;;  %2649 = vst.msk [vmem:[#allocation5 + $0x210] sm:$0xff] %vm2484_vm13, %v7692_v60  ;;  %v2971_v57 = vrot.slane %v7692_v60, 2  ;;  %v2762_v30 = vrot.slane %v7692_v60, 1  ;;  %v2974_v44 = vrot.slane %v2608_v34, 2  ;;  %2650 = vst.msk [vmem:[#allocation5 + $0x228] sm:$0xff] %vm2484_vm13, %v7698_v39  ;;  %v3470_v21 = vpop.permute.xlu0 %3469  ;;  %v2972_v5 = vrot.slane %v7698_v39, 2  ;;  %v3472_v23 = vpop.permute.xlu1 %3471 }
 0x382   : > { %v2763_v14 = vrot.slane %v7698_v39, 1  ;;  %v2765_v4 = vrot.slane %v2608_v34, 1  ;;  %3561 = vst.msk [vmem:[#allocation5 + $0x68] sm:$0xff] %vm3092_vm0, %v3470_v21  ;;  %3562 = vst.msk [vmem:[#allocation5 + $0x80] sm:$0xff] %vm3092_vm0, %v3472_v23 }
 0x383   : > { %3619 = vrot.lane.b32.xlu0 %v7562_v32, %s5433_s29  ;;  %v7712_v12 = vsel %vm1123_vm5, %v2971_v57, %v2972_v5  ;;  %v7715_v56 = vsel %vm1123_vm5, %v2972_v5, %v2974_v44 }
 0x384   : > { %v7718_v40 = vsel %vm913_vm4, %v2762_v30, %v2763_v14  ;;  %v7721_v0 = vsel %vm913_vm4, %v2763_v14, %v2765_v4  ;;  %3778 = vst.msk [vmem:[#allocation5 + $0x1c0] sm:$0xff] %vm2484_vm13, %v7712_v12  ;;  %3779 = vst.msk [vmem:[#allocation5 + $0x1d8] sm:$0xff] %vm2484_vm13, %v7715_v56 }
 0x385   : > { %3621 = vrot.lane.b32.xlu1 %v7574_v49, %s5433_s29  ;;  %3314 = vst.msk [vmem:[#allocation5 + $0x1e8] sm:$0xff] %vm2484_vm13, %v7718_v40  ;;  %3315 = vst.msk [vmem:[#allocation5 + $0x200] sm:$0xff] %vm2484_vm13, %v7721_v0  ;;  %v3140_v36 = vpop.permute.xlu0 %3139  ;;  %v3142_v28 = vpop.permute.xlu1 %3141 }
 0x386   : > { %3230 = vst.msk [vmem:[#allocation5 + $0x90] sm:$0xff] %vm3223_vm1, %v3140_v36  ;;  %3231 = vst.msk [vmem:[#allocation5 + $0xa8] sm:$0xff] %vm3223_vm1, %v3142_v28 }
 0x387   : > { %3359 = vrot.lane.b32.xlu0 %v7556_v38, %s5432_s26 }
 0x389   : > { %3361 = vrot.lane.b32.xlu1 %v7559_v29, %s5432_s26  ;;  %v3604_v61 = vpop.permute.xlu0 %3603  ;;  %v3606_v52 = vpop.permute.xlu1 %3605 }
 0x38a   : > { %3695 = vst.msk [vmem:[#allocation5 + $0x68] sm:$0xff] %vm3223_vm1, %v3604_v61  ;;  %3696 = vst.msk [vmem:[#allocation5 + $0x80] sm:$0xff] %vm3223_vm1, %v3606_v52 }
 0x38b   : > { %2819 = vrot.lane.b32.xlu0 %v7562_v32, %s5432_s26  ;;  %v3848_v33 = vld [vmem:[#allocation5 + $0x1c0] sm:$0xff]  ;;  %v3851_v37 = vld [vmem:[#allocation5 + $0x1d8] sm:$0xff] }
 0x38c   : > { %v3917_v11 = vpack.c.bf16 %v3851_v37, %v3848_v33 }
 0x38d   : > { %2821 = vrot.lane.b32.xlu1 %v7574_v49, %s5432_s26  ;;  %v3344_v32 = vpop.permute.xlu0 %3343  ;;  %v2413_v49 = vpop.f32.mrb[60].mxu1  ;;  %v3813_v33 = vld [vmem:[#allocation5 + $0xa8] sm:$0xff] }
 0x38e   : > { %3433 = vst.msk [vmem:[#allocation5 + $0x98] sm:$0xff] %vm2883_vm15, %v3344_v32  ;;  %5307 = vmatmul.mubr.msk.bf16.gmra.mrb[96].mxu1 %vm2484_vm13, %v3917_v11  ;;  %v3346_v46 = vpop.permute.xlu1 %3345  ;;  %v2415_v50 = vpop.f32.mrb[61].mxu1 }
 0x38f   : > { %3028 = vrot.lane.b32.xlu0 %v7556_v38, %s5437_s19  ;;  %v2414_v38 = vadd.f32 %v7440_v13, %v2413_v49  ;;  %3434 = vst.msk [vmem:[#allocation5 + $0xb0] sm:$0xff] %vm2883_vm15, %v3346_v46  ;;  %v2416_v51 = vpop.f32.mrb[62].mxu1 }
 0x390   : > { %v2417_v48 = vadd.f32 %v7440_v13, %v2416_v51  ;;  %v2418_v53 = vpop.f32.mrb[63].mxu1  ;;  %v3810_v51 = vld [vmem:[#allocation5 + $0x90] sm:$0xff] }
 0x391   : > { %3030 = vrot.lane.b32.xlu1 %v7559_v29, %s5437_s19  ;;  %v2804_v29 = vpop.permute.xlu0 %2803  ;;  %v2474_v54 = vmax.f32 %v2414_v38, 0.0  ;;  %v3805_v8 = vld [vmem:[#allocation5 + $0x68] sm:$0xff]  ;;  %v3808_v45 = vld [vmem:[#allocation5 + $0x80] sm:$0xff]  ;;  %v3897_v9 = vpack.c.bf16 %v3813_v33, %v3810_v51 }
 0x392   : > { %2892 = vst.msk [vmem:[#allocation5 + $0xc0] sm:$0xff] %vm2883_vm15, %v2804_v29  ;;  %v2806_v15 = vpop.permute.xlu1 %2805  ;;  %v2475_v26 = vmax.f32 %v2417_v48, 0.0  ;;  %v3895_v41 = vpack.c.bf16 %v3808_v45, %v3805_v8 }
 0x393   : > { %3489 = vrot.lane.b32.xlu0 %v7580_v27, %s5437_s19  ;;  %2563 = vst.msk [vmem:[#allocation4 + $0x121] sm:$0xff] %vm2484_vm13, %v2474_v54 }
 0x394   : > { %2893 = vst.msk [vmem:[#allocation5 + $0xd8] sm:$0xff] %vm2883_vm15, %v2806_v15  ;;  %4183 = vmatprep.mubr.bf16.mxu0 %v3895_v41 }
 0x395   : > { %3491 = vrot.lane.b32.xlu1 %v7588_v58, %s5437_s19  ;;  %v3013_v24 = vpop.permute.xlu0 %3012  ;;  %2564 = vst.msk [vmem:[#allocation4 + $0x129] sm:$0xff] %vm2484_vm13, %v2475_v26  ;;  %4184 = vmatmul.mubr.bf16.gmra.mrb[24].mxu0 %v3894_v43 }
 0x396   : > { %3101 = vst.msk [vmem:[#allocation5 + $0xc0] sm:$0xff] %vm3092_vm0, %v3013_v24 }
 0x397   : > { %3159 = vrot.lane.b32.xlu0 %v7580_v27, %s5433_s29  ;;  %v3015_v27 = vpop.permute.xlu1 %3014 }
 0x398   : > { %3102 = vst.msk [vmem:[#allocation5 + $0xd8] sm:$0xff] %vm3092_vm0, %v3015_v27 }
 0x399   : > { %3161 = vrot.lane.b32.xlu1 %v7588_v58, %s5433_s29  ;;  %v3474_v31 = vpop.permute.xlu0 %3473 }
 0x39a   : > { %3563 = vst.msk [vmem:[#allocation5 + $0x98] sm:$0xff] %vm3092_vm0, %v3474_v31  ;;  %v7770_v58 = vld [vmem:[#allocation4 + $0x120] sm:$0xff] }
 0x39b   : > { %3623 = vrot.lane.b32.xlu0 %v7610_v55, %s5433_s29  ;;  %v3476_v16 = vpop.permute.xlu1 %3475  ;;  %2651 = vst.msk [vmem:[#allocation5 + $0x240] sm:$0xff] %vm2484_vm13, %v7770_v58  ;;  %v2976_v47 = vrot.slane %v7770_v58, 2  ;;  %v2767_v17 = vrot.slane %v7770_v58, 1 }
 0x39c   : > { %3564 = vst.msk [vmem:[#allocation5 + $0xb0] sm:$0xff] %vm3092_vm0, %v3476_v16  ;;  %v7779_v42 = vld [vmem:[#allocation4 + $0x128] sm:$0xff]  ;;  %v2611_v25 = vld [vmem:[#allocation4 + $0x130] sm:$0x3] }
 0x39d   : > { %3625 = vrot.lane.b32.xlu1 %v7613_v19, %s5433_s29  ;;  %v3144_v20 = vpop.permute.xlu0 %3143  ;;  %v2979_v2 = vrot.slane %v2611_v25, 2  ;;  %2652 = vst.msk [vmem:[#allocation5 + $0x258] sm:$0xff] %vm2484_vm13, %v7779_v42  ;;  %v2977_v22 = vrot.slane %v7779_v42, 2  ;;  %v2768_v62 = vrot.slane %v7779_v42, 1  ;;  %v2770_v34 = vrot.slane %v2611_v25, 1 }
 0x39e   : > { %3232 = vst.msk [vmem:[#allocation5 + $0xc0] sm:$0xff] %vm3223_vm1, %v3144_v20 }
 0x39f   : > { %3363 = vrot.lane.b32.xlu0 %v7604_v59, %s5432_s26  ;;  %v3146_v57 = vpop.permute.xlu1 %3145  ;;  %v7791_v30 = vsel %vm1123_vm5, %v2976_v47, %v2977_v22  ;;  %v7794_v44 = vsel %vm1123_vm5, %v2977_v22, %v2979_v2  ;;  %v7797_v21 = vsel %vm913_vm4, %v2767_v17, %v2768_v62  ;;  %v7800_v5 = vsel %vm913_vm4, %v2768_v62, %v2770_v34  ;;  %v7892_v22 = vld [vmem:[#allocation4 + $0x198] sm:$0xff]  ;;  %v7894_v62 = vld [vmem:[#allocation4 + $0x1a0] sm:$0xff] }
 0x3a0   : > { %3233 = vst.msk [vmem:[#allocation5 + $0xd8] sm:$0xff] %vm3223_vm1, %v3146_v57  ;;  %v3723_v57 = vrot.slane %v7892_v22, 2 }
 0x3a1   : > { %3365 = vrot.lane.b32.xlu1 %v7607_v7, %s5432_s26  ;;  %3780 = vst.msk [vmem:[#allocation5 + $0x1f0] sm:$0xff] %vm2484_vm13, %v7791_v30  ;;  %3781 = vst.msk [vmem:[#allocation5 + $0x208] sm:$0xff] %vm2484_vm13, %v7794_v44 }
 0x3a2   : > { %3316 = vst.msk [vmem:[#allocation5 + $0x218] sm:$0xff] %vm2484_vm13, %v7797_v21  ;;  %3317 = vst.msk [vmem:[#allocation5 + $0x230] sm:$0xff] %vm2484_vm13, %v7800_v5 }
 0x3a3   : > { %2823 = vrot.lane.b32.xlu0 %v7610_v55, %s5432_s26  ;;  %v3608_v55 = vpop.permute.xlu0 %3607  ;;  %v3610_v14 = vpop.permute.xlu1 %3609 }
 0x3a4   : > { %3697 = vst.msk [vmem:[#allocation5 + $0x98] sm:$0xff] %vm3223_vm1, %v3608_v55  ;;  %3698 = vst.msk [vmem:[#allocation5 + $0xb0] sm:$0xff] %vm3223_vm1, %v3610_v14 }
 0x3a5   : > { %2825 = vrot.lane.b32.xlu1 %v7613_v19, %s5432_s26 }
 0x3a7   : > { %3493 = vrot.lane.b32.xlu0 %v7626_v6, %s5437_s19  ;;  %v3348_v4 = vpop.permute.xlu0 %3347  ;;  %v3350_v23 = vpop.permute.xlu1 %3349 }
 0x3a8   : > { %3435 = vst.msk [vmem:[#allocation5 + $0xc8] sm:$0xff] %vm2883_vm15, %v3348_v4  ;;  %v3854_v19 = vld [vmem:[#allocation5 + $0x1f0] sm:$0xff]  ;;  %v3857_v36 = vld [vmem:[#allocation5 + $0x208] sm:$0xff]  ;;  %3436 = vst.msk [vmem:[#allocation5 + $0xe0] sm:$0xff] %vm2883_vm15, %v3350_v23 }
 0x3a9   : > { %3495 = vrot.lane.b32.xlu1 %v7636_v3, %s5437_s19  ;;  %v3920_v28 = vpack.c.bf16 %v3857_v36, %v3854_v19  ;;  %v2421_v52 = vpop.f32.mrb[64].mxu1 }
 0x3aa   : > { %v2422_v37 = vadd.f32 %v7440_v13, %v2421_v52  ;;  %v2423_v11 = vpop.f32.mrb[65].mxu1 }
 0x3ab   : > { %3627 = vrot.lane.b32.xlu0 %v7655_v1, %s5433_s29  ;;  %v2808_v61 = vpop.permute.xlu0 %2807  ;;  %5310 = vmatprep.mubr.msk.bf16.mxu1 %vm2484_vm13, %v3920_v28  ;;  %v2810_v32 = vpop.permute.xlu1 %2809  ;;  %v3811_v49 = vld [vmem:[#allocation5 + $0x98] sm:$0xff]  ;;  %v3814_v46 = vld [vmem:[#allocation5 + $0xb0] sm:$0xff] }
 0x3ac   : > { %2894 = vst.msk [vmem:[#allocation5 + $0xf0] sm:$0xff] %vm2883_vm15, %v2808_v61  ;;  %2895 = vst.msk [vmem:[#allocation5 + $0x108] sm:$0xff] %vm2883_vm15, %v2810_v32  ;;  %v2424_v38 = vpop.f32.mrb[66].mxu1  ;;  %v3898_v50 = vpack.c.bf16 %v3814_v46, %v3811_v49  ;;  %v2476_v29 = vmax.f32 %v2422_v37, 0.0  ;;  %v7914_v37 = vld [vmem:[#allocation4 + $0x1a8] sm:$0x3] }
 0x3ad   : > { %3629 = vrot.lane.b32.xlu1 %v7666_v18, %s5433_s29  ;;  %v2425_v54 = vadd.f32 %v7440_v13, %v2424_v38  ;;  %v2426_v48 = vpop.f32.mrb[67].mxu1  ;;  %v3726_v46 = vrot.slane %v7914_v37, 2  ;;  %v3819_v38 = vld [vmem:[#allocation5 + $0xd8] sm:$0xff] }
 0x3ae   : > { %4191 = vmatprep.mubr.bf16.mxu0 %v3898_v50  ;;  %2565 = vst.msk [vmem:[#allocation4 + $0x139] sm:$0xff] %vm2484_vm13, %v2476_v29 }
 0x3af   : > { %3367 = vrot.lane.b32.xlu0 %v7649_v10, %s5432_s26  ;;  %v3017_v53 = vpop.permute.xlu0 %3016  ;;  %v2477_v15 = vmax.f32 %v2425_v54, 0.0  ;;  %v3019_v8 = vpop.permute.xlu1 %3018  ;;  %4192 = vmatmul.mubr.bf16.gmra.mrb[28].mxu0 %v3897_v9 }
 0x3b0   : > { %3103 = vst.msk [vmem:[#allocation5 + $0xf0] sm:$0xff] %vm3092_vm0, %v3017_v53  ;;  %3104 = vst.msk [vmem:[#allocation5 + $0x108] sm:$0xff] %vm3092_vm0, %v3019_v8  ;;  %v3816_v53 = vld [vmem:[#allocation5 + $0xc0] sm:$0xff] }
 0x3b1   : > { %3369 = vrot.lane.b32.xlu1 %v7652_v63, %s5432_s26  ;;  %2566 = vst.msk [vmem:[#allocation4 + $0x141] sm:$0xff] %vm2484_vm13, %v2477_v15  ;;  %v3900_v15 = vpack.c.bf16 %v3819_v38, %v3816_v53 }
 0x3b3   : > { %3497 = vrot.lane.b32.xlu0 %v7692_v60, %s5437_s19 }
 0x3b5   : > { %3499 = vrot.lane.b32.xlu1 %v7698_v39, %s5437_s19  ;;  %v7846_v45 = vld [vmem:[#allocation4 + $0x138] sm:$0xff] }
 0x3b6   : > { %2653 = vst.msk [vmem:[#allocation5 + $0x270] sm:$0xff] %vm2484_vm13, %v7846_v45  ;;  %v2981_v35 = vrot.slane %v7846_v45, 2  ;;  %v2772_v24 = vrot.slane %v7846_v45, 1 }
 0x3b7   : > { %3032 = vrot.lane.b32.xlu0 %v7604_v59, %s5437_s19 }
 0x3b8   : > { %v7852_v26 = vld [vmem:[#allocation4 + $0x140] sm:$0xff]  ;;  %v2614_v41 = vld [vmem:[#allocation4 + $0x148] sm:$0x3] }
 0x3b9   : > { %3034 = vrot.lane.b32.xlu1 %v7607_v7, %s5437_s19  ;;  %v2984_v43 = vrot.slane %v2614_v41, 2  ;;  %2654 = vst.msk [vmem:[#allocation5 + $0x288] sm:$0xff] %vm2484_vm13, %v7852_v26  ;;  %v2982_v7 = vrot.slane %v7852_v26, 2  ;;  %v2773_v27 = vrot.slane %v7852_v26, 1  ;;  %v2775_v31 = vrot.slane %v2614_v41, 1 }
 0x3bb   : > { %3631 = vrot.lane.b32.xlu0 %v7718_v40, %s5433_s29  ;;  %v7866_v47 = vsel %vm1123_vm5, %v2981_v35, %v2982_v7  ;;  %v7869_v17 = vsel %vm1123_vm5, %v2982_v7, %v2984_v43  ;;  %v7872_v25 = vsel %vm913_vm4, %v2772_v24, %v2773_v27  ;;  %v7875_v20 = vsel %vm913_vm4, %v2773_v27, %v2775_v31 }
 0x3bc   : > { %3782 = vst.msk [vmem:[#allocation5 + $0x220] sm:$0xff] %vm2484_vm13, %v7866_v47  ;;  %3783 = vst.msk [vmem:[#allocation5 + $0x238] sm:$0xff] %vm2484_vm13, %v7869_v17 }
 0x3bd   : > { %3633 = vrot.lane.b32.xlu1 %v7721_v0, %s5433_s29  ;;  %v3478_v59 = vpop.permute.xlu0 %3477  ;;  %3318 = vst.msk [vmem:[#allocation5 + $0x248] sm:$0xff] %vm2484_vm13, %v7872_v25  ;;  %3319 = vst.msk [vmem:[#allocation5 + $0x260] sm:$0xff] %vm2484_vm13, %v7875_v20 }
 0x3be   : > { %3565 = vst.msk [vmem:[#allocation5 + $0xc8] sm:$0xff] %vm3092_vm0, %v3478_v59 }
 0x3bf   : > { %v3480_v16 = vpop.permute.xlu1 %3479  ;;  %3163 = vrot.lane.b32.xlu0 %v7626_v6, %s5433_s29 }
 0x3c0   : > { %3566 = vst.msk [vmem:[#allocation5 + $0xe0] sm:$0xff] %vm3092_vm0, %v3480_v16 }
 0x3c1   : > { %3165 = vrot.lane.b32.xlu1 %v7636_v3, %s5433_s29  ;;  %v3148_v6 = vpop.permute.xlu0 %3147  ;;  %v3724_v3 = vrot.slane %v7894_v62, 2 }
 0x3c2   : > { %3234 = vst.msk [vmem:[#allocation5 + $0xf0] sm:$0xff] %vm3223_vm1, %v3148_v6 }
 0x3c3   : > { %v3150_v2 = vpop.permute.xlu1 %3149  ;;  %3371 = vrot.lane.b32.xlu0 %v7712_v12, %s5432_s26  ;;  %v3860_v14 = vld [vmem:[#allocation5 + $0x220] sm:$0xff]  ;;  %v3863_v4 = vld [vmem:[#allocation5 + $0x238] sm:$0xff]  ;;  %v3725_v23 = vsel %vm1123_vm5, %v3723_v57, %v3724_v3  ;;  %v3727_v48 = vsel %vm1123_vm5, %v3724_v3, %v3726_v46 }
 0x3c4   : > { %3235 = vst.msk [vmem:[#allocation5 + $0x108] sm:$0xff] %vm3223_vm1, %v3150_v2  ;;  %v3923_v19 = vpack.c.bf16 %v3863_v4, %v3860_v14 }
 0x3c5   : > { %3373 = vrot.lane.b32.xlu1 %v7715_v56, %s5432_s26  ;;  %v3612_v34 = vpop.permute.xlu0 %3611  ;;  %3790 = vst.msk [vmem:[#allocation5 + $0x2e0] sm:$0xff] %vm2484_vm13, %v3725_v23  ;;  %v2429_v28 = vpop.f32.mrb[68].mxu1  ;;  %3791 = vst.msk [vmem:[#allocation5 + $0x2f8] sm:$0xff] %vm2484_vm13, %v3727_v48 }
 0x3c6   : > { %3699 = vst.msk [vmem:[#allocation5 + $0xc8] sm:$0xff] %vm3223_vm1, %v3612_v34  ;;  %5311 = vmatmul.mubr.msk.bf16.gmra.mrb[100].mxu1 %vm2484_vm13, %v3923_v19  ;;  %v2431_v52 = vpop.f32.mrb[69].mxu1 }
 0x3c7   : > { %v3614_v55 = vpop.permute.xlu1 %3613  ;;  %2827 = vrot.lane.b32.xlu0 %v7655_v1, %s5432_s26  ;;  %v2430_v1 = vadd.f32 %v7440_v13, %v2429_v28  ;;  %v2432_v33 = vpop.f32.mrb[70].mxu1 }
 0x3c8   : > { %3700 = vst.msk [vmem:[#allocation5 + $0xe0] sm:$0xff] %vm3223_vm1, %v3614_v55  ;;  %v2433_v32 = vadd.f32 %v7440_v13, %v2432_v33  ;;  %v2434_v49 = vpop.f32.mrb[71].mxu1 }
 0x3c9   : > { %2829 = vrot.lane.b32.xlu1 %v7666_v18, %s5432_s26  ;;  %v3352_v36 = vpop.permute.xlu0 %3351  ;;  %v2478_v11 = vmax.f32 %v2430_v1, 0.0  ;;  %v3822_v46 = vld [vmem:[#allocation5 + $0xf0] sm:$0xff] }
 0x3ca   : > { %3437 = vst.msk [vmem:[#allocation5 + $0xf8] sm:$0xff] %vm2883_vm15, %v3352_v36  ;;  %v2479_v54 = vmax.f32 %v2433_v32, 0.0 }
 0x3cb   : > { %v3354_v61 = vpop.permute.xlu1 %3353  ;;  %3501 = vrot.lane.b32.xlu0 %v7770_v58, %s5437_s19  ;;  %2567 = vst.msk [vmem:[#allocation4 + $0x151] sm:$0xff] %vm2484_vm13, %v2478_v11 }
 0x3cc   : > { %3438 = vst.msk [vmem:[#allocation5 + $0x110] sm:$0xff] %vm2883_vm15, %v3354_v61  ;;  %v7997_v61 = vld [vmem:[%s8559_s4] ss:$0 sm:$0xff] }
 0x3cd   : > { %3503 = vrot.lane.b32.xlu1 %v7779_v42, %s5437_s19  ;;  %v2812_v18 = vpop.permute.xlu0 %2811  ;;  %v3817_v51 = vld [vmem:[#allocation5 + $0xc8] sm:$0xff]  ;;  %2568 = vst.msk [vmem:[#allocation4 + $0x159] sm:$0xff] %vm2484_vm13, %v2479_v54 }
 0x3ce   : > { %2896 = vst.msk [vmem:[#allocation5 + $0x120] sm:$0xff] %vm2883_vm15, %v2812_v18 }
 0x3cf   : > { %v2814_v50 = vpop.permute.xlu1 %2813  ;;  %3036 = vrot.lane.b32.xlu0 %v7649_v10, %s5437_s19  ;;  %v3820_v29 = vld [vmem:[#allocation5 + $0xe0] sm:$0xff] }
 0x3d0   : > { %2897 = vst.msk [vmem:[#allocation5 + $0x138] sm:$0xff] %vm2883_vm15, %v2814_v50  ;;  %v3901_v13 = vpack.c.bf16 %v3820_v29, %v3817_v51 }
 0x3d1   : > { %3038 = vrot.lane.b32.xlu1 %v7652_v63, %s5437_s19  ;;  %v3021_v9 = vpop.permute.xlu0 %3020 }
 0x3d2   : > { %3105 = vst.msk [vmem:[#allocation5 + $0x120] sm:$0xff] %vm3092_vm0, %v3021_v9  ;;  %4199 = vmatprep.mubr.bf16.mxu0 %v3901_v13  ;;  %v7937_v63 = vld [vmem:[#allocation4 + $0x150] sm:$0xff] }
 0x3d3   : > { %v3023_v10 = vpop.permute.xlu1 %3022  ;;  %3635 = vrot.lane.b32.xlu0 %v7797_v21, %s5433_s29  ;;  %4200 = vmatmul.mubr.bf16.gmra.mrb[32].mxu0 %v3900_v15  ;;  %v2986_v35 = vrot.slane %v7937_v63, 2  ;;  %2655 = vst.msk [vmem:[#allocation5 + $0x2a0] sm:$0xff] %vm2484_vm13, %v7937_v63  ;;  %v2777_v24 = vrot.slane %v7937_v63, 1 }
 0x3d4   : > { %3106 = vst.msk [vmem:[#allocation5 + $0x138] sm:$0xff] %vm3092_vm0, %v3023_v10  ;;  %v7946_v43 = vld [vmem:[#allocation4 + $0x158] sm:$0xff]  ;;  %v2617_v59 = vld [vmem:[#allocation4 + $0x160] sm:$0x3] }
 0x3d5   : > { %3637 = vrot.lane.b32.xlu1 %v7800_v5, %s5433_s29  ;;  %v3482_v8 = vpop.permute.xlu0 %3481  ;;  %v2987_v27 = vrot.slane %v7946_v43, 2  ;;  %v2989_v31 = vrot.slane %v2617_v59, 2  ;;  %2656 = vst.msk [vmem:[#allocation5 + $0x2b8] sm:$0xff] %vm2484_vm13, %v7946_v43  ;;  %v2780_v16 = vrot.slane %v2617_v59, 1 }
 0x3d6   : > { %3567 = vst.msk [vmem:[#allocation5 + $0xf8] sm:$0xff] %vm3092_vm0, %v3482_v8 }
 0x3d7   : > { %v3484_v41 = vpop.permute.xlu1 %3483  ;;  %3167 = vrot.lane.b32.xlu0 %v7692_v60, %s5433_s29  ;;  %v2778_v60 = vrot.slane %v7946_v43, 1  ;;  %v7958_v2 = vsel %vm1123_vm5, %v2986_v35, %v2987_v27 }
 0x3d8   : > { %3568 = vst.msk [vmem:[#allocation5 + $0x110] sm:$0xff] %vm3092_vm0, %v3484_v41 }
 0x3d9   : > { %3169 = vrot.lane.b32.xlu1 %v7698_v39, %s5433_s29  ;;  %v3152_v7 = vpop.permute.xlu0 %3151  ;;  %v7961_v39 = vsel %vm1123_vm5, %v2987_v27, %v2989_v31  ;;  %v7964_v34 = vsel %vm913_vm4, %v2777_v24, %v2778_v60  ;;  %v7967_v57 = vsel %vm913_vm4, %v2778_v60, %v2780_v16  ;;  %3784 = vst.msk [vmem:[#allocation5 + $0x250] sm:$0xff] %vm2484_vm13, %v7958_v2 }
 0x3da   : > { %3236 = vst.msk [vmem:[#allocation5 + $0x120] sm:$0xff] %vm3223_vm1, %v3152_v7 }
 0x3db   : > { %v3154_v6 = vpop.permute.xlu1 %3153  ;;  %3375 = vrot.lane.b32.xlu0 %v7791_v30, %s5432_s26  ;;  %3785 = vst.msk [vmem:[#allocation5 + $0x268] sm:$0xff] %vm2484_vm13, %v7961_v39  ;;  %3320 = vst.msk [vmem:[#allocation5 + $0x278] sm:$0xff] %vm2484_vm13, %v7964_v34 }
 0x3dc   : > { %3237 = vst.msk [vmem:[#allocation5 + $0x138] sm:$0xff] %vm3223_vm1, %v3154_v6 }
 0x3dd   : > { %3321 = vst.msk [vmem:[#allocation5 + $0x290] sm:$0xff] %vm2484_vm13, %v7967_v57  ;;  %3377 = vrot.lane.b32.xlu1 %v7794_v44, %s5432_s26  ;;  %v3616_v3 = vpop.permute.xlu0 %3615 }
 0x3de   : > { %3701 = vst.msk [vmem:[#allocation5 + $0xf8] sm:$0xff] %vm3223_vm1, %v3616_v3 }
 0x3df   : > { %v3618_v55 = vpop.permute.xlu1 %3617  ;;  %2831 = vrot.lane.b32.xlu0 %v7718_v40, %s5432_s26 }
 0x3e0   : > { %3702 = vst.msk [vmem:[#allocation5 + $0x110] sm:$0xff] %vm3223_vm1, %v3618_v55  ;;  %v3866_v23 = vld [vmem:[#allocation5 + $0x250] sm:$0xff] }
 0x3e1   : > { %2833 = vrot.lane.b32.xlu1 %v7721_v0, %s5432_s26  ;;  %v3356_v14 = vpop.permute.xlu0 %3355  ;;  %v2437_v28 = vpop.f32.mrb[72].mxu1  ;;  %v3825_v0 = vld [vmem:[#allocation5 + $0x108] sm:$0xff] }
 0x3e2   : > { %3439 = vst.msk [vmem:[#allocation5 + $0x128] sm:$0xff] %vm2883_vm15, %v3356_v14  ;;  %v3869_v19 = vld [vmem:[#allocation5 + $0x268] sm:$0xff]  ;;  %v2438_v1 = vadd.f32 %v7997_v61, %v2437_v28  ;;  %v2439_v52 = vpop.f32.mrb[73].mxu1  ;;  %v3903_v54 = vpack.c.bf16 %v3825_v0, %v3822_v46  ;;  %v3828_v0 = vld [vmem:[#allocation5 + $0x120] sm:$0xff] }
 0x3e3   : > { %v3358_v4 = vpop.permute.xlu1 %3357  ;;  %3505 = vrot.lane.b32.xlu0 %v7846_v45, %s5437_s19  ;;  %v3926_v36 = vpack.c.bf16 %v3869_v19, %v3866_v23  ;;  %v2440_v32 = vpop.f32.mrb[74].mxu1 }
 0x3e4   : > { %3440 = vst.msk [vmem:[#allocation5 + $0x140] sm:$0xff] %vm2883_vm15, %v3358_v4  ;;  %v2480_v38 = vmax.f32 %v2438_v1, 0.0  ;;  %v2441_v50 = vadd.f32 %v7997_v61, %v2440_v32  ;;  %v2442_v51 = vpop.f32.mrb[75].mxu1  ;;  %v3831_v4 = vld [vmem:[#allocation5 + $0x138] sm:$0xff] }
 0x3e5   : > { %3507 = vrot.lane.b32.xlu1 %v7852_v26, %s5437_s19  ;;  %v2816_v40 = vpop.permute.xlu0 %2815  ;;  %5314 = vmatprep.mubr.msk.bf16.mxu1 %vm2484_vm13, %v3926_v36  ;;  %v3823_v18 = vld [vmem:[#allocation5 + $0xf8] sm:$0xff]  ;;  %v3906_v52 = vpack.c.bf16 %v3831_v4, %v3828_v0 }
 0x3e6   : > { %2898 = vst.msk [vmem:[#allocation5 + $0x150] sm:$0xff] %vm2883_vm15, %v2816_v40 }
 0x3e7   : > { %v2818_v33 = vpop.permute.xlu1 %2817  ;;  %3040 = vrot.lane.b32.xlu0 %v7712_v12, %s5437_s19  ;;  %v3826_v11 = vld [vmem:[#allocation5 + $0x110] sm:$0xff]  ;;  %2569 = vst.msk [vmem:[#allocation4 + $0x169] sm:$0xff] %vm2484_vm13, %v2480_v38  ;;  %v2481_v12 = vmax.f32 %v2441_v50, 0.0 }
 0x3e8   : > { %2899 = vst.msk [vmem:[#allocation5 + $0x168] sm:$0xff] %vm2883_vm15, %v2818_v33  ;;  %v3904_v49 = vpack.c.bf16 %v3826_v11, %v3823_v18 }
 0x3e9   : > { %3042 = vrot.lane.b32.xlu1 %v7715_v56, %s5437_s19  ;;  %v3025_v29 = vpop.permute.xlu0 %3024  ;;  %2570 = vst.msk [vmem:[#allocation4 + $0x171] sm:$0xff] %vm2484_vm13, %v2481_v12 }
 0x3ea   : > { %3107 = vst.msk [vmem:[#allocation5 + $0x150] sm:$0xff] %vm3092_vm0, %v3025_v29  ;;  %4207 = vmatprep.mubr.bf16.mxu0 %v3904_v49 }
 0x3eb   : > { %v3027_v48 = vpop.permute.xlu1 %3026  ;;  %3639 = vrot.lane.b32.xlu0 %v7872_v25, %s5433_s29  ;;  %4208 = vmatmul.mubr.bf16.gmra.mrb[36].mxu0 %v3903_v54 }
 0x3ec   : > { %3108 = vst.msk [vmem:[#allocation5 + $0x168] sm:$0xff] %vm3092_vm0, %v3027_v48 }
 0x3ed   : > { %3641 = vrot.lane.b32.xlu1 %v7875_v20, %s5433_s29  ;;  %v3486_v56 = vpop.permute.xlu0 %3485 }
 0x3ee   : > { %3569 = vst.msk [vmem:[#allocation5 + $0x128] sm:$0xff] %vm3092_vm0, %v3486_v56  ;;  %v8020_v9 = vld [vmem:[#allocation4 + $0x168] sm:$0xff] }
 0x3ef   : > { %v3488_v13 = vpop.permute.xlu1 %3487  ;;  %3171 = vrot.lane.b32.xlu0 %v7770_v58, %s5433_s29  ;;  %2657 = vst.msk [vmem:[#allocation5 + $0x2d0] sm:$0xff] %vm2484_vm13, %v8020_v9  ;;  %v2991_v8 = vrot.slane %v8020_v9, 2 }
 0x3f0   : > { %3570 = vst.msk [vmem:[#allocation5 + $0x140] sm:$0xff] %vm3092_vm0, %v3488_v13  ;;  %v8027_v10 = vld [vmem:[#allocation4 + $0x170] sm:$0xff]  ;;  %v2620_v58 = vld [vmem:[#allocation4 + $0x178] sm:$0x3] }
 0x3f1   : > { %3173 = vrot.lane.b32.xlu1 %v7779_v42, %s5433_s29  ;;  %v3156_v53 = vpop.permute.xlu0 %3155  ;;  %v2782_v42 = vrot.slane %v8020_v9, 1  ;;  %v2994_v41 = vrot.slane %v2620_v58, 2  ;;  %2658 = vst.msk [vmem:[#allocation5 + $0x2e8] sm:$0xff] %vm2484_vm13, %v8027_v10  ;;  %v2992_v24 = vrot.slane %v8027_v10, 2  ;;  %v2783_v59 = vrot.slane %v8027_v10, 1 }
 0x3f2   : > { %3238 = vst.msk [vmem:[#allocation5 + $0x150] sm:$0xff] %vm3223_vm1, %v3156_v53  ;;  %v2785_v7 = vrot.slane %v2620_v58, 1 }
 0x3f3   : > { %v3158_v15 = vpop.permute.xlu1 %3157  ;;  %3379 = vrot.lane.b32.xlu0 %v7866_v47, %s5432_s26  ;;  %v8042_v31 = vsel %vm1123_vm5, %v2991_v8, %v2992_v24  ;;  %v8045_v60 = vsel %vm1123_vm5, %v2992_v24, %v2994_v41  ;;  %v8048_v16 = vsel %vm913_vm4, %v2782_v42, %v2783_v59 }
 0x3f4   : > { %3239 = vst.msk [vmem:[#allocation5 + $0x168] sm:$0xff] %vm3223_vm1, %v3158_v15  ;;  %v8051_v6 = vsel %vm913_vm4, %v2783_v59, %v2785_v7 }
 0x3f5   : > { %3381 = vrot.lane.b32.xlu1 %v7869_v17, %s5432_s26  ;;  %v3620_v35 = vpop.permute.xlu0 %3619  ;;  %3786 = vst.msk [vmem:[#allocation5 + $0x280] sm:$0xff] %vm2484_vm13, %v8042_v31  ;;  %3787 = vst.msk [vmem:[#allocation5 + $0x298] sm:$0xff] %vm2484_vm13, %v8045_v60 }
 0x3f6   : > { %3703 = vst.msk [vmem:[#allocation5 + $0x128] sm:$0xff] %vm3223_vm1, %v3620_v35 }
 0x3f7   : > { %v3622_v27 = vpop.permute.xlu1 %3621  ;;  %2835 = vrot.lane.b32.xlu0 %v7797_v21, %s5432_s26  ;;  %3322 = vst.msk [vmem:[#allocation5 + $0x2a8] sm:$0xff] %vm2484_vm13, %v8048_v16  ;;  %3323 = vst.msk [vmem:[#allocation5 + $0x2c0] sm:$0xff] %vm2484_vm13, %v8051_v6 }
 0x3f8   : > { %3704 = vst.msk [vmem:[#allocation5 + $0x140] sm:$0xff] %vm3223_vm1, %v3622_v27 }
 0x3f9   : > { %2837 = vrot.lane.b32.xlu1 %v7800_v5, %s5432_s26  ;;  %v3360_v21 = vpop.permute.xlu0 %3359  ;;  %v3834_v0 = vld [vmem:[#allocation5 + $0x150] sm:$0xff] }
 0x3fa   : > { %3441 = vst.msk [vmem:[#allocation5 + $0x158] sm:$0xff] %vm2883_vm15, %v3360_v21 }
 0x3fb   : > { %v3362_v3 = vpop.permute.xlu1 %3361  ;;  %3509 = vrot.lane.b32.xlu0 %v7937_v63, %s5437_s19 }
 0x3fc   : > { %3442 = vst.msk [vmem:[#allocation5 + $0x170] sm:$0xff] %vm2883_vm15, %v3362_v3  ;;  %v3872_v19 = vld [vmem:[#allocation5 + $0x280] sm:$0xff]  ;;  %v3875_v36 = vld [vmem:[#allocation5 + $0x298] sm:$0xff] }
 0x3fd   : > { %3511 = vrot.lane.b32.xlu1 %v7946_v43, %s5437_s19  ;;  %v2820_v55 = vpop.permute.xlu0 %2819  ;;  %v3829_v14 = vld [vmem:[#allocation5 + $0x128] sm:$0xff]  ;;  %v3929_v28 = vpack.c.bf16 %v3875_v36, %v3872_v19  ;;  %v2445_v33 = vpop.f32.mrb[76].mxu1 }
 0x3fe   : > { %2900 = vst.msk [vmem:[#allocation5 + $0x180] sm:$0xff] %vm2883_vm15, %v2820_v55  ;;  %v2446_v18 = vadd.f32 %v7997_v61, %v2445_v33  ;;  %v2447_v11 = vpop.f32.mrb[77].mxu1 }
 0x3ff   : > { %v2822_v23 = vpop.permute.xlu1 %2821  ;;  %3044 = vrot.lane.b32.xlu0 %v7791_v30, %s5437_s19  ;;  %v3832_v5 = vld [vmem:[#allocation5 + $0x140] sm:$0xff]  ;;  %5315 = vmatmul.mubr.msk.bf16.gmra.mrb[104].mxu1 %vm2484_vm13, %v3929_v28  ;;  %v2448_v32 = vpop.f32.mrb[78].mxu1 }
 0x400   : > { %2901 = vst.msk [vmem:[#allocation5 + $0x198] sm:$0xff] %vm2883_vm15, %v2822_v23  ;;  %v3907_v40 = vpack.c.bf16 %v3832_v5, %v3829_v14  ;;  %v2482_v49 = vmax.f32 %v2446_v18, 0.0  ;;  %v2449_v46 = vadd.f32 %v7997_v61, %v2448_v32  ;;  %v2450_v38 = vpop.f32.mrb[79].mxu1  ;;  %v3837_v5 = vld [vmem:[#allocation5 + $0x168] sm:$0xff] }
 0x401   : > { %3046 = vrot.lane.b32.xlu1 %v7794_v44, %s5437_s19  ;;  %v3029_v1 = vpop.permute.xlu0 %3028 }
 0x402   : > { %3109 = vst.msk [vmem:[#allocation5 + $0x180] sm:$0xff] %vm3092_vm0, %v3029_v1  ;;  %4215 = vmatprep.mubr.bf16.mxu0 %v3907_v40  ;;  %v2483_v51 = vmax.f32 %v2449_v46, 0.0 }
 0x403   : > { %v3031_v30 = vpop.permute.xlu1 %3030  ;;  %3643 = vrot.lane.b32.xlu0 %v7964_v34, %s5433_s29  ;;  %4216 = vmatmul.mubr.bf16.gmra.mrb[40].mxu0 %v3906_v52  ;;  %2571 = vst.msk [vmem:[#allocation4 + $0x181] sm:$0xff] %vm2484_vm13, %v2482_v49  ;;  %v3909_v52 = vpack.c.bf16 %v3837_v5, %v3834_v0 }
 0x404   : > { %3110 = vst.msk [vmem:[#allocation5 + $0x198] sm:$0xff] %vm3092_vm0, %v3031_v30 }
 0x405   : > { %3645 = vrot.lane.b32.xlu1 %v7967_v57, %s5433_s29  ;;  %v3490_v44 = vpop.permute.xlu0 %3489  ;;  %2572 = vst.msk [vmem:[#allocation4 + $0x189] sm:$0xff] %vm2484_vm13, %v2483_v51  ;;  %v8094_v61 = vpop.f32.mrb[80].mxu1 }
 0x406   : > { %3571 = vst.msk [vmem:[#allocation5 + $0x158] sm:$0xff] %vm3092_vm0, %v3490_v44  ;;  %v8096_v12 = vpop.f32.mrb[81].mxu1 }
 0x407   : > { %v3492_v50 = vpop.permute.xlu1 %3491  ;;  %3175 = vrot.lane.b32.xlu0 %v7846_v45, %s5433_s29  ;;  %v8101_v45 = vpop.f32.mrb[82].mxu1 }
 0x408   : > { %3572 = vst.msk [vmem:[#allocation5 + $0x170] sm:$0xff] %vm3092_vm0, %v3492_v50  ;;  %v8105_v48 = vpop.f32.mrb[83].mxu1 }
 0x409   : > { %3177 = vrot.lane.b32.xlu1 %v7852_v26, %s5433_s29  ;;  %v3160_v29 = vpop.permute.xlu0 %3159 }
 0x40a   : > { %3240 = vst.msk [vmem:[#allocation5 + $0x180] sm:$0xff] %vm3223_vm1, %v3160_v29  ;;  %v8108_v56 = vld [vmem:[#allocation4 + $0x180] sm:$0xff] }
 0x40b   : > { %v3162_v54 = vpop.permute.xlu1 %3161  ;;  %3383 = vrot.lane.b32.xlu0 %v7958_v2, %s5432_s26  ;;  %v3257_v53 = vrot.slane %v8108_v56, 1  ;;  %v3326_v15 = vrot.slane %v8108_v56, 2 }
 0x40c   : > { %3241 = vst.msk [vmem:[#allocation5 + $0x198] sm:$0xff] %vm3223_vm1, %v3162_v54  ;;  %v8115_v58 = vld [vmem:[#allocation4 + $0x188] sm:$0xff]  ;;  %v2623_v8 = vld [vmem:[#allocation4 + $0x190] sm:$0x3] }
 0x40d   : > { %3385 = vrot.lane.b32.xlu1 %v7961_v39, %s5432_s26  ;;  %v3624_v26 = vpop.permute.xlu0 %3623  ;;  %v3258_v41 = vrot.slane %v8115_v58, 1  ;;  %v3327_v35 = vrot.slane %v8115_v58, 2  ;;  %v3260_v24 = vrot.slane %v2623_v8, 1  ;;  %v3329_v59 = vrot.slane %v2623_v8, 2 }
 0x40e   : > { %3705 = vst.msk [vmem:[#allocation5 + $0x158] sm:$0xff] %vm3223_vm1, %v3624_v26 }
 0x40f   : > { %v3626_v13 = vpop.permute.xlu1 %3625  ;;  %2839 = vrot.lane.b32.xlu0 %v7872_v25, %s5432_s26  ;;  %v8122_v25 = vpop.f32.mrb[84].mxu1  ;;  %v8129_v21 = vsel %vm1123_vm5, %v3326_v15, %v3327_v35  ;;  %v8135_v3 = vsel %vm913_vm4, %v3258_v41, %v3260_v24  ;;  %v8138_v55 = vsel %vm1123_vm5, %v3327_v35, %v3329_v59 }
 0x410   : > { %3706 = vst.msk [vmem:[#allocation5 + $0x170] sm:$0xff] %vm3223_vm1, %v3626_v13  ;;  %v8124_v27 = vpop.f32.mrb[85].mxu1 }
 0x411   : > { %2841 = vrot.lane.b32.xlu1 %v7875_v20, %s5432_s26  ;;  %v3364_v42 = vpop.permute.xlu0 %3363  ;;  %v8132_v20 = vsel %vm913_vm4, %v3257_v53, %v3258_v41  ;;  %v8141_v14 = vpop.f32.mrb[86].mxu1  ;;  %3788 = vst.msk [vmem:[#allocation5 + $0x2b0] sm:$0xff] %vm2484_vm13, %v8129_v21  ;;  %3789 = vst.msk [vmem:[#allocation5 + $0x2c8] sm:$0xff] %vm2484_vm13, %v8138_v55  ;;  %v3840_v51 = vld [vmem:[#allocation5 + $0x180] sm:$0xff] }
 0x412   : > { %3443 = vst.msk [vmem:[#allocation5 + $0x188] sm:$0xff] %vm2883_vm15, %v3364_v42  ;;  %v8153_v4 = vpop.f32.mrb[87].mxu1 }
 0x413   : > { %v3366_v7 = vpop.permute.xlu1 %3365  ;;  %3513 = vrot.lane.b32.xlu0 %v8020_v9, %s5437_s19  ;;  %3324 = vst.msk [vmem:[#allocation5 + $0x2d8] sm:$0xff] %vm2484_vm13, %v8132_v20  ;;  %3325 = vst.msk [vmem:[#allocation5 + $0x2f0] sm:$0xff] %vm2484_vm13, %v8135_v3 }
 0x414   : > { %3444 = vst.msk [vmem:[#allocation5 + $0x1a0] sm:$0xff] %vm2883_vm15, %v3366_v7 }
 0x415   : > { %3515 = vrot.lane.b32.xlu1 %v8027_v10, %s5437_s19  ;;  %v2824_v23 = vpop.permute.xlu0 %2823  ;;  %v3835_v36 = vld [vmem:[#allocation5 + $0x158] sm:$0xff] }
 0x416   : > { %2902 = vst.msk [vmem:[#allocation5 + $0x1b0] sm:$0xff] %vm2883_vm15, %v2824_v23 }
 0x417   : > { %v2826_v19 = vpop.permute.xlu1 %2825  ;;  %3048 = vrot.lane.b32.xlu0 %v7866_v47, %s5437_s19  ;;  %v3838_v40 = vld [vmem:[#allocation5 + $0x170] sm:$0xff] }
 0x418   : > { %2903 = vst.msk [vmem:[#allocation5 + $0x1c8] sm:$0xff] %vm2883_vm15, %v2826_v19  ;;  %v3910_v28 = vpack.c.bf16 %v3838_v40, %v3835_v36  ;;  %v3878_v47 = vld [vmem:[#allocation5 + $0x2b0] sm:$0xff]  ;;  %v3881_v30 = vld [vmem:[#allocation5 + $0x2c8] sm:$0xff] }
 0x419   : > { %3050 = vrot.lane.b32.xlu1 %v7869_v17, %s5437_s19  ;;  %v3494_v1 = vpop.permute.xlu0 %3493  ;;  %v3932_v18 = vpack.c.bf16 %v3881_v30, %v3878_v47 }
 0x41a   : > { %3573 = vst.msk [vmem:[#allocation5 + $0x188] sm:$0xff] %vm3092_vm0, %v3494_v1  ;;  %4223 = vmatprep.mubr.bf16.mxu0 %v3910_v28 }
 0x41b   : > { %v3496_v33 = vpop.permute.xlu1 %3495  ;;  %3647 = vrot.lane.b32.xlu0 %v8048_v16, %s5433_s29  ;;  %4224 = vmatmul.mubr.bf16.gmra.mrb[44].mxu0 %v3909_v52  ;;  %v3884_v52 = vld [vmem:[#allocation5 + $0x2e0] sm:$0xff] }
 0x41c   : > { %3574 = vst.msk [vmem:[#allocation5 + $0x1a0] sm:$0xff] %vm3092_vm0, %v3496_v33  ;;  %5318 = vmatprep.mubr.msk.bf16.mxu1 %vm2484_vm13, %v3932_v18 }
 0x41d   : > { %3649 = vrot.lane.b32.xlu1 %v8051_v6, %s5433_s29  ;;  %v3628_v11 = vpop.permute.xlu0 %3627 }
 0x41e   : > { %3707 = vst.msk [vmem:[#allocation5 + $0x188] sm:$0xff] %vm3223_vm1, %v3628_v11 }
 0x41f   : > { %v3630_v17 = vpop.permute.xlu1 %3629  ;;  %3179 = vrot.lane.b32.xlu0 %v7937_v63, %s5433_s29  ;;  %v3843_v63 = vld [vmem:[#allocation5 + $0x198] sm:$0xff] }
 0x420   : > { %3708 = vst.msk [vmem:[#allocation5 + $0x1a0] sm:$0xff] %vm3223_vm1, %v3630_v17  ;;  %v3912_v54 = vpack.c.bf16 %v3843_v63, %v3840_v51 }
 0x421   : > { %3181 = vrot.lane.b32.xlu1 %v7946_v43, %s5433_s29  ;;  %v3368_v32 = vpop.permute.xlu0 %3367 }
 0x422   : > { %3445 = vst.msk [vmem:[#allocation5 + $0x1b8] sm:$0xff] %vm2883_vm15, %v3368_v32 }
 0x423   : > { %v3370_v44 = vpop.permute.xlu1 %3369  ;;  %3387 = vrot.lane.b32.xlu0 %v8042_v31, %s5432_s26 }
 0x424   : > { %3446 = vst.msk [vmem:[#allocation5 + $0x1d0] sm:$0xff] %vm2883_vm15, %v3370_v44 }
 0x425   : > { %3389 = vrot.lane.b32.xlu1 %v8045_v60, %s5432_s26  ;;  %v3498_v49 = vpop.permute.xlu0 %3497  ;;  %v3841_v43 = vld [vmem:[#allocation5 + $0x188] sm:$0xff] }
 0x426   : > { %3575 = vst.msk [vmem:[#allocation5 + $0x1b8] sm:$0xff] %vm3092_vm0, %v3498_v49  ;;  %v3591_v49 = vrot.slane %v7894_v62, 1 }
 0x427   : > { %v3500_v46 = vpop.permute.xlu1 %3499  ;;  %2843 = vrot.lane.b32.xlu0 %v7964_v34, %s5432_s26  ;;  %v3844_v38 = vld [vmem:[#allocation5 + $0x1a0] sm:$0xff] }
 0x428   : > { %3576 = vst.msk [vmem:[#allocation5 + $0x1d0] sm:$0xff] %vm3092_vm0, %v3500_v46  ;;  %v3913_v50 = vpack.c.bf16 %v3844_v38, %v3841_v43 }
 0x429   : > { %2845 = vrot.lane.b32.xlu1 %v7967_v57, %s5432_s26  ;;  %v3033_v29 = vpop.permute.xlu0 %3032 }
 0x42a   : > { %3111 = vst.msk [vmem:[#allocation5 + $0x1b0] sm:$0xff] %vm3092_vm0, %v3033_v29  ;;  %4231 = vmatprep.mubr.bf16.mxu0 %v3913_v50 }
 0x42b   : > { %v3035_v26 = vpop.permute.xlu1 %3034  ;;  %3517 = vrot.lane.b32.xlu0 %v8108_v56, %s5437_s19  ;;  %4232 = vmatmul.mubr.bf16.gmra.mrb[48].mxu0 %v3912_v54  ;;  %v5416_v54 = vld [vmem:[%s8562_s7] sm:$0xff]  }
 0x42c   : > { %3112 = vst.msk [vmem:[#allocation5 + $0x1c8] sm:$0xff] %vm3092_vm0, %v3035_v26  ;;  %5322 = vmatprep.subr.bf16.mxu0 %v5416_v54 }
 0x42d   : > { %3519 = vrot.lane.b32.xlu1 %v8115_v58, %s5437_s19  ;;  %v3632_v34 = vpop.permute.xlu0 %3631  ;;  %5323 = vmatpush3.bf16.msra.mxu0 %v5416_v54 }
 0x42e   : > { %3709 = vst.msk [vmem:[#allocation5 + $0x1b8] sm:$0xff] %vm3223_vm1, %v3632_v34 }
 0x42f   : > { %v3634_v13 = vpop.permute.xlu1 %3633  ;;  %3052 = vrot.lane.b32.xlu0 %v7958_v2, %s5437_s19 }
 0x430   : > { %3710 = vst.msk [vmem:[#allocation5 + $0x1d0] sm:$0xff] %vm3223_vm1, %v3634_v13  ;;  %v5102_v2 = vpop.f32.mrb[16].mxu0 }
 0x431   : > { %3054 = vrot.lane.b32.xlu1 %v7961_v39, %s5437_s19  ;;  %v3164_v57 = vpop.permute.xlu0 %3163  ;;  %v8208_v39 = vld [vmem:[%s8561_s6] ss:$0 sm:$0xff]  ;;  %v5103_v42 = vpop.f32.mrb[17].mxu0 }
 0x432   : > { %3242 = vst.msk [vmem:[#allocation5 + $0x1b0] sm:$0xff] %vm3223_vm1, %v3164_v57  ;;  %v5104_v24 = vadd.f32 %v5103_v42, %v5102_v2  ;;  %v5105_v7 = vpop.f32.mrb[18].mxu0 }
 0x433   : > { %v3166_v53 = vpop.permute.xlu1 %3165  ;;  %3651 = vrot.lane.b32.xlu0 %v8132_v20, %s5433_s29  ;;  %v5106_v23 = vpop.f32.mrb[19].mxu0 }
 0x434   : > { %3243 = vst.msk [vmem:[#allocation5 + $0x1c8] sm:$0xff] %vm3223_vm1, %v3166_v53  ;;  %v4170_v5 = vadd.f32 %v5104_v24, %v8208_v39  ;;  %v5107_v19 = vadd.f32 %v5106_v23, %v5105_v7  ;;  %v5417_v53 = vld [vmem:[%s8562_s7 + $0x8] sm:$0xff]  }
 0x435   : > { %3653 = vrot.lane.b32.xlu1 %v8135_v3, %s5433_s29  ;;  %v3372_v15 = vpop.permute.xlu0 %3371  ;;  %v3847_v41 = vld [vmem:[#allocation5 + $0x1b8] sm:$0xff]  ;;  %5324 = vmatprep.subr.bf16.mxu0 %v5417_v53 }
 0x436   : > { %3447 = vst.msk [vmem:[#allocation5 + $0x1e8] sm:$0xff] %vm2883_vm15, %v3372_v15  ;;  %v4331_v33 = vadd.f32 %v8096_v12, %v4170_v5  ;;  %v4173_v47 = vadd.f32 %v5107_v19, %v8208_v39  ;;  %5325 = vmatpush3.bf16.msra.mxu0 %v5417_v53 }
 0x437   : > { %v3374_v8 = vpop.permute.xlu1 %3373  ;;  %3183 = vrot.lane.b32.xlu0 %v8020_v9, %s5433_s29  ;;  %v3850_v35 = vld [vmem:[#allocation5 + $0x1d0] sm:$0xff]  ;;  %v8213_v59 = vpop.f32.mrb[88].mxu1 }
 0x438   : > { %3448 = vst.msk [vmem:[#allocation5 + $0x200] sm:$0xff] %vm2883_vm15, %v3374_v8  ;;  %v3916_v20 = vpack.c.bf16 %v3850_v35, %v3847_v41  ;;  %v8215_v3 = vpop.f32.mrb[89].mxu1  ;;  %v4334_v11 = vadd.f32 %v8105_v48, %v4173_v47  ;;  %v4457_v12 = vmax.f32 %v4331_v33, 0.0 }
 0x439   : > { %3185 = vrot.lane.b32.xlu1 %v8027_v10, %s5433_s29  ;;  %v8220_v36 = vpop.f32.mrb[90].mxu1  ;;  %v2828_v9 = vpop.permute.xlu0 %2827  ;;  %v3846_v40 = vld [vmem:[#allocation5 + $0x1b0] sm:$0xff]  ;;  %v3887_v10 = vld [vmem:[#allocation5 + $0x2f8] sm:$0xff] }
 0x43a   : > { %4239 = vmatprep.mubr.bf16.mxu0 %v3916_v20  ;;  %2904 = vst.msk [vmem:[#allocation5 + $0x1e0] sm:$0xff] %vm2883_vm15, %v2828_v9  ;;  %v8223_v28 = vpop.f32.mrb[91].mxu1  ;;  %v3935_v18 = vpack.c.bf16 %v3887_v10, %v3884_v52  ;;  %v4458_v32 = vmax.f32 %v4334_v11, 0.0 }
 0x43b   : > { %v2830_v0 = vpop.permute.xlu1 %2829  ;;  %3391 = vrot.lane.b32.xlu0 %v8129_v21, %s5432_s26  ;;  %v3849_v1 = vld [vmem:[#allocation5 + $0x1c8] sm:$0xff] }
 0x43c   : > { %2905 = vst.msk [vmem:[#allocation5 + $0x1f8] sm:$0xff] %vm2883_vm15, %v2830_v0  ;;  %v3915_v30 = vpack.c.bf16 %v3849_v1, %v3846_v40  ;;  %5319 = vmatmul.mubr.msk.bf16.gmra.mrb[108].mxu1 %vm2484_vm13, %v3935_v18 }
 0x43d   : > { %3393 = vrot.lane.b32.xlu1 %v8138_v55, %s5432_s26  ;;  %v3502_v17 = vpop.permute.xlu0 %3501  ;;  %v8240_v55 = vpack.c.bf16 %v4458_v32, %v4457_v12 }
 0x43e   : > { %4240 = vmatmul.mubr.bf16.gmra.mrb[52].mxu0 %v3915_v30  ;;  %3577 = vst.msk [vmem:[#allocation5 + $0x1e8] sm:$0xff] %vm3092_vm0, %v3502_v17 }
 0x43f   : > { %v3504_v21 = vpop.permute.xlu1 %3503  ;;  %2847 = vrot.lane.b32.xlu0 %v8048_v16, %s5432_s26  ;;  %v3590_v16 = vrot.slane %v7892_v22, 1 }
 0x440   : > { %3578 = vst.msk [vmem:[#allocation5 + $0x200] sm:$0xff] %vm3092_vm0, %v3504_v21 }
 0x441   : > { %2849 = vrot.lane.b32.xlu1 %v8051_v6, %s5432_s26  ;;  %v3037_v48 = vpop.permute.xlu0 %3036  ;;  %v3593_v6 = vrot.slane %v7914_v37, 1  ;;  %v3592_v43 = vsel %vm913_vm4, %v3590_v16, %v3591_v49 }
 0x442   : > { %3113 = vst.msk [vmem:[#allocation5 + $0x1e0] sm:$0xff] %vm3092_vm0, %v3037_v48 }
 0x443   : > { %v3039_v44 = vpop.permute.xlu1 %3038  ;;  %3521 = vrot.lane.b32.xlu0 %v7892_v22, %s5437_s19 }
 0x444   : > { %3114 = vst.msk [vmem:[#allocation5 + $0x1f8] sm:$0xff] %vm3092_vm0, %v3039_v44 }
 0x445   : > { %3523 = vrot.lane.b32.xlu1 %v7894_v62, %s5437_s19  ;;  %v3636_v63 = vpop.permute.xlu0 %3635  ;;  %v3594_v62 = vsel %vm913_vm4, %v3591_v49, %v3593_v6 }
 0x446   : > { %3711 = vst.msk [vmem:[#allocation5 + $0x1e8] sm:$0xff] %vm3223_vm1, %v3636_v63 }
 0x447   : > { %v3638_v46 = vpop.permute.xlu1 %3637  ;;  %3056 = vrot.lane.b32.xlu0 %v8042_v31, %s5437_s19 }
 0x448   : > { %3712 = vst.msk [vmem:[#allocation5 + $0x200] sm:$0xff] %vm3223_vm1, %v3638_v46 }
 0x449   : > { %3058 = vrot.lane.b32.xlu1 %v8045_v60, %s5437_s19  ;;  %v3168_v22 = vpop.permute.xlu0 %3167  ;;  %v8258_v38 = vpop.f32.mrb[92].mxu1 }
 0x44a   : > { %3244 = vst.msk [vmem:[#allocation5 + $0x1e0] sm:$0xff] %vm3223_vm1, %v3168_v22  ;;  %v8262_v50 = vpop.f32.mrb[93].mxu1  ;;  %v5108_v29 = vpop.f32.mrb[20].mxu0 }
 0x44b   : > { %v3170_v37 = vpop.permute.xlu1 %3169  ;;  %3655 = vrot.lane.b32.xlu0 %v3592_v43, %s5433_s29  ;;  %v8266_v31 = vpop.f32.mrb[94].mxu1 }
 0x44c   : > { %3245 = vst.msk [vmem:[#allocation5 + $0x1f8] sm:$0xff] %vm3223_vm1, %v3170_v37  ;;  %v8269_v51 = vpop.f32.mrb[95].mxu1  ;;  %v5109_v34 = vpop.f32.mrb[21].mxu0 }
 0x44d   : > { %3657 = vrot.lane.b32.xlu1 %v3594_v62, %s5433_s29  ;;  %v3376_v60 = vpop.permute.xlu0 %3375  ;;  %v3853_v13 = vld [vmem:[#allocation5 + $0x1e8] sm:$0xff]  ;;  %v5110_v15 = vadd.f32 %v5109_v34, %v5108_v29  ;;  %v5111_v2 = vpop.f32.mrb[22].mxu0 }
 0x44e   : > { %3449 = vst.msk [vmem:[#allocation5 + $0x218] sm:$0xff] %vm2883_vm15, %v3376_v60  ;;  %v5112_v42 = vpop.f32.mrb[23].mxu0 }
 0x44f   : > { %v3378_v26 = vpop.permute.xlu1 %3377  ;;  %3187 = vrot.lane.b32.xlu0 %v8108_v56, %s5433_s29  ;;  %v3856_v57 = vld [vmem:[#allocation5 + $0x200] sm:$0xff]  ;;  %v4178_v56 = vadd.f32 %v5110_v15, %v8208_v39  ;;  %v5113_v35 = vadd.f32 %v5112_v42, %v5111_v2 }
 0x450   : > { %3450 = vst.msk [vmem:[#allocation5 + $0x230] sm:$0xff] %vm2883_vm15, %v3378_v26  ;;  %v3919_v8 = vpack.c.bf16 %v3856_v57, %v3853_v13 }
 0x451   : > { %3189 = vrot.lane.b32.xlu1 %v8115_v58, %s5433_s29  ;;  %v2832_v41 = vpop.permute.xlu0 %2831  ;;  %v3852_v7 = vld [vmem:[#allocation5 + $0x1e0] sm:$0xff]  ;;  %v4339_v23 = vadd.f32 %v8094_v61, %v4178_v56  ;;  %v4181_v5 = vadd.f32 %v5113_v35, %v8208_v39 }
 0x452   : > { %4247 = vmatprep.mubr.bf16.mxu0 %v3919_v8  ;;  %2906 = vst.msk [vmem:[#allocation5 + $0x210] sm:$0xff] %vm2883_vm15, %v2832_v41 }
 0x453   : > { %v2834_v24 = vpop.permute.xlu1 %2833  ;;  %v3855_v20 = vld [vmem:[#allocation5 + $0x1f8] sm:$0xff]  ;;  %v4342_v19 = vadd.f32 %v8101_v45, %v4181_v5  ;;  %v4459_v0 = vmax.f32 %v4339_v23, 0.0 }
 0x454   : > { %2907 = vst.msk [vmem:[#allocation5 + $0x228] sm:$0xff] %vm2883_vm15, %v2834_v24  ;;  %v3918_v58 = vpack.c.bf16 %v3855_v20, %v3852_v7 }
 0x455   : > { %v3506_v9 = vpop.permute.xlu0 %3505  ;;  %v4460_v1 = vmax.f32 %v4342_v19, 0.0 }
 0x456   : > { %4248 = vmatmul.mubr.bf16.gmra.mrb[56].mxu0 %v3918_v58  ;;  %3579 = vst.msk [vmem:[#allocation5 + $0x218] sm:$0xff] %vm3092_vm0, %v3506_v9 }
 0x457   : > { %v3508_v40 = vpop.permute.xlu1 %3507  ;;  %v8291_v52 = vpack.c.bf16 %v4460_v1, %v4459_v0 }
 0x458   : > { %3580 = vst.msk [vmem:[#allocation5 + $0x230] sm:$0xff] %vm3092_vm0, %v3508_v40 }
 0x459   : > { %v3041_v61 = vpop.permute.xlu0 %3040 }
 0x45a   : > { %3115 = vst.msk [vmem:[#allocation5 + $0x210] sm:$0xff] %vm3092_vm0, %v3041_v61 }
 0x45b   : > { %v3043_v10 = vpop.permute.xlu1 %3042 }
 0x45c   : > { %3116 = vst.msk [vmem:[#allocation5 + $0x228] sm:$0xff] %vm3092_vm0, %v3043_v10 }
 0x45d   : > { %v3640_v33 = vpop.permute.xlu0 %3639 }
 0x45e   : > { %3713 = vst.msk [vmem:[#allocation5 + $0x218] sm:$0xff] %vm3223_vm1, %v3640_v33 }
 0x45f   : > { %v3642_v45 = vpop.permute.xlu1 %3641 }
 0x460   : > { %3714 = vst.msk [vmem:[#allocation5 + $0x230] sm:$0xff] %vm3223_vm1, %v3642_v45 }
 0x461   : > { %v3172_v47 = vpop.permute.xlu0 %3171  ;;  %v8299_v18 = vpop.f32.mrb[96].mxu1 }
 0x462   : > { %3246 = vst.msk [vmem:[#allocation5 + $0x210] sm:$0xff] %vm3223_vm1, %v3172_v47  ;;  %v8301_v17 = vpop.f32.mrb[97].mxu1 }
 0x463   : > { %v3174_v30 = vpop.permute.xlu1 %3173  ;;  %v8304_v12 = vpop.f32.mrb[98].mxu1 }
 0x464   : > { %3247 = vst.msk [vmem:[#allocation5 + $0x228] sm:$0xff] %vm3223_vm1, %v3174_v30  ;;  %v8307_v44 = vpop.f32.mrb[99].mxu1 }
 0x465   : > { %v3380_v11 = vpop.permute.xlu0 %3379  ;;  %v3859_v32 = vld [vmem:[#allocation5 + $0x218] sm:$0xff] }
 0x466   : > { %3451 = vst.msk [vmem:[#allocation5 + $0x248] sm:$0xff] %vm2883_vm15, %v3380_v11 }
 0x467   : > { %v3382_v21 = vpop.permute.xlu1 %3381  ;;  %v3862_v48 = vld [vmem:[#allocation5 + $0x230] sm:$0xff] }
 0x468   : > { %3452 = vst.msk [vmem:[#allocation5 + $0x260] sm:$0xff] %vm2883_vm15, %v3382_v21  ;;  %v3922_v16 = vpack.c.bf16 %v3862_v48, %v3859_v32  ;;  %v5114_v62 = vpop.f32.mrb[24].mxu0 }
 0x469   : > { %v2836_v49 = vpop.permute.xlu0 %2835  ;;  %v3858_v6 = vld [vmem:[#allocation5 + $0x210] sm:$0xff]  ;;  %v5115_v60 = vpop.f32.mrb[25].mxu0 }
 0x46a   : > { %4255 = vmatprep.mubr.bf16.mxu0 %v3922_v16  ;;  %2908 = vst.msk [vmem:[#allocation5 + $0x240] sm:$0xff] %vm2883_vm15, %v2836_v49  ;;  %v5116_v29 = vadd.f32 %v5115_v60, %v5114_v62  ;;  %v5117_v54 = vpop.f32.mrb[26].mxu0 }
 0x46b   : > { %v2838_v63 = vpop.permute.xlu1 %2837  ;;  %v3861_v46 = vld [vmem:[#allocation5 + $0x228] sm:$0xff]  ;;  %v5118_v26 = vpop.f32.mrb[27].mxu0 }
 0x46c   : > { %2909 = vst.msk [vmem:[#allocation5 + $0x258] sm:$0xff] %vm2883_vm15, %v2838_v63  ;;  %v3921_v43 = vpack.c.bf16 %v3861_v46, %v3858_v6  ;;  %v4186_v34 = vadd.f32 %v5116_v29, %v8208_v39  ;;  %v5119_v57 = vadd.f32 %v5118_v26, %v5117_v54 }
 0x46d   : > { %v3510_v22 = vpop.permute.xlu0 %3509 }
 0x46e   : > { %4256 = vmatmul.mubr.bf16.gmra.mrb[60].mxu0 %v3921_v43  ;;  %3581 = vst.msk [vmem:[#allocation5 + $0x248] sm:$0xff] %vm3092_vm0, %v3510_v22  ;;  %v4347_v15 = vadd.f32 %v8124_v27, %v4186_v34  ;;  %v4189_v2 = vadd.f32 %v5119_v57, %v8208_v39 }
 0x46f   : > { %v3512_v37 = vpop.permute.xlu1 %3511 }
 0x470   : > { %3582 = vst.msk [vmem:[#allocation5 + $0x260] sm:$0xff] %vm3092_vm0, %v3512_v37  ;;  %v4350_v8 = vadd.f32 %v8153_v4, %v4189_v2  ;;  %v4461_v41 = vmax.f32 %v4347_v15, 0.0 }
 0x471   : > { %v3045_v13 = vpop.permute.xlu0 %3044 }
 0x472   : > { %3117 = vst.msk [vmem:[#allocation5 + $0x240] sm:$0xff] %vm3092_vm0, %v3045_v13  ;;  %v4462_v35 = vmax.f32 %v4350_v8, 0.0 }
 0x473   : > { %v3047_v53 = vpop.permute.xlu1 %3046 }
 0x474   : > { %3118 = vst.msk [vmem:[#allocation5 + $0x258] sm:$0xff] %vm3092_vm0, %v3047_v53  ;;  %v8321_v24 = vpack.c.bf16 %v4462_v35, %v4461_v41 }
 0x475   : > { %v3644_v42 = vpop.permute.xlu0 %3643 }
 0x476   : > { %3715 = vst.msk [vmem:[#allocation5 + $0x248] sm:$0xff] %vm3223_vm1, %v3644_v42 }
 0x477   : > { %v3646_v56 = vpop.permute.xlu1 %3645 }
 0x478   : > { %3716 = vst.msk [vmem:[#allocation5 + $0x260] sm:$0xff] %vm3223_vm1, %v3646_v56 }
 0x479   : > { %v3176_v7 = vpop.permute.xlu0 %3175 }
 0x47a   : > { %3248 = vst.msk [vmem:[#allocation5 + $0x240] sm:$0xff] %vm3223_vm1, %v3176_v7 }
 0x47b   : > { %v3178_v27 = vpop.permute.xlu1 %3177 }
 0x47c   : > { %3249 = vst.msk [vmem:[#allocation5 + $0x258] sm:$0xff] %vm3223_vm1, %v3178_v27 }
 0x47d   : > { %v3384_v20 = vpop.permute.xlu0 %3383  ;;  %v3865_v23 = vld [vmem:[#allocation5 + $0x248] sm:$0xff] }
 0x47e   : > { %3453 = vst.msk [vmem:[#allocation5 + $0x278] sm:$0xff] %vm2883_vm15, %v3384_v20 }
 0x47f   : > { %v3386_v4 = vpop.permute.xlu1 %3385  ;;  %v3868_v5 = vld [vmem:[#allocation5 + $0x260] sm:$0xff] }
 0x480   : > { %3454 = vst.msk [vmem:[#allocation5 + $0x290] sm:$0xff] %vm2883_vm15, %v3386_v4  ;;  %v3925_v58 = vpack.c.bf16 %v3868_v5, %v3865_v23 }
 0x481   : > { %v2840_v19 = vpop.permute.xlu0 %2839  ;;  %v3864_v40 = vld [vmem:[#allocation5 + $0x240] sm:$0xff] }
 0x482   : > { %4263 = vmatprep.mubr.bf16.mxu0 %v3925_v58  ;;  %2910 = vst.msk [vmem:[#allocation5 + $0x270] sm:$0xff] %vm2883_vm15, %v2840_v19  ;;  %v5120_v10 = vpop.f32.mrb[28].mxu0 }
 0x483   : > { %v2842_v9 = vpop.permute.xlu1 %2841  ;;  %v3867_v0 = vld [vmem:[#allocation5 + $0x258] sm:$0xff]  ;;  %v5121_v45 = vpop.f32.mrb[29].mxu0 }
 0x484   : > { %2911 = vst.msk [vmem:[#allocation5 + $0x288] sm:$0xff] %vm2883_vm15, %v2842_v9  ;;  %v3924_v1 = vpack.c.bf16 %v3867_v0, %v3864_v40  ;;  %v5122_v47 = vadd.f32 %v5121_v45, %v5120_v10  ;;  %v5123_v30 = vpop.f32.mrb[30].mxu0 }
 0x485   : > { %v3514_v61 = vpop.permute.xlu0 %3513  ;;  %v5124_v11 = vpop.f32.mrb[31].mxu0 }
 0x486   : > { %4264 = vmatmul.mubr.bf16.gmra.mrb[64].mxu0 %v3924_v1  ;;  %3583 = vst.msk [vmem:[#allocation5 + $0x278] sm:$0xff] %vm3092_vm0, %v3514_v61  ;;  %v4194_v21 = vadd.f32 %v5122_v47, %v8208_v39  ;;  %v5125_v48 = vadd.f32 %v5124_v11, %v5123_v30 }
 0x487   : > { %v3516_v33 = vpop.permute.xlu1 %3515 }
 0x488   : > { %3584 = vst.msk [vmem:[#allocation5 + $0x290] sm:$0xff] %vm3092_vm0, %v3516_v33  ;;  %v4355_v49 = vadd.f32 %v8122_v25, %v4194_v21  ;;  %v4197_v63 = vadd.f32 %v5125_v48, %v8208_v39 }
 0x489   : > { %v3049_v32 = vpop.permute.xlu0 %3048 }
 0x48a   : > { %3119 = vst.msk [vmem:[#allocation5 + $0x270] sm:$0xff] %vm3092_vm0, %v3049_v32  ;;  %v4358_v6 = vadd.f32 %v8141_v14, %v4197_v63  ;;  %v4463_v22 = vmax.f32 %v4355_v49, 0.0 }
 0x48b   : > { %v3051_v16 = vpop.permute.xlu1 %3050 }
 0x48c   : > { %3120 = vst.msk [vmem:[#allocation5 + $0x288] sm:$0xff] %vm3092_vm0, %v3051_v16  ;;  %v4464_v62 = vmax.f32 %v4358_v6, 0.0 }
 0x48d   : > { %v3648_v46 = vpop.permute.xlu0 %3647 }
 0x48e   : > { %3717 = vst.msk [vmem:[#allocation5 + $0x278] sm:$0xff] %vm3223_vm1, %v3648_v46  ;;  %v8339_v37 = vpack.c.bf16 %v4464_v62, %v4463_v22 }
 0x48f   : > { %v3650_v43 = vpop.permute.xlu1 %3649 }
 0x490   : > { %3718 = vst.msk [vmem:[#allocation5 + $0x290] sm:$0xff] %vm3223_vm1, %v3650_v43 }
 0x491   : > { %v3180_v60 = vpop.permute.xlu0 %3179 }
 0x492   : > { %3250 = vst.msk [vmem:[#allocation5 + $0x270] sm:$0xff] %vm3223_vm1, %v3180_v60 }
 0x493   : > { %v3182_v25 = vpop.permute.xlu1 %3181 }
 0x494   : > { %3251 = vst.msk [vmem:[#allocation5 + $0x288] sm:$0xff] %vm3223_vm1, %v3182_v25 }
 0x495   : > { %v3388_v29 = vpop.permute.xlu0 %3387  ;;  %v3871_v54 = vld [vmem:[#allocation5 + $0x278] sm:$0xff] }
 0x496   : > { %3455 = vst.msk [vmem:[#allocation5 + $0x2a8] sm:$0xff] %vm2883_vm15, %v3388_v29 }
 0x497   : > { %v3390_v14 = vpop.permute.xlu1 %3389  ;;  %v3874_v26 = vld [vmem:[#allocation5 + $0x290] sm:$0xff] }
 0x498   : > { %3456 = vst.msk [vmem:[#allocation5 + $0x2c0] sm:$0xff] %vm2883_vm15, %v3390_v14  ;;  %v3928_v34 = vpack.c.bf16 %v3874_v26, %v3871_v54 }
 0x499   : > { %v2844_v13 = vpop.permute.xlu0 %2843  ;;  %v3870_v53 = vld [vmem:[#allocation5 + $0x270] sm:$0xff]  ;;  %v8347_v8 = vpop.f32.mrb[100].mxu1 }
 0x49a   : > { %4271 = vmatprep.mubr.bf16.mxu0 %v3928_v34  ;;  %2912 = vst.msk [vmem:[#allocation5 + $0x2a0] sm:$0xff] %vm2883_vm15, %v2844_v13  ;;  %v8349_v56 = vpop.f32.mrb[101].mxu1 }
 0x49b   : > { %v2846_v57 = vpop.permute.xlu1 %2845  ;;  %v3873_v15 = vld [vmem:[#allocation5 + $0x288] sm:$0xff]  ;;  %v8352_v35 = vpop.f32.mrb[102].mxu1 }
 0x49c   : > { %2913 = vst.msk [vmem:[#allocation5 + $0x2b8] sm:$0xff] %vm2883_vm15, %v2846_v57  ;;  %v3927_v2 = vpack.c.bf16 %v3873_v15, %v3870_v53  ;;  %v8355_v7 = vpop.f32.mrb[103].mxu1 }
 0x49d   : > { %v3518_v42 = vpop.permute.xlu0 %3517 }
 0x49e   : > { %4272 = vmatmul.mubr.bf16.gmra.mrb[68].mxu0 %v3927_v2  ;;  %3585 = vst.msk [vmem:[#allocation5 + $0x2a8] sm:$0xff] %vm3092_vm0, %v3518_v42 }
 0x49f   : > { %v3520_v41 = vpop.permute.xlu1 %3519 }
 0x4a0   : > { %3586 = vst.msk [vmem:[#allocation5 + $0x2c0] sm:$0xff] %vm3092_vm0, %v3520_v41 }
 0x4a1   : > { %v3053_v27 = vpop.permute.xlu0 %3052 }
 0x4a2   : > { %3121 = vst.msk [vmem:[#allocation5 + $0x2a0] sm:$0xff] %vm3092_vm0, %v3053_v27 }
 0x4a3   : > { %v3055_v20 = vpop.permute.xlu1 %3054 }
 0x4a4   : > { %3122 = vst.msk [vmem:[#allocation5 + $0x2b8] sm:$0xff] %vm3092_vm0, %v3055_v20 }
 0x4a5   : > { %v3652_v4 = vpop.permute.xlu0 %3651 }
 0x4a6   : > { %v5126_v23 = vpop.f32.mrb[32].mxu0  ;;  %3719 = vst.msk [vmem:[#allocation5 + $0x2a8] sm:$0xff] %vm3223_vm1, %v3652_v4 }
 0x4a7   : > { %v3654_v5 = vpop.permute.xlu1 %3653  ;;  %v5127_v58 = vpop.f32.mrb[33].mxu0 }
 0x4a8   : > { %3720 = vst.msk [vmem:[#allocation5 + $0x2c0] sm:$0xff] %vm3223_vm1, %v3654_v5  ;;  %v5128_v19 = vadd.f32 %v5127_v58, %v5126_v23  ;;  %v5129_v9 = vpop.f32.mrb[34].mxu0 }
 0x4a9   : > { %v5130_v40 = vpop.f32.mrb[35].mxu0  ;;  %v3184_v1 = vpop.permute.xlu0 %3183 }
 0x4aa   : > { %v4202_v0 = vadd.f32 %v5128_v19, %v8208_v39  ;;  %v5131_v61 = vadd.f32 %v5130_v40, %v5129_v9  ;;  %3252 = vst.msk [vmem:[#allocation5 + $0x2a0] sm:$0xff] %vm3223_vm1, %v3184_v1 }
 0x4ab   : > { %v3186_v10 = vpop.permute.xlu1 %3185 }
 0x4ac   : > { %v4363_v33 = vadd.f32 %v8215_v3, %v4202_v0  ;;  %v4205_v45 = vadd.f32 %v5131_v61, %v8208_v39  ;;  %3253 = vst.msk [vmem:[#allocation5 + $0x2b8] sm:$0xff] %vm3223_vm1, %v3186_v10 }
 0x4ad   : > { %v3392_v30 = vpop.permute.xlu0 %3391  ;;  %v3877_v21 = vld [vmem:[#allocation5 + $0x2a8] sm:$0xff] }
 0x4ae   : > { %v4366_v47 = vadd.f32 %v8223_v28, %v4205_v45  ;;  %3457 = vst.msk [vmem:[#allocation5 + $0x2d8] sm:$0xff] %vm2883_vm15, %v3392_v30  ;;  %v4465_v48 = vmax.f32 %v4363_v33, 0.0 }
 0x4af   : > { %v3394_v11 = vpop.permute.xlu1 %3393  ;;  %v3880_v32 = vld [vmem:[#allocation5 + $0x2c0] sm:$0xff] }
 0x4b0   : > { %v4466_v16 = vmax.f32 %v4366_v47, 0.0  ;;  %3458 = vst.msk [vmem:[#allocation5 + $0x2f0] sm:$0xff] %vm2883_vm15, %v3394_v11  ;;  %v3931_v49 = vpack.c.bf16 %v3880_v32, %v3877_v21 }
 0x4b1   : > { %v2848_v3 = vpop.permute.xlu0 %2847  ;;  %v3876_v46 = vld [vmem:[#allocation5 + $0x2a0] sm:$0xff] }
 0x4b2   : > { %v8369_v63 = vpack.c.bf16 %v4466_v16, %v4465_v48  ;;  %4279 = vmatprep.mubr.bf16.mxu0 %v3931_v49  ;;  %2914 = vst.msk [vmem:[#allocation5 + $0x2d0] sm:$0xff] %vm2883_vm15, %v2848_v3 }
 0x4b3   : > { %v2850_v6 = vpop.permute.xlu1 %2849  ;;  %v3879_v28 = vld [vmem:[#allocation5 + $0x2b8] sm:$0xff] }
 0x4b4   : > { %2915 = vst.msk [vmem:[#allocation5 + $0x2e8] sm:$0xff] %vm2883_vm15, %v2850_v6  ;;  %v3930_v43 = vpack.c.bf16 %v3879_v28, %v3876_v46 }
 0x4b5   : > { %v3522_v22 = vpop.permute.xlu0 %3521 }
 0x4b6   : > { %4280 = vmatmul.mubr.bf16.gmra.mrb[72].mxu0 %v3930_v43  ;;  %3587 = vst.msk [vmem:[#allocation5 + $0x2d8] sm:$0xff] %vm3092_vm0, %v3522_v22 }
 0x4b7   : > { %v3524_v62 = vpop.permute.xlu1 %3523 }
 0x4b8   : > { %3588 = vst.msk [vmem:[#allocation5 + $0x2f0] sm:$0xff] %vm3092_vm0, %v3524_v62 }
 0x4b9   : > { %v3057_v60 = vpop.permute.xlu0 %3056 }
 0x4ba   : > { %3123 = vst.msk [vmem:[#allocation5 + $0x2d0] sm:$0xff] %vm3092_vm0, %v3057_v60 }
 0x4bb   : > { %v3059_v25 = vpop.permute.xlu1 %3058 }
 0x4bc   : > { %3124 = vst.msk [vmem:[#allocation5 + $0x2e8] sm:$0xff] %vm3092_vm0, %v3059_v25 }
 0x4bd   : > { %v3656_v29 = vpop.permute.xlu0 %3655 }
 0x4be   : > { %v5132_v14 = vpop.f32.mrb[36].mxu0  ;;  %3721 = vst.msk [vmem:[#allocation5 + $0x2d8] sm:$0xff] %vm3223_vm1, %v3656_v29 }
 0x4bf   : > { %v3658_v54 = vpop.permute.xlu1 %3657  ;;  %v5133_v26 = vpop.f32.mrb[37].mxu0 }
 0x4c0   : > { %3722 = vst.msk [vmem:[#allocation5 + $0x2f0] sm:$0xff] %vm3223_vm1, %v3658_v54  ;;  %v5134_v34 = vadd.f32 %v5133_v26, %v5132_v14  ;;  %v5135_v13 = vpop.f32.mrb[38].mxu0 }
 0x4c1   : > { %v5136_v57 = vpop.f32.mrb[39].mxu0  ;;  %v3188_v15 = vpop.permute.xlu0 %3187 }
 0x4c2   : > { %v4210_v53 = vadd.f32 %v5134_v34, %v8208_v39  ;;  %v5137_v2 = vadd.f32 %v5136_v57, %v5135_v13  ;;  %3254 = vst.msk [vmem:[#allocation5 + $0x2d0] sm:$0xff] %vm3223_vm1, %v3188_v15 }
 0x4c3   : > { %v3190_v42 = vpop.permute.xlu1 %3189 }
 0x4c4   : > { %v4371_v41 = vadd.f32 %v8213_v59, %v4210_v53  ;;  %v4213_v27 = vadd.f32 %v5137_v2, %v8208_v39  ;;  %3255 = vst.msk [vmem:[#allocation5 + $0x2e8] sm:$0xff] %vm3223_vm1, %v3190_v42 }
 0x4c5   : > { %v3883_v4 = vld [vmem:[#allocation5 + $0x2d8] sm:$0xff] }
 0x4c6   : > { %v4374_v20 = vadd.f32 %v8220_v36, %v4213_v27  ;;  %v4467_v5 = vmax.f32 %v4371_v41, 0.0 }
 0x4c7   : > { %v3886_v23 = vld [vmem:[#allocation5 + $0x2f0] sm:$0xff] }
 0x4c8   : > { %v4468_v58 = vmax.f32 %v4374_v20, 0.0  ;;  %v3934_v19 = vpack.c.bf16 %v3886_v23, %v3883_v4 }
 0x4c9   : > { %v3882_v40 = vld [vmem:[#allocation5 + $0x2d0] sm:$0xff] }
 0x4ca   : > { %v4494_v9 = vpack.c.bf16 %v4468_v58, %v4467_v5  ;;  %4287 = vmatprep.mubr.bf16.mxu0 %v3934_v19 }
 0x4cb   : > { %v3885_v0 = vld [vmem:[#allocation5 + $0x2e8] sm:$0xff] }
 0x4cc   : > { %v3933_v1 = vpack.c.bf16 %v3885_v0, %v3882_v40 }
 0x4ce   : > { %4288 = vmatmul.mubr.bf16.gmra.mrb[76].mxu0 %v3933_v1 }
 0x4cf   : > { %5326 = vmatprep.mubr.msk.bf16.mxu0 %vm2484_vm13, %v8240_v55 }
 0x4d2   : > { %v8387_v59 = vpop.f32.mrb[104].mxu1 }
 0x4d3   : > { %v8389_v10 = vpop.f32.mrb[105].mxu1 }
 0x4d4   : > { %v8393_v33 = vpop.f32.mrb[106].mxu1 }
 0x4d5   : > { %v8397_v30 = vpop.f32.mrb[107].mxu1 }
 0x4d6   : > { %v5138_v61 = vpop.f32.mrb[40].mxu0  ;;  %5327 = vmatmul.mubr.msk.bf16.vlgmr.msra.gmra.mrb[80].mxu0 %vm2484_vm13, %v8291_v52 }
 0x4d7   : > { %v5139_v36 = vpop.f32.mrb[41].mxu0  ;;  %5330 = vmatprep.mubr.msk.bf16.mxu0 %vm2484_vm13, %v8321_v24 }
 0x4d8   : > { %v5140_v45 = vadd.f32 %v5139_v36, %v5138_v61  ;;  %v5141_v47 = vpop.f32.mrb[42].mxu0 }
 0x4d9   : > { %v5142_v11 = vpop.f32.mrb[43].mxu0 }
 0x4da   : > { %v4218_v55 = vadd.f32 %v5140_v45, %v8208_v39  ;;  %v5143_v21 = vadd.f32 %v5142_v11, %v5141_v47 }
 0x4dc   : > { %v4379_v32 = vadd.f32 %v8262_v50, %v4218_v55  ;;  %v4221_v48 = vadd.f32 %v5143_v21, %v8208_v39 }
 0x4de   : > { %v4382_v52 = vadd.f32 %v8269_v51, %v4221_v48  ;;  %5331 = vmatmul.mubr.msk.bf16.gmra.mrb[84].mxu0 %vm2484_vm13, %v8339_v37  ;;  %v4469_v24 = vmax.f32 %v4379_v32, 0.0 }
 0x4df   : > { %5334 = vmatprep.mubr.msk.bf16.mxu0 %vm2484_vm13, %v8369_v63 }
 0x4e0   : > { %v4470_v16 = vmax.f32 %v4382_v52, 0.0 }
 0x4e2   : > { %v4495_v49 = vpack.c.bf16 %v4470_v16, %v4469_v24 }
 0x4e6   : > { %5335 = vmatmul.mubr.msk.bf16.gmra.mrb[88].mxu0 %vm2484_vm13, %v4494_v9 }
 0x4e7   : > { %5338 = vmatprep.mubr.msk.bf16.mxu0 %vm2484_vm13, %v4495_v49 }
 0x4ee   : > { %v5144_v3 = vpop.f32.mrb[44].mxu0 }
 0x4ef   : > { %v5145_v6 = vpop.f32.mrb[45].mxu0 }
 0x4f0   : > { %v5146_v50 = vadd.f32 %v5145_v6, %v5144_v3  ;;  %v5147_v46 = vpop.f32.mrb[46].mxu0 }
 0x4f1   : > { %v5148_v28 = vpop.f32.mrb[47].mxu0 }
 0x4f2   : > { %v4226_v51 = vadd.f32 %v5146_v50, %v8208_v39  ;;  %v5149_v43 = vadd.f32 %v5148_v28, %v5147_v46 }
 0x4f4   : > { %v4387_v37 = vadd.f32 %v8258_v38, %v4226_v51  ;;  %v4229_v22 = vadd.f32 %v5149_v43, %v8208_v39 }
 0x4f6   : > { %v4390_v63 = vadd.f32 %v8266_v31, %v4229_v22  ;;  %v4471_v62 = vmax.f32 %v4387_v37, 0.0 }
 0x4f8   : > { %v4472_v60 = vmax.f32 %v4390_v63, 0.0 }
 0x4fa   : > { %v4496_v25 = vpack.c.bf16 %v4472_v60, %v4471_v62 }
 0x4fc   : > { %5339 = vmatmul.mubr.msk.bf16.gmra.mrb[92].mxu0 %vm2484_vm13, %v4496_v25 }
 0x4fe   : > { %v5150_v29 = vpop.f32.mrb[48].mxu0 }
 0x4ff   : > { %v5151_v14 = vpop.f32.mrb[49].mxu0 }
 0x500   : > { %v5152_v54 = vadd.f32 %v5151_v14, %v5150_v29  ;;  %v5153_v26 = vpop.f32.mrb[50].mxu0 }
 0x501   : > { %v5154_v34 = vpop.f32.mrb[51].mxu0 }
 0x502   : > { %v4234_v13 = vadd.f32 %v5152_v54, %v8208_v39  ;;  %v5155_v57 = vadd.f32 %v5154_v34, %v5153_v26 }
 0x504   : > { %v4395_v53 = vadd.f32 %v8301_v17, %v4234_v13  ;;  %v4237_v38 = vadd.f32 %v5155_v57, %v8208_v39 }
 0x506   : > { %v4398_v15 = vadd.f32 %v8307_v44, %v4237_v38  ;;  %v4473_v31 = vmax.f32 %v4395_v53, 0.0 }
 0x508   : > { %v4474_v2 = vmax.f32 %v4398_v15, 0.0 }
 0x50a   : > { %v4497_v42 = vpack.c.bf16 %v4474_v2, %v4473_v31 }
 0x50c   : > { %5342 = vmatprep.mubr.msk.bf16.mxu0 %vm2484_vm13, %v4497_v42 }
 0x50f   : > { %v8419_v27 = vpop.f32.mrb[108].mxu1 }
 0x510   : > { %v8421_v4 = vpop.f32.mrb[109].mxu1 }
 0x511   : > { %v5156_v41 = vpop.f32.mrb[52].mxu0  ;;  %v8423_v58 = vpop.f32.mrb[110].mxu1 }
 0x512   : > { %v5157_v20 = vpop.f32.mrb[53].mxu0  ;;  %v8425_v19 = vpop.f32.mrb[111].mxu1 }
 0x513   : > { %v5158_v23 = vadd.f32 %v5157_v20, %v5156_v41  ;;  %v5159_v5 = vpop.f32.mrb[54].mxu0 }
 0x514   : > { %v5160_v17 = vpop.f32.mrb[55].mxu0 }
 0x515   : > { %v4242_v44 = vadd.f32 %v5158_v23, %v8208_v39  ;;  %v5161_v9 = vadd.f32 %v5160_v17, %v5159_v5 }
 0x517   : > { %v4403_v40 = vadd.f32 %v8299_v18, %v4242_v44  ;;  %v4245_v0 = vadd.f32 %v5161_v9, %v8208_v39 }
 0x519   : > { %v4406_v1 = vadd.f32 %v8304_v12, %v4245_v0  ;;  %v4475_v61 = vmax.f32 %v4403_v40, 0.0 }
 0x51b   : > { %v4476_v36 = vmax.f32 %v4406_v1, 0.0 }
 0x51d   : > { %v4498_v45 = vpack.c.bf16 %v4476_v36, %v4475_v61 }
 0x51f   : > { %5343 = vmatmul.mubr.msk.bf16.gmra.mrb[96].mxu0 %vm2484_vm13, %v4498_v45 }
 0x529   : > { %v5162_v47 = vpop.f32.mrb[56].mxu0 }
 0x52a   : > { %v5163_v11 = vpop.f32.mrb[57].mxu0 }
 0x52b   : > { %v5164_v55 = vadd.f32 %v5163_v11, %v5162_v47  ;;  %v5165_v21 = vpop.f32.mrb[58].mxu0 }
 0x52c   : > { %v5166_v32 = vpop.f32.mrb[59].mxu0 }
 0x52d   : > { %v4250_v48 = vadd.f32 %v5164_v55, %v8208_v39  ;;  %v5167_v52 = vadd.f32 %v5166_v32, %v5165_v21 }
 0x52f   : > { %v4411_v24 = vadd.f32 %v8349_v56, %v4250_v48  ;;  %v4253_v18 = vadd.f32 %v5167_v52, %v8208_v39 }
 0x531   : > { %v4414_v16 = vadd.f32 %v8355_v7, %v4253_v18  ;;  %v4477_v12 = vmax.f32 %v4411_v24, 0.0 }
 0x533   : > { %v4478_v49 = vmax.f32 %v4414_v16, 0.0 }
 0x535   : > { %v4499_v3 = vpack.c.bf16 %v4478_v49, %v4477_v12 }
 0x537   : > { %5346 = vmatprep.mubr.msk.bf16.mxu0 %vm2484_vm13, %v4499_v3 }
 0x541   : > { %v5168_v6 = vpop.f32.mrb[60].mxu0 }
 0x542   : > { %v5169_v50 = vpop.f32.mrb[61].mxu0 }
 0x543   : > { %v5170_v46 = vadd.f32 %v5169_v50, %v5168_v6  ;;  %v5171_v28 = vpop.f32.mrb[62].mxu0 }
 0x544   : > { %v5172_v51 = vpop.f32.mrb[63].mxu0 }
 0x545   : > { %v4258_v43 = vadd.f32 %v5170_v46, %v8208_v39  ;;  %v5173_v37 = vadd.f32 %v5172_v51, %v5171_v28 }
 0x547   : > { %v4419_v22 = vadd.f32 %v8347_v8, %v4258_v43  ;;  %v4261_v56 = vadd.f32 %v5173_v37, %v8208_v39 }
 0x549   : > { %v4422_v63 = vadd.f32 %v8352_v35, %v4261_v56  ;;  %v4479_v7 = vmax.f32 %v4419_v22, 0.0 }
 0x54b   : > { %v4480_v62 = vmax.f32 %v4422_v63, 0.0 }
 0x54d   : > { %v4500_v60 = vpack.c.bf16 %v4480_v62, %v4479_v7 }
 0x54f   : > { %5347 = vmatmul.mubr.msk.bf16.gmra.mrb[100].mxu0 %vm2484_vm13, %v4500_v60 }
 0x559   : > { %v5174_v25 = vpop.f32.mrb[64].mxu0 }
 0x55a   : > { %v5175_v29 = vpop.f32.mrb[65].mxu0 }
 0x55b   : > { %v5176_v14 = vadd.f32 %v5175_v29, %v5174_v25  ;;  %v5177_v54 = vpop.f32.mrb[66].mxu0 }
 0x55c   : > { %v5178_v26 = vpop.f32.mrb[67].mxu0 }
 0x55d   : > { %v4266_v34 = vadd.f32 %v5176_v14, %v8208_v39  ;;  %v5179_v13 = vadd.f32 %v5178_v26, %v5177_v54 }
 0x55f   : > { %v4427_v57 = vadd.f32 %v8389_v10, %v4266_v34  ;;  %v4269_v8 = vadd.f32 %v5179_v13, %v8208_v39 }
 0x561   : > { %v4430_v53 = vadd.f32 %v8397_v30, %v4269_v8  ;;  %v4481_v35 = vmax.f32 %v4427_v57, 0.0 }
 0x563   : > { %v4482_v38 = vmax.f32 %v4430_v53, 0.0 }
 0x565   : > { %v4501_v15 = vpack.c.bf16 %v4482_v38, %v4481_v35 }
 0x567   : > { %5350 = vmatprep.mubr.msk.bf16.mxu0 %vm2484_vm13, %v4501_v15 }
 0x571   : > { %v5180_v31 = vpop.f32.mrb[68].mxu0 }
 0x572   : > { %v5181_v2 = vpop.f32.mrb[69].mxu0 }
 0x573   : > { %v5182_v42 = vadd.f32 %v5181_v2, %v5180_v31  ;;  %v5183_v41 = vpop.f32.mrb[70].mxu0 }
 0x574   : > { %v5184_v20 = vpop.f32.mrb[71].mxu0 }
 0x575   : > { %v4274_v23 = vadd.f32 %v5182_v42, %v8208_v39  ;;  %v5185_v5 = vadd.f32 %v5184_v20, %v5183_v41 }
 0x577   : > { %v4435_v17 = vadd.f32 %v8387_v59, %v4274_v23  ;;  %v4277_v10 = vadd.f32 %v5185_v5, %v8208_v39 }
 0x579   : > { %v4438_v44 = vadd.f32 %v8393_v33, %v4277_v10  ;;  %v4483_v30 = vmax.f32 %v4435_v17, 0.0 }
 0x57b   : > { %v4484_v9 = vmax.f32 %v4438_v44, 0.0 }
 0x57d   : > { %v4502_v40 = vpack.c.bf16 %v4484_v9, %v4483_v30 }
 0x57f   : > { %5351 = vmatmul.mubr.msk.bf16.gmra.mrb[104].mxu0 %vm2484_vm13, %v4502_v40 }
 0x589   : > { %v5186_v0 = vpop.f32.mrb[72].mxu0 }
 0x58a   : > { %v5187_v1 = vpop.f32.mrb[73].mxu0 }
 0x58b   : > { %v5188_v61 = vadd.f32 %v5187_v1, %v5186_v0  ;;  %v5189_v36 = vpop.f32.mrb[74].mxu0 }
 0x58c   : > { %v5190_v45 = vpop.f32.mrb[75].mxu0 }
 0x58d   : > { %v5191_v47 = vadd.f32 %v5190_v45, %v5189_v36  ;;  %v4282_v11 = vadd.f32 %v5188_v61, %v8208_v39 }
 0x58f   : > { %v4443_v55 = vadd.f32 %v8421_v4, %v4282_v11  ;;  %v4285_v59 = vadd.f32 %v5191_v47, %v8208_v39 }
 0x591   : > { %v4446_v21 = vadd.f32 %v8425_v19, %v4285_v59  ;;  %v4485_v33 = vmax.f32 %v4443_v55, 0.0  ;;  %v8463_v19 = vld [vmem:[%s8563_s8] ss:$0 sm:$0xff] }
 0x593   : > { %v4486_v32 = vmax.f32 %v4446_v21, 0.0 }
 0x595   : > { %v4503_v48 = vpack.c.bf16 %v4486_v32, %v4485_v33 }
 0x597   : > { %5354 = vmatprep.mubr.msk.bf16.mxu0 %vm2484_vm13, %v4503_v48 }
 0x5a1   : > { %v5192_v52 = vpop.f32.mrb[76].mxu0 }
 0x5a2   : > { %v5193_v24 = vpop.f32.mrb[77].mxu0 }
 0x5a3   : > { %v5194_v18 = vadd.f32 %v5193_v24, %v5192_v52  ;;  %v5195_v16 = vpop.f32.mrb[78].mxu0 }
 0x5a4   : > { %v5196_v12 = vpop.f32.mrb[79].mxu0 }
 0x5a5   : > { %v4290_v49 = vadd.f32 %v5194_v18, %v8208_v39  ;;  %v5197_v3 = vadd.f32 %v5196_v12, %v5195_v16 }
 0x5a7   : > { %v4451_v6 = vadd.f32 %v8419_v27, %v4290_v49  ;;  %v4293_v4 = vadd.f32 %v5197_v3, %v8208_v39 }
 0x5a9   : > { %v4454_v50 = vadd.f32 %v8423_v58, %v4293_v4  ;;  %v5328_v46 = vpop.f32.mrb[80].mxu0  ;;  %v4487_v43 = vmax.f32 %v4451_v6, 0.0 }
 0x5aa   : > { %v4619_v28 = vadd.f32 %v5328_v46, %v8463_v19  ;;  %v4610_v51 = vpop.f32.mrb[81].mxu0 }
 0x5ab   : > { %v4488_v37 = vmax.f32 %v4454_v50, 0.0  ;;  %v4611_v22 = vadd.f32 %v8463_v19, %v4610_v51  ;;  %v5329_v56 = vpop.f32.mrb[82].mxu0 }
 0x5ac   : > { %v4622_v27 = vadd.f32 %v5329_v56, %v8463_v19  ;;  %v4613_v63 = vpop.f32.mrb[83].mxu0  ;;  %v4739_v62 = vmax.f32 %v4619_v28, 0.0 }
 0x5ad   : > { %v4504_v39 = vpack.c.bf16 %v4488_v37, %v4487_v43  ;;  %v4614_v7 = vadd.f32 %v8463_v19, %v4613_v63  ;;  %v4737_v25 = vmax.f32 %v4611_v22, 0.0 }
 0x5ae   : > { %v4740_v60 = vmax.f32 %v4622_v27, 0.0 }
 0x5af   : > { %v4738_v29 = vmax.f32 %v4614_v7, 0.0  ;;  %5355 = vmatmul.mubr.msk.bf16.gmra.mrb[108].mxu0 %vm2484_vm13, %v4504_v39 }
 0x5b0   : > { %v4772_v58 = vpack.c.bf16 %v4740_v60, %v4739_v62  ;;  %v8506_v60 = vld [vmem:[%s8564_s9] sm:$0xff]  }
 0x5b1   : > { %v4771_v14 = vpack.c.bf16 %v4738_v29, %v4737_v25  ;;  %v5332_v54 = vpop.f32.mrb[84].mxu0  ;;  %5250 = vmatprep.mubr.msk.bf16.mxu0 %vm690_vm2, %v8506_v60  ;;  %v4787_v25 = vld [vmem:[%s8565_s10] sm:$0xff]  ;;  %v4788_v29 = vld [vmem:[%s8565_s10 + $0x8] sm:$0xff] }
 0x5b2   : > { %v4635_v26 = vadd.f32 %v5332_v54, %v8463_v19  ;;  %v4626_v34 = vpop.f32.mrb[85].mxu0  ;;  %v4811_v62 = vsel %vm690_vm2, %v4772_v58, 0  ;;  %4791 = vperm.xlu0 %5387, %v4787_v25   ;;  %4796 = vperm.xlu1 %5388, %v4788_v29  }
 0x5b3   : > { %v4627_v13 = vadd.f32 %v8463_v19, %v4626_v34  ;;  %v5333_v57 = vpop.f32.mrb[86].mxu0  ;;  %v4808_v7 = vsel %vm690_vm2, %v4771_v14, 0 }
 0x5b4   : > { %v4638_v8 = vadd.f32 %v5333_v57, %v8463_v19  ;;  %v4629_v53 = vpop.f32.mrb[87].mxu0  ;;  %v4743_v38 = vmax.f32 %v4635_v26, 0.0 }
 0x5b5   : > { %v4630_v35 = vadd.f32 %v8463_v19, %v4629_v53  ;;  %v4741_v31 = vmax.f32 %v4627_v13, 0.0 }
 0x5b6   : > { %v4744_v15 = vmax.f32 %v4638_v8, 0.0 }
 0x5b7   : > { %v4742_v2 = vmax.f32 %v4630_v35, 0.0 }
 0x5b8   : > { %v8475_v42 = vpack.c.bf16 %v4744_v15, %v4743_v38 }
 0x5b9   : > { %v8477_v41 = vpack.c.bf16 %v4742_v2, %v4741_v31  ;;  %v5336_v20 = vpop.f32.mrb[88].mxu0 }
 0x5ba   : > { %v4651_v23 = vadd.f32 %v5336_v20, %v8463_v19  ;;  %v4642_v5 = vpop.f32.mrb[89].mxu0 }
 0x5bb   : > { %v4643_v17 = vadd.f32 %v8463_v19, %v4642_v5  ;;  %v5337_v10 = vpop.f32.mrb[90].mxu0  ;;  %v4814_v20 = vsel %vm690_vm2, %v8477_v41, 0 }
 0x5bc   : > { %v4654_v44 = vadd.f32 %v5337_v10, %v8463_v19  ;;  %v4645_v30 = vpop.f32.mrb[91].mxu0  ;;  %v4747_v40 = vmax.f32 %v4651_v23, 0.0  ;;  %v4817_v23 = vsel %vm690_vm2, %v8475_v42, 0 }
 0x5bd   : > { %v4646_v9 = vadd.f32 %v8463_v19, %v4645_v30  ;;  %v4745_v1 = vmax.f32 %v4643_v17, 0.0 }
 0x5be   : > { %v4748_v0 = vmax.f32 %v4654_v44, 0.0 }
 0x5bf   : > { %v4746_v61 = vmax.f32 %v4646_v9, 0.0 }
 0x5c0   : > { %v8483_v36 = vpack.c.bf16 %v4748_v0, %v4747_v40 }
 0x5c1   : > { %v8485_v45 = vpack.c.bf16 %v4746_v61, %v4745_v1 }
 0x5c3   : > { %v4820_v42 = vsel %vm690_vm2, %v8485_v45, 0 }
 0x5cf   : > { %v5340_v47 = vpop.f32.mrb[92].mxu0 }
 0x5d0   : > { %v4667_v11 = vadd.f32 %v5340_v47, %v8463_v19  ;;  %v4658_v55 = vpop.f32.mrb[93].mxu0 }
 0x5d1   : > { %v4659_v59 = vadd.f32 %v8463_v19, %v4658_v55  ;;  %v5341_v21 = vpop.f32.mrb[94].mxu0 }
 0x5d2   : > { %v4670_v33 = vadd.f32 %v5341_v21, %v8463_v19  ;;  %v4661_v32 = vpop.f32.mrb[95].mxu0  ;;  %v4751_v52 = vmax.f32 %v4667_v11, 0.0 }
 0x5d3   : > { %v4662_v48 = vadd.f32 %v8463_v19, %v4661_v32  ;;  %v4749_v18 = vmax.f32 %v4659_v59, 0.0  ;;  %v4823_v59 = vsel %vm690_vm2, %v8483_v36, 0 }
 0x5d4   : > { %v4752_v24 = vmax.f32 %v4670_v33, 0.0 }
 0x5d5   : > { %v4750_v16 = vmax.f32 %v4662_v48, 0.0 }
 0x5d6   : > { %v8491_v12 = vpack.c.bf16 %v4752_v24, %v4751_v52 }
 0x5d7   : > { %v8493_v49 = vpack.c.bf16 %v4750_v16, %v4749_v18 }
 0x5f2   : > { %v5344_v3 = vpop.f32.mrb[96].mxu0 }
 0x5f3   : > { %v4683_v6 = vadd.f32 %v5344_v3, %v8463_v19  ;;  %v4674_v4 = vpop.f32.mrb[97].mxu0 }
 0x5f4   : > { %v4675_v50 = vadd.f32 %v8463_v19, %v4674_v4  ;;  %v5345_v46 = vpop.f32.mrb[98].mxu0 }
 0x5f5   : > { %v4686_v28 = vadd.f32 %v5345_v46, %v8463_v19  ;;  %v4677_v51 = vpop.f32.mrb[99].mxu0  ;;  %v4755_v37 = vmax.f32 %v4683_v6, 0.0  ;;  %v4826_v46 = vsel %vm690_vm2, %v8493_v49, 0 }
 0x5f6   : > { %v4678_v43 = vadd.f32 %v8463_v19, %v4677_v51  ;;  %v4753_v56 = vmax.f32 %v4675_v50, 0.0 }
 0x5f7   : > { %v4756_v22 = vmax.f32 %v4686_v28, 0.0  ;;  %v4829_v28 = vsel %vm690_vm2, %v8491_v12, 0 }
 0x5f8   : > { %v4754_v27 = vmax.f32 %v4678_v43, 0.0 }
 0x5f9   : > { %v4780_v63 = vpack.c.bf16 %v4756_v22, %v4755_v37 }
 0x5fa   : > { %v4779_v39 = vpack.c.bf16 %v4754_v27, %v4753_v56 }
 0x5fc   : > { %5362 = vmatprep.subr.msk.bf16.mxu0 %vm690_vm2, %v4779_v39 }
 0x5fd   : > { %5235 = vmatpush3.bf16.xpose.msra.mxu0 %v4808_v7 }
 0x5fe   : > { %5363 = vmatprep.subr.msk.bf16.mxu0 %vm690_vm2, %v4780_v63 }
 0x605   : > { %5237 = vmatpush3.bf16.xpose.msra.mxu0 %v4811_v62 }
 0x622   : > { %v5348_v58 = vpop.f32.mrb[100].mxu0 }
 0x623   : > { %v4699_v14 = vadd.f32 %v5348_v58, %v8463_v19  ;;  %v4690_v54 = vpop.f32.mrb[101].mxu0 }
 0x624   : > { %v4691_v26 = vadd.f32 %v8463_v19, %v4690_v54  ;;  %v5349_v34 = vpop.f32.mrb[102].mxu0 }
 0x625   : > { %v4702_v13 = vadd.f32 %v5349_v34, %v8463_v19  ;;  %v4693_v57 = vpop.f32.mrb[103].mxu0  ;;  %v4759_v53 = vmax.f32 %v4699_v14, 0.0 }
 0x626   : > { %v4694_v8 = vadd.f32 %v8463_v19, %v4693_v57  ;;  %v4757_v38 = vmax.f32 %v4691_v26, 0.0 }
 0x627   : > { %v4760_v35 = vmax.f32 %v4702_v13, 0.0 }
 0x628   : > { %v4758_v15 = vmax.f32 %v4694_v8, 0.0 }
 0x629   : > { %v4782_v31 = vpack.c.bf16 %v4760_v35, %v4759_v53 }
 0x62a   : > { %v4781_v2 = vpack.c.bf16 %v4758_v15, %v4757_v38 }
 0x62c   : > { %5364 = vmatprep.subr.msk.bf16.mxu0 %vm690_vm2, %v4781_v2 }
 0x62d   : > { %5239 = vmatpush3.bf16.xpose.msra.mxu0 %v4814_v20 }
 0x62e   : > { %5365 = vmatprep.subr.msk.bf16.mxu0 %vm690_vm2, %v4782_v31 }
 0x631   : > { %v4797_v43 = vpop.permute.xlu1 %4796 }
 0x635   : > { %5241 = vmatpush3.bf16.xpose.msra.mxu0 %v4817_v23 }
 0x652   : > { %v5352_v5 = vpop.f32.mrb[104].mxu0 }
 0x653   : > { %v4715_v17 = vadd.f32 %v5352_v5, %v8463_v19  ;;  %v4706_v10 = vpop.f32.mrb[105].mxu0 }
 0x654   : > { %v4707_v44 = vadd.f32 %v8463_v19, %v4706_v10  ;;  %v5353_v30 = vpop.f32.mrb[106].mxu0 }
 0x655   : > { %v4718_v9 = vadd.f32 %v5353_v30, %v8463_v19  ;;  %v4709_v40 = vpop.f32.mrb[107].mxu0  ;;  %v4763_v41 = vmax.f32 %v4715_v17, 0.0 }
 0x656   : > { %v4710_v0 = vadd.f32 %v8463_v19, %v4709_v40  ;;  %v4761_v61 = vmax.f32 %v4707_v44, 0.0 }
 0x657   : > { %v4764_v1 = vmax.f32 %v4718_v9, 0.0 }
 0x658   : > { %v4762_v47 = vmax.f32 %v4710_v0, 0.0 }
 0x659   : > { %v4784_v11 = vpack.c.bf16 %v4764_v1, %v4763_v41 }
 0x65a   : > { %v4783_v55 = vpack.c.bf16 %v4762_v47, %v4761_v61 }
 0x65c   : > { %5366 = vmatprep.subr.msk.bf16.mxu0 %vm690_vm2, %v4783_v55 }
 0x65d   : > { %5243 = vmatpush3.bf16.xpose.msra.mxu0 %v4820_v42 }
 0x65e   : > { %5367 = vmatprep.subr.msk.bf16.mxu0 %vm690_vm2, %v4784_v11 }
 0x665   : > { %5245 = vmatpush3.bf16.xpose.msra.mxu0 %v4823_v59 }
 0x682   : > { %v5356_v21 = vpop.f32.mrb[108].mxu0 }
 0x683   : > { %v4731_v33 = vadd.f32 %v5356_v21, %v8463_v19  ;;  %v4722_v32 = vpop.f32.mrb[109].mxu0 }
 0x684   : > { %v4723_v48 = vadd.f32 %v8463_v19, %v4722_v32  ;;  %v5357_v52 = vpop.f32.mrb[110].mxu0 }
 0x685   : > { %v4734_v24 = vadd.f32 %v5357_v52, %v8463_v19  ;;  %v4725_v18 = vpop.f32.mrb[111].mxu0  ;;  %v4767_v16 = vmax.f32 %v4731_v33, 0.0 }
 0x686   : > { %v4726_v45 = vadd.f32 %v8463_v19, %v4725_v18  ;;  %v4765_v6 = vmax.f32 %v4723_v48, 0.0  ;;  %v4792_v19 = vpop.permute.xlu0 %4791 }
 0x687   : > { %v4768_v3 = vmax.f32 %v4734_v24, 0.0 }
 0x688   : > { %v4766_v4 = vmax.f32 %v4726_v45, 0.0 }
 0x689   : > { %v4786_v50 = vpack.c.bf16 %v4768_v3, %v4767_v16 }
 0x68a   : > { %v4785_v36 = vpack.c.bf16 %v4766_v4, %v4765_v6 }
 0x68c   : > { %5368 = vmatprep.subr.msk.bf16.mxu0 %vm690_vm2, %v4785_v36 }
 0x68d   : > { %5247 = vmatpush3.bf16.xpose.msra.mxu0 %v4826_v46 }
 0x68e   : > { %5369 = vmatprep.subr.msk.bf16.mxu0 %vm690_vm2, %v4786_v50 }
 0x695   : > { %5249 = vmatpush3.bf16.xpose.msra.mxu0 %v4829_v28 }
 0x69c   : > { %5251 = vmatmul.mubr.msk.bf16.vlgmr.msra.gmra.mrb[112].mxu0 %vm690_vm2, %v8506_v60 }
 0x76f   : > { %v4889_v51 = vpop.f32.mrb[112].mxu0 }
 0x770   : > { %v4890_v37 = vadd.f32 %v4889_v51, %v4792_v19  ;;  %v4891_v49 = vpop.f32.mrb[113].mxu0 }
 0x771   : > { %v4892_v22 = vadd.f32 %v4891_v49, %v4792_v19  ;;  %v4893_v56 = vpop.f32.mrb[114].mxu0 }
 0x772   : > { %4898 = vst [vmem:[%s386_s12] sm:$0xff] %v4890_v37  ;;  %v4894_v27 = vadd.f32 %v4893_v56, %v4797_v43  ;;  %v4895_v63 = vpop.f32.mrb[115].mxu0 }
 0x773   : > { %4899 = vst [vmem:[%s386_s12 + $0x8] sm:$0xff] %v4892_v22  ;;  %v4896_v12 = vadd.f32 %v4895_v63, %v4797_v43 }
 0x774   : > { %4900 = vst [vmem:[%s386_s12 + $0x10] sm:$0xff] %v4894_v27 }
 0x775   : > { %4901 = vst [vmem:[%s386_s12 + $0x18] sm:$0xff] %v4896_v12 }
 0x776 PF: > { %s21_s17 = sadd.s32 1, %s5428_s17  }
 0x777   : > { %p18_p4 = scmp.ge.s32.totalorder %s21_s17, 4  }
 0x779   :  { %20 = sbr.rel (!%p18_p4) target bundleno = 1 (0x1), region = 96 }

</bundles_post_ra>
